<compile_context>
chip_gen: v6e
topology: v6e:2x2x1
jax: 0.10.0
libtpu: 0.0.40
codegen_flags: <defaults>
</compile_context>

<pallas_src>
import jax
import jax.numpy as jnp
from jax.experimental import pallas as pl
from jax.experimental.pallas import tpu as pltpu

V_WIDTH = 32
OUT_DIM = 16
N_MLP = 6
HID = N_MLP * V_WIDTH          # 192 fused hidden features
FUSED_OUT = N_MLP * OUT_DIM    # 96 fused output features
MAX_TN = 8192                  # VMEM-safe on v7x (64 MiB part)
MIN_TN = 512                   # amortize per-step pipeline overhead

# Segment order inside the fused hidden / output: x, y, z, yz, xz, xy
# Coordinates each segment consumes (index into (x, y, z)):
_SEG_COORDS = [(0,), (1,), (2,), (1, 2), (0, 2), (0, 1)]


def vmlp_kernel(pts_ref, aux_ref, w2t_ref, out_ref):
    # pts_ref : (3, TN)  f32     aux_ref : (HID, 8) f32
    #   aux[:, 0:3] = W1 (zero cols for unused coords), aux[:, 3] = b1,
    #   aux[:FUSED_OUT, 4] = b2
    # w2t_ref : (FUSED_OUT, HID) bf16, block-diagonal transposed second layer
    # out_ref : (OUT_DIM, TN) f32
    pts = pts_ref[...]
    aux = aux_ref[...]

    x = pts[0:1, :]            # (1, TN)
    y = pts[1:2, :]
    z = pts[2:3, :]

    # First layer: VPU broadcasts (keep OFF the MXU — the MXU is the binding
    # unit). Single ReLU over the whole (HID, TN) hidden buffer.
    h = aux[:, 0:1] * x + aux[:, 1:2] * y + aux[:, 2:3] * z + aux[:, 3:4]
    h = jnp.maximum(h, 0.0)                                   # (HID, TN) f32

    # Second layer: one fused block-diagonal matmul, bf16 operands, f32 accum.
    # TODO(synk): if a v5e bundle dump shows the vst slot binding on the
    # (HID, TN) hidden spill, chunk HID and accumulate over K here.
    res = jnp.dot(w2t_ref[...], h.astype(jnp.bfloat16),
                  preferred_element_type=jnp.float32)         # (96, TN) f32
    res = res + aux[:FUSED_OUT, 4:5]                          # + b2

    x_f = res[0 * OUT_DIM:1 * OUT_DIM, :]
    y_f = res[1 * OUT_DIM:2 * OUT_DIM, :]
    z_f = res[2 * OUT_DIM:3 * OUT_DIM, :]
    yz_f = res[3 * OUT_DIM:4 * OUT_DIM, :]
    xz_f = res[4 * OUT_DIM:5 * OUT_DIM, :]
    xy_f = res[5 * OUT_DIM:6 * OUT_DIM, :]

    out_ref[...] = (x_f * yz_f + y_f * xz_f + z_f * xy_f).astype(out_ref.dtype)


def make_params(key):
    """Deterministic parameter init (6 MLPs, 2 layers each) — raw 24-tensor list."""
    params = []
    specs = [
        ("x", 1), ("y", 1), ("z", 1),      # vector decoders (in_dim=1)
        ("yz", 2), ("xz", 2), ("xy", 2),   # plane decoders (in_dim=2)
    ]
    for _, in_dim in specs:
        key, k1, k2 = jax.random.split(key, 3)
        w1 = jax.random.normal(k1, (in_dim, V_WIDTH), jnp.float32) * 0.5
        b1 = jnp.zeros((1, V_WIDTH), jnp.float32) + 0.01
        w2 = jax.random.normal(k2, (V_WIDTH, OUT_DIM), jnp.float32) * 0.2
        b2 = jnp.zeros((1, OUT_DIM), jnp.float32) + 0.02
        params.extend([w1, b1, w2, b2])
    return params


def pack_params(params):
    """Pack the 24 per-MLP tensors into 2 fused arrays for the kernel."""
    aux = jnp.zeros((HID, 8), jnp.float32)
    w2t = jnp.zeros((FUSED_OUT, HID), jnp.float32)

    for seg in range(N_MLP):
        w1, b1, w2, b2 = params[4 * seg: 4 * seg + 4]
        h0, h1 = seg * V_WIDTH, (seg + 1) * V_WIDTH
        o0, o1 = seg * OUT_DIM, (seg + 1) * OUT_DIM
        for row, coord in enumerate(_SEG_COORDS[seg]):
            aux = aux.at[h0:h1, coord].set(w1[row, :])
        aux = aux.at[h0:h1, 3].set(b1[0, :])
        aux = aux.at[o0:o1, 4].set(b2[0, :])
        w2t = w2t.at[o0:o1, h0:h1].set(w2.T)          # block-diagonal, transposed
    return aux, w2t.astype(jnp.bfloat16)


def _pick_tn(n):
    """Tile size: big enough to amortize step overhead, >=2 blocks when
    possible (v7x has 2 TensorCores sharded by the 'parallel' grid axis),
    capped at MAX_TN for v7x's 64 MiB VMEM."""
    half = -(-n // 2)                                  # cdiv(n, 2)
    tn = ((half + MIN_TN - 1) // MIN_TN) * MIN_TN      # round up to 512 lanes
    return max(MIN_TN, min(MAX_TN, tn))


@jax.jit
def vmlp_encoding(in_tensor, packed):
    """in_tensor: (N, 3) float32 (any N). Returns (N, OUT_DIM) float32."""
    aux, w2t = packed
    N = in_tensor.shape[0]
    tn = _pick_tn(N)
    n_blocks = pl.cdiv(N, tn)
    n_pad = n_blocks * tn

    # Pad then transpose (one fused XLA op) -> lane-dense (3, n_pad) input.
    pts = in_tensor
    if n_pad != N:
        pts = jnp.pad(pts, ((0, n_pad - N), (0, 0)))
    pts_t = jnp.transpose(pts)

    flops_per_pt = 7 * HID + 2 * HID * FUSED_OUT + 5 * OUT_DIM
    weight_bytes = aux.size * 4 + w2t.size * 2
    cost = pl.CostEstimate(
        flops=n_pad * flops_per_pt,
        transcendentals=0,
        bytes_accessed=n_pad * 4 * (3 + OUT_DIM) + weight_bytes,
    )

    out_t = pl.pallas_call(
        vmlp_kernel,
        out_shape=jax.ShapeDtypeStruct((OUT_DIM, n_pad), jnp.float32),
        grid_spec=pltpu.PrefetchScalarGridSpec(
            num_scalar_prefetch=0,
            grid=(n_blocks,),
            in_specs=[
                pl.BlockSpec((3, tn), lambda i: (0, i)),            # points
                pl.BlockSpec((HID, 8), lambda i: (0, 0)),           # W1 | b1 | b2
                pl.BlockSpec((FUSED_OUT, HID), lambda i: (0, 0)),   # W2^T (bf16)
            ],
            out_specs=pl.BlockSpec((OUT_DIM, tn), lambda i: (0, i)),
        ),
        compiler_params=pltpu.CompilerParams(
            dimension_semantics=("parallel",),
            vmem_limit_bytes=48 * 1024 * 1024,
        ),
        cost_estimate=cost,
    )(pts_t, aux, w2t)

    # Slice on the lane axis first (cheap), then transpose back to (N, 16).
    return jnp.transpose(out_t[:, :N])


def vmlp_reference(in_tensor, params):
    """Pure-JAX f32 reference matching the PyTorch forward semantics."""
    def mlp(inp, w1, b1, w2, b2):
        h = jnp.maximum(inp @ w1 + b1, 0.0)
        return h @ w2 + b2

    (xw1, xb1, xw2, xb2,
     yw1, yb1, yw2, yb2,
     zw1, zb1, zw2, zb2,
     yzw1, yzb1, yzw2, yzb2,
     xzw1, xzb1, xzw2, xzb2,
     xyw1, xyb1, xyw2, xyb2) = params

    x = in_tensor[..., 0:1]
    y = in_tensor[..., 1:2]
    z = in_tensor[..., 2:3]

    x_f = mlp(x, xw1, xb1, xw2, xb2)
    y_f = mlp(y, yw1, yb1, yw2, yb2)
    z_f = mlp(z, zw1, zb1, zw2, zb2)
    yz_f = mlp(jnp.concatenate([y, z], -1), yzw1, yzb1, yzw2, yzb2)
    xz_f = mlp(jnp.concatenate([x, z], -1), xzw1, xzb1, xzw2, xzb2)
    xy_f = mlp(jnp.concatenate([x, y], -1), xyw1, xyb1, xyw2, xyb2)
    return x_f * yz_f + y_f * xz_f + z_f * xy_f


if __name__ == "__main__":
    key = jax.random.PRNGKey(0)
    k_pts, k_par, k_pts2 = jax.random.split(key, 3)

    params = make_params(k_par)
    packed = pack_params(params)

    # Main case: 2 grid blocks (both v7x TensorCores busy).
    N = 2048
    in_tensor = jax.random.uniform(k_pts, (N, 3), jnp.float32, -1.0, 1.0)
    out = jax.block_until_ready(vmlp_encoding(in_tensor, packed))
    ref = vmlp_reference(in_tensor, params)
    assert out.shape == (N, OUT_DIM)
    # bf16 second-layer matmul -> relaxed tolerance vs the pure-f32 reference.
    assert jnp.allclose(out, ref, atol=3e-2, rtol=3e-2), "mismatch vs reference"

    # Ragged case: exercises the padding path (N not a multiple of the tile).
    N2 = 300
    in_tensor2 = jax.random.uniform(k_pts2, (N2, 3), jnp.float32, -1.0, 1.0)
    out2 = jax.block_until_ready(vmlp_encoding(in_tensor2, packed))
    ref2 = vmlp_reference(in_tensor2, params)
    assert out2.shape == (N2, OUT_DIM)
    assert jnp.allclose(out2, ref2, atol=3e-2, rtol=3e-2), "mismatch vs reference (ragged)"

    print("KERNEL_OK")
</pallas_src>

<mosaic_0001>
module attributes {stable_mosaic.version = 11 : i64} {
  func.func @vmlp_kernel(%arg0: i32, %arg1: memref<3x1024xf32, #tpu.memory_space<vmem>>, %arg2: memref<192x8xf32, #tpu.memory_space<vmem>>, %arg3: memref<96x192xbf16, #tpu.memory_space<vmem>>, %arg4: memref<16x1024xf32, #tpu.memory_space<vmem>>) attributes {dimension_semantics = [#tpu.dimension_semantics<parallel>], iteration_bounds = array<i64: 2>, scalar_prefetch = 0 : i64, scratch_operands = 0 : i64, tpu.core_type = #tpu.core_type<tc>, window_params = [{transform_indices = @transform_0, window_bounds = array<i64: 3, 1024>}, {pipeline_mode = #tpu.pipeline_mode<synchronous>, transform_indices = @transform_1, window_bounds = array<i64: 192, 8>}, {pipeline_mode = #tpu.pipeline_mode<synchronous>, transform_indices = @transform_2, window_bounds = array<i64: 96, 192>}, {transform_indices = @transform_3, window_bounds = array<i64: 16, 1024>}]} {
    %c0 = arith.constant 0 : index
    %c0_0 = arith.constant 0 : index
    %0 = vector.load %arg1[%c0, %c0_0] : memref<3x1024xf32, #tpu.memory_space<vmem>>, vector<3x1024xf32>
    %c0_1 = arith.constant 0 : index
    %c0_2 = arith.constant 0 : index
    %1 = vector.load %arg2[%c0_1, %c0_2] : memref<192x8xf32, #tpu.memory_space<vmem>>, vector<192x8xf32>
    %2 = vector.extract_strided_slice %0 {offsets = [0, 0], sizes = [1, 1024], strides = [1, 1]} : vector<3x1024xf32> to vector<1x1024xf32>
    %3 = vector.extract_strided_slice %0 {offsets = [1, 0], sizes = [1, 1024], strides = [1, 1]} : vector<3x1024xf32> to vector<1x1024xf32>
    %4 = vector.extract_strided_slice %0 {offsets = [2, 0], sizes = [1, 1024], strides = [1, 1]} : vector<3x1024xf32> to vector<1x1024xf32>
    %5 = vector.extract_strided_slice %1 {offsets = [0, 0], sizes = [192, 1], strides = [1, 1]} : vector<192x8xf32> to vector<192x1xf32>
    %6 = vector.broadcast %5 : vector<192x1xf32> to vector<192x1024xf32>
    %7 = vector.broadcast %2 : vector<1x1024xf32> to vector<192x1024xf32>
    %8 = arith.mulf %6, %7 : vector<192x1024xf32>
    %9 = vector.extract_strided_slice %1 {offsets = [0, 1], sizes = [192, 1], strides = [1, 1]} : vector<192x8xf32> to vector<192x1xf32>
    %10 = vector.broadcast %9 : vector<192x1xf32> to vector<192x1024xf32>
    %11 = vector.broadcast %3 : vector<1x1024xf32> to vector<192x1024xf32>
    %12 = arith.mulf %10, %11 : vector<192x1024xf32>
    %13 = arith.addf %8, %12 : vector<192x1024xf32>
    %14 = vector.extract_strided_slice %1 {offsets = [0, 2], sizes = [192, 1], strides = [1, 1]} : vector<192x8xf32> to vector<192x1xf32>
    %15 = vector.broadcast %14 : vector<192x1xf32> to vector<192x1024xf32>
    %16 = vector.broadcast %4 : vector<1x1024xf32> to vector<192x1024xf32>
    %17 = arith.mulf %15, %16 : vector<192x1024xf32>
    %18 = arith.addf %13, %17 : vector<192x1024xf32>
    %19 = vector.extract_strided_slice %1 {offsets = [0, 3], sizes = [192, 1], strides = [1, 1]} : vector<192x8xf32> to vector<192x1xf32>
    %20 = vector.broadcast %19 : vector<192x1xf32> to vector<192x1024xf32>
    %21 = arith.addf %18, %20 : vector<192x1024xf32>
    %cst = arith.constant 0.000000e+00 : f32
    %22 = vector.broadcast %cst : f32 to vector<192x1024xf32>
    %23 = arith.maximumf %21, %22 : vector<192x1024xf32>
    %c0_3 = arith.constant 0 : index
    %c0_4 = arith.constant 0 : index
    %24 = vector.load %arg3[%c0_3, %c0_4] : memref<96x192xbf16, #tpu.memory_space<vmem>>, vector<96x192xbf16>
    %25 = arith.truncf %23 : vector<192x1024xf32> to vector<192x1024xbf16>
    %cst_5 = arith.constant dense<0.000000e+00> : vector<96x1024xf32>
    %26 = tpu.matmul %24, %25, %cst_5 {dimension_numbers = #tpu.dot_dimension_numbers<[1], [0], [0], [1], [0, 0, 1, 1], [], []>} : vector<96x192xbf16>, vector<192x1024xbf16>, vector<96x1024xf32> -> vector<96x1024xf32>
    %27 = vector.extract_strided_slice %1 {offsets = [0, 4], sizes = [96, 1], strides = [1, 1]} : vector<192x8xf32> to vector<96x1xf32>
    %28 = vector.broadcast %27 : vector<96x1xf32> to vector<96x1024xf32>
    %29 = arith.addf %26, %28 : vector<96x1024xf32>
    %30 = vector.extract_strided_slice %29 {offsets = [0, 0], sizes = [16, 1024], strides = [1, 1]} : vector<96x1024xf32> to vector<16x1024xf32>
    %31 = vector.extract_strided_slice %29 {offsets = [16, 0], sizes = [16, 1024], strides = [1, 1]} : vector<96x1024xf32> to vector<16x1024xf32>
    %32 = vector.extract_strided_slice %29 {offsets = [32, 0], sizes = [16, 1024], strides = [1, 1]} : vector<96x1024xf32> to vector<16x1024xf32>
    %33 = vector.extract_strided_slice %29 {offsets = [48, 0], sizes = [16, 1024], strides = [1, 1]} : vector<96x1024xf32> to vector<16x1024xf32>
    %34 = vector.extract_strided_slice %29 {offsets = [64, 0], sizes = [16, 1024], strides = [1, 1]} : vector<96x1024xf32> to vector<16x1024xf32>
    %35 = vector.extract_strided_slice %29 {offsets = [80, 0], sizes = [16, 1024], strides = [1, 1]} : vector<96x1024xf32> to vector<16x1024xf32>
    %36 = arith.mulf %30, %33 : vector<16x1024xf32>
    %37 = arith.mulf %31, %34 : vector<16x1024xf32>
    %38 = arith.addf %36, %37 : vector<16x1024xf32>
    %39 = arith.mulf %32, %35 : vector<16x1024xf32>
    %40 = arith.addf %38, %39 : vector<16x1024xf32>
    %c0_6 = arith.constant 0 : index
    %c0_7 = arith.constant 0 : index
    %41 = vector.load %arg4[%c0_6, %c0_7] : memref<16x1024xf32, #tpu.memory_space<vmem>>, vector<16x1024xf32>
    tpu.vector_store %arg4[%c0_6, %c0_7], %40 {strides = array<i32>} : memref<16x1024xf32, #tpu.memory_space<vmem>>, vector<16x1024xf32>,
    return
  }
  func.func @transform_0(%arg0: i32) -> (i32, i32) {
    %c0_i32 = arith.constant 0 : i32
    %c0_i32_0 = arith.constant 0 : i32
    return %c0_i32, %arg0 : i32, i32
  }
  func.func @transform_1(%arg0: i32) -> (i32, i32) {
    %c0_i32 = arith.constant 0 : i32
    %c0_i32_0 = arith.constant 0 : i32
    %c0_i32_1 = arith.constant 0 : i32
    return %c0_i32, %c0_i32_0 : i32, i32
  }
  func.func @transform_2(%arg0: i32) -> (i32, i32) {
    %c0_i32 = arith.constant 0 : i32
    %c0_i32_0 = arith.constant 0 : i32
    %c0_i32_1 = arith.constant 0 : i32
    return %c0_i32, %c0_i32_0 : i32, i32
  }
  func.func @transform_3(%arg0: i32) -> (i32, i32) {
    %c0_i32 = arith.constant 0 : i32
    %c0_i32_0 = arith.constant 0 : i32
    return %c0_i32, %arg0 : i32, i32
  }
}

</mosaic_0001>

<bundles_post_ra>
// kernel: vmlp_encoding.1
= control target key start
LH: loop header
LB: loop body
LE: loop exit
PB: predicated region body
PF: predicated region fallthrough
CT: control target
= control target key end

     0   :  { %8 = vsyncpa [#allocation3], 0  ;;  %s6457_s0 = inlined_call_operand.vmem [shape: f32[3,2048], index: 0, kind: input, shape index: {}]   ;;  %s6458_s1 = inlined_call_operand.vmem [shape: f32[192,8], index: 1, kind: input, shape index: {}]   ;;  %s6459_s2 = inlined_call_operand.vmem [shape: bf16[96,192], index: 2, kind: input, shape index: {}]   ;;  %s6460_s3 = inlined_call_operand.hbm [shape: f32[16,2048], index: 3, kind: output, shape index: {}]  }
   0x1   :  { %10 = vsyncpa [#allocation3 + $0x1], 0  ;;  %s3223_s12 = smov 0   ;;  %s3225_s13 = smov 0  }
   0x2   :  { %s3227_s14 = smov 0   ;;  %s3229_s15 = smov 0  }
   0x3 LB: > { %s3244_s16 = sadd.s32 4294967295, %s3192_s15   ;;  %s2946_s17 = sadd.s32 4294967294, %s3192_s15   ;;  %s3192_s15 = sphi %s3229_s15, %s7308_s15   ;;  %s3188_s14 = sphi %s3227_s14, %s7307_s14   ;;  %s3184_s13 = sphi %s3225_s13, %s7306_s13   ;;  %s3180_s12 = sphi %s3223_s12, %s7305_s12  }
   0x4   : > { %s3248_s18 = sadd.s32 1, %s3192_s15   ;;  %s91_s19 = sadd.s32 1, %s3188_s14 }
   0x5   : > { %s88_s20 = ssub.s32 %s3192_s15, %s3248_s18  ;;  %p101_p0 = scmp.ne.s32.totalorder %s3188_s14, %s3184_s13 }
   0x6   : > { %p89_p1 = scmp.eq.s32.totalorder %s88_s20, 0  ;;  %p102_p2 = scmp.eq.s32.totalorder %s3244_s16, 1 }
   0x7   : > { %p107_p3 = scmp.ne.s32.totalorder %s3184_s13, %s3180_s12  ;;  %p108_p4 = scmp.eq.s32.totalorder %s2946_s17, 1 }
   0x8   : > { %s3259_s21 = scalar_select %p89_p1, %s3188_s14, %s91_s19  }
   0x9   : > { %p3261_p5 = por %p102_p2, %p101_p0  ;;  %p3265_p6 = por %p108_p4, %p107_p3 }
   0xa   : > { %p2949_p7 = scmp.ge.s32.totalorder %s3192_s15, 1  ;;  %p141_p8 = scmp.lt.s32.totalorder %s3192_s15, 3 }
   0xc   : > { %p142_p9 = pnand %p2949_p7, %p141_p8 }
   0xe   : > { %145 = sbr.rel (%p142_p9) target bundleno = 812 (0x32c), region = 32 }
  0x13   : > { %v3274_v0 = vld [vmem:[%s6458_s1 + $0x78] sm:$0xff]  ;;  %v3279_v1 = vld [vmem:[%s6458_s1 + $0x10] sm:$0xff]  ;;  %v6463_v2 = vmov 2   ;;  %v6461_v3 = vmov 0   ;;  %s2951_s28 = sshll.u32 %s3244_s16, 3  ;;  %v325_v4 = vlaneseq  ;;  %v3289_v5 = vld [vmem:[%s6458_s1 + $0x68] sm:$0xff] }
  0x14   : > { %3045 = vset.pattern.permute.xlu0 %v6463_v2  ;;  %3042 = vset.pattern.permute.xlu1 %v6461_v3  ;;  %p166_p10 = scmp.lt.s32.totalorder %s2951_s28, 15  ;;  %v3294_v6 = vld [vmem:[%s6458_s1 + $0x18] sm:$0xff]  ;;  %v3299_v7 = vld [vmem:[%s6458_s1 + $0x40] sm:$0xff]  ;;  %v6465_v13 = vmov 1   ;;  %v3338_v20 = vld [vmem:[%s6458_s1 + $0x70] sm:$0xff]  ;;  %v6467_v21 = vmov 3  }
  0x15   : > { %1202 = vperm.xlu0 %3045, %v3274_v0   ;;  %213 = vperm.xlu1 %3042, %v3279_v1   ;;  %v326_v8 = vshrl.u32 %v325_v4, 7  ;;  %v3315_v10 = vld [vmem:[%s6458_s1 + $0x38] sm:$0xff]  ;;  %v189_v16 = vld [vmem:[%s6458_s1 + $0x60] sm:$0xff]  ;;  %v3353_v24 = vld [vmem:[%s6458_s1 + $0x30] sm:$0xff]  ;;  %vm2383_vm0 = vcmask 523264   ;;  %s162_s5 = sand.u32 1, %s3184_s13  }
  0x16   : > { %s7310_s28 = smov (!%p166_p10, %s2951_s28), 15  ;;  %v188_v23 = vld [vmem:[%s6458_s1 + $0x58] sm:$0xff]  ;;  %v3359_v25 = vld [vmem:[%s6458_s1 + $0x20] sm:$0xff]  ;;  %v3382_v33 = vld [vmem:[%s6458_s1 + $0x8] sm:$0xff]  ;;  %s2950_s6 = sshll.u32 %s162_s5, 7 }
  0x17   : > { %s2952_s8 = sshll.u32 %s7310_s28, 2  ;;  %v3310_v9 = vsub.s32 4, %v326_v8  ;;  %v3318_v12 = vsub.s32 5, %v326_v8  ;;  %v3322_v14 = vsub.s32 0, %v326_v8  ;;  %v3329_v17 = vsub.s32 1, %v326_v8  ;;  %6719 = vst [vmem:[#allocation10_spill] sm:$0xff] %v3382_v33 }
  0x18   : > { %s3306_s11 = scalar_lea.vmem %s6457_s0, %s2952_s8  ;;  %v3386_v34 = vsub.s32 6, %v326_v8  ;;  %v3392_v35 = vsub.s32 2, %v326_v8  ;;  %v187_v50 = vld [vmem:[%s6458_s1 + $0x50] sm:$0xff]  ;;  %v3432_v51 = vld [vmem:[%s6458_s1 + $0x28] sm:$0xff]  ;;  %v3441_v52 = vld [vmem:[%s6458_s1 + $0xa0] sm:$0xff]  ;;  %s6319_s7 = scalar_lea.vmem [#allocation2], %s2950_s6 }
  0x19   : > { %1194 = vperm.xlu0 %3045, %v3289_v5   ;;  %218 = vperm.xlu1 %3042, %v3294_v6   ;;  %v175_v11 = vld [vmem:[%s3306_s11 + $0x10] sm:$0x77]  ;;  %v176_v26 = vld [vmem:[%s3306_s11 + $0x18] sm:$0x77]  ;;  %6727 = vst [vmem:[#allocation18_spill] sm:$0xff] %v3441_v52  ;;  %v3454_v54 = vld [vmem:[%s6458_s1] sm:$0xff] }
  0x1a   : > { %v348_v15 = vrot.slane %v175_v11, %v3310_v9  ;;  %v708_v19 = vrot.slane %v175_v11, %v3318_v12  ;;  %v356_v27 = vrot.slane %v176_v26, %v3310_v9  ;;  %v344_v28 = vrot.slane %v175_v11, %v3322_v14  ;;  %v196_v53 = vld [vmem:[%s6458_s1 + $0x98] sm:$0xff]  ;;  %6728 = vst [vmem:[#allocation19_spill] sm:$0xff] %v3454_v54  ;;  %v186_v55 = vld [vmem:[%s6458_s1 + $0x48] sm:$0xff]  ;;  %v195_v57 = vld [vmem:[%s6458_s1 + $0x90] sm:$0xff]  ;;  %s2994_s8 = sshll.u32 %s3244_s16, 10  ;;  %s2884_s9 = sshll.u32 %s6319_s7, 4  ;;  %s6411_s9 = int_to_ptr.vmem [resolvable:$true] %s2884_s9 }
  0x1b   : > { %v352_v29 = vrot.slane %v176_v26, %v3322_v14  ;;  %v1260_v36 = vrot.slane %v175_v11, %v3386_v34  ;;  %v716_v37 = vrot.slane %v176_v26, %v3318_v12  ;;  %v704_v38 = vrot.slane %v175_v11, %v3329_v17  ;;  %v3473_v56 = vld [vmem:[%s6458_s1 + $0xb8] sm:$0xff]  ;;  %v194_v58 = vld [vmem:[%s6458_s1 + $0x88] sm:$0xff]  ;;  %v3490_v59 = vld [vmem:[%s6458_s1 + $0xb0] sm:$0xff]  ;;  %s6408_s17 = scalar_lea.hbm %s6460_s3, %s2994_s8  ;;  %s6417_s19 = scalar_lea.sflag [#allocation3], %s162_s5 }
  0x1c   : > { %v3332_v18 = vrot.slane %v348_v15, %v3322_v14  ;;  %v3342_v22 = vrot.slane %v708_v19, %v3329_v17  ;;  %v3370_v30 = vrot.slane %v356_v27, %v3322_v14  ;;  %v3373_v31 = vrot.slane %v344_v28, %v3322_v14  ;;  %6729 = vst [vmem:[#allocation20_spill] sm:$0xff] %v3473_v56  ;;  %v3499_v60 = vld [vmem:[%s6458_s1 + $0xa8] sm:$0xff]  ;;  %v193_v61 = vld [vmem:[%s6458_s1 + $0x80] sm:$0xff]  ;;  %s3132_s20 = scalar_lea.vmem %s6411_s9, 2048  ;;  %s3199_s24 = smov [#allocation2]  }
  0x1d   : > { %1174 = vperm.xlu0 %3045, %v3299_v7   ;;  %278 = vperm.xlu1 %3042, %v3274_v0   ;;  %v3376_v32 = vrot.slane %v352_v29, %v3322_v14  ;;  %v712_v39 = vrot.slane %v176_v26, %v3329_v17  ;;  %v3399_v40 = vrot.slane %v1260_v36, %v3392_v35  ;;  %v173_v8 = vld [vmem:[%s3306_s11] sm:$0x77]  ;;  %p3133_p11 = scmp.ne.s32.totalorder %s6411_s9, %s3132_s20 }
  0x1e   : > { %6714 = vst [vmem:[#allocation5_spill] sm:$0xff] %v3332_v18  ;;  %6715 = vst [vmem:[#allocation6_spill] sm:$0xff] %v3342_v22  ;;  %v3402_v41 = vrot.slane %v716_v37, %v3329_v17  ;;  %v1268_v42 = vrot.slane %v176_v26, %v3386_v34  ;;  %v3406_v43 = vrot.slane %v704_v38, %v3329_v17 }
  0x1f   : > { %6716 = vst [vmem:[#allocation7_spill] sm:$0xff] %v3370_v30  ;;  %6717 = vst [vmem:[#allocation8_spill] sm:$0xff] %v3373_v31  ;;  %v1256_v44 = vrot.slane %v175_v11, %v3392_v35  ;;  %v3411_v45 = vrot.slane %v712_v39, %v3329_v17  ;;  %v1264_v48 = vrot.slane %v176_v26, %v3392_v35  ;;  %v174_v11 = vld [vmem:[%s3306_s11 + $0x8] sm:$0x77]  ;;  %p3134_p12 = pnand %p3133_p11, %p3261_p5  ;;  %s3136_s11 = sshll.u32 %s3199_s24, 4  ;;  %s3137_s11 = int_to_ptr.vmem [resolvable:$false] %s3136_s11 }
  0x20   : > { %6718 = vst [vmem:[#allocation9_spill] sm:$0xff] %v3376_v32  ;;  %6720 = vst [vmem:[#allocation11_spill] sm:$0xff] %v3399_v40  ;;  %v3414_v46 = vrot.slane %v1268_v42, %v3392_v35  ;;  %v1244_v15 = vrot.slane %v173_v8, %v3386_v34  ;;  %v332_v19 = vrot.slane %v173_v8, %v3310_v9  ;;  %s3138_s25 = scalar_lea.vmem %s3137_s11, 4096  ;;  %p3139_p0 = scmp.lt.s32.totalorder %s6411_s9, %s3137_s11 }
  0x21   : > { %1170 = vperm.xlu0 %3045, %v3315_v10   ;;  %3043 = vset.pattern.permute.xlu1 %v6465_v13  ;;  %6721 = vst [vmem:[#allocation12_spill] sm:$0xff] %v3402_v41  ;;  %6722 = vst [vmem:[#allocation13_spill] sm:$0xff] %v3406_v43  ;;  %v3417_v47 = vrot.slane %v1256_v44, %v3392_v35  ;;  %v3422_v49 = vrot.slane %v1264_v48, %v3392_v35  ;;  %p3135_p13 = pneg %p3134_p12  ;;  %p3140_p1 = scmp.lt.s32.totalorder %s3138_s25, %s3132_s20 }
  0x22   : > { %650 = vperm.xlu1 %3043, %v3274_v0   ;;  %6723 = vst [vmem:[#allocation14_spill] sm:$0xff] %v3411_v45  ;;  %6724 = vst [vmem:[#allocation15_spill] sm:$0xff] %v3414_v46  ;;  %v328_v27 = vrot.slane %v173_v8, %v3322_v14  ;;  %v336_v28 = vrot.slane %v174_v11, %v3322_v14  ;;  %v700_v36 = vrot.slane %v174_v11, %v3318_v12 }
  0x23   : > { %6725 = vst [vmem:[#allocation16_spill] sm:$0xff] %v3417_v47  ;;  %6726 = vst [vmem:[#allocation17_spill] sm:$0xff] %v3422_v49  ;;  %v688_v38 = vrot.slane %v173_v8, %v3329_v17  ;;  %v696_v39 = vrot.slane %v174_v11, %v3329_v17  ;;  %v3548_v42 = vrot.slane %v332_v19, %v3322_v14  ;;  %p3141_p2 = por %p3140_p1, %p3139_p0 }
  0x24   : > { %6730 = vst [vmem:[#allocation21_spill] sm:$0xff] %v3490_v59  ;;  %6731 = vst [vmem:[#allocation22_spill] sm:$0xff] %v3499_v60  ;;  %v3560_v48 = vrot.slane %v328_v27, %v3322_v14 }
  0x25   : > { %3061 = vset.pattern.permute.xlu0 %v6467_v21  ;;  %p3142_p3 = pnand %p3141_p2, %p3135_p13 }
  0x26   : > { %1742 = vperm.xlu0 %3061, %v189_v16   ;;  %3044 = vset.pattern.permute.xlu1 %v6463_v2  ;;  %6740 = vst [vmem:[#allocation31_spill] sm:$0xff] %v3560_v48 }
  0x27   : > { %1198 = vperm.xlu1 %3044, %v3338_v20  }
  0x2a   : > { %1738 = vperm.xlu0 %3061, %v188_v23  }
  0x2b   : > { %3046 = vset.pattern.permute.xlu1 %v6461_v3 }
  0x2c   : > { %263 = vperm.xlu1 %3046, %v189_v16  }
  0x2e   : > { %1718 = vperm.xlu0 %3061, %v3353_v24  }
  0x30   : > { %268 = vperm.xlu1 %3046, %v3289_v5  }
  0x32   : > { %1710 = vperm.xlu0 %3061, %v3359_v25  }
  0x34   : > { %3047 = vset.pattern.permute.xlu1 %v6465_v13 }
  0x35   : > { %642 = vperm.xlu1 %3047, %v3289_v5  }
  0x36   : > { %1702 = vperm.xlu0 %3061, %v3279_v1  }
  0x39   : > { %3048 = vset.pattern.permute.xlu1 %v6463_v2 }
  0x3a   : > { %1190 = vperm.xlu1 %3048, %v189_v16   ;;  %1698 = vperm.xlu0 %3061, %v3382_v33  }
  0x3e   : > { %3049 = vset.pattern.permute.xlu1 %v6467_v21  ;;  %3077 = vset.pattern.permute.xlu0 %v6465_v13 }
  0x3f   : > { %1750 = vperm.xlu1 %3049, %v3338_v20   ;;  %646 = vperm.xlu0 %3077, %v3338_v20  }
  0x43   : > { %1754 = vperm.xlu1 %3049, %v3274_v0   ;;  %638 = vperm.xlu0 %3077, %v189_v16   ;;  %v1252_v16 = vrot.slane %v174_v11, %v3386_v34  ;;  %v692_v34 = vrot.slane %v173_v8, %v3318_v12 }
  0x45   : > { %v3543_v37 = vrot.slane %v1252_v16, %v3392_v35 }
  0x47   : > { %3050 = vset.pattern.permute.xlu1 %v6461_v3  ;;  %634 = vperm.xlu0 %3077, %v188_v23   ;;  %6737 = vst [vmem:[#allocation28_spill] sm:$0xff] %v3543_v37 }
  0x48   : > { %258 = vperm.xlu1 %3050, %v188_v23  }
  0x4b   : > { %614 = vperm.xlu0 %3077, %v3353_v24  }
  0x4c   : > { %3051 = vset.pattern.permute.xlu1 %v6465_v13 }
  0x4d   : > { %630 = vperm.xlu1 %3051, %v187_v50  }
  0x4f   : > { %610 = vperm.xlu0 %3077, %v3432_v51  }
  0x51   : > { %3052 = vset.pattern.permute.xlu1 %v6463_v2 }
  0x52   : > { %1182 = vperm.xlu1 %3052, %v187_v50  }
  0x53   : > { %602 = vperm.xlu0 %3077, %v3294_v6  }
  0x56   : > { %1186 = vperm.xlu1 %3052, %v188_v23   ;;  %v1240_v23 = vrot.slane %v173_v8, %v3392_v35  ;;  %v3586_v8 = vrot.slane %v696_v39, %v3329_v17 }
  0x57   : > { %594 = vperm.xlu0 %3077, %v3382_v33  }
  0x58   : > { %v3554_v12 = vrot.slane %v1240_v23, %v3392_v35  ;;  %6746 = vst [vmem:[#allocation37_spill] sm:$0xff] %v3586_v8 }
  0x5a   : > { %3053 = vset.pattern.permute.xlu1 %v6467_v21  ;;  %6738 = vst [vmem:[#allocation29_spill] sm:$0xff] %v3554_v12 }
  0x5b   : > { %1746 = vperm.xlu1 %3053, %v3289_v5   ;;  %670 = vperm.xlu0 %3077, %v3441_v52  }
  0x5f   : > { %3054 = vset.pattern.permute.xlu1 %v6461_v3  ;;  %666 = vperm.xlu0 %3077, %v196_v53  }
  0x60   : > { %243 = vperm.xlu1 %3054, %v3299_v7  }
  0x63   : > { %3084 = vset.pattern.permute.xlu0 %v6461_v3 }
  0x64   : > { %3055 = vset.pattern.permute.xlu1 %v6465_v13  ;;  %203 = vperm.xlu0 %3084, %v3454_v54  }
  0x65   : > { %622 = vperm.xlu1 %3055, %v3299_v7  }
  0x68   : > { %208 = vperm.xlu0 %3084, %v3382_v33  }
  0x69   : > { %626 = vperm.xlu1 %3055, %v186_v55  }
  0x6c   : > { %273 = vperm.xlu0 %3084, %v3338_v20   ;;  %v340_v20 = vrot.slane %v174_v11, %v3310_v9  ;;  %v3540_v9 = vrot.slane %v1244_v15, %v3392_v35 }
  0x6d   : > { %3056 = vset.pattern.permute.xlu1 %v6463_v2 }
  0x6e   : > { %1178 = vperm.xlu1 %3056, %v186_v55   ;;  %6736 = vst [vmem:[#allocation27_spill] sm:$0xff] %v3540_v9  ;;  %v3551_v44 = vrot.slane %v340_v20, %v3322_v14 }
  0x70   : > { %253 = vperm.xlu0 %3084, %v187_v50  }
  0x72   : > { %3057 = vset.pattern.permute.xlu1 %v6467_v21 }
  0x73   : > { %1734 = vperm.xlu1 %3057, %v187_v50   ;;  %v3563_v50 = vrot.slane %v336_v28, %v3322_v14  ;;  %v3583_v14 = vrot.slane %v688_v38, %v3329_v17 }
  0x74   : > { %248 = vperm.xlu0 %3084, %v186_v55  }
  0x75   : > { %6741 = vst [vmem:[#allocation32_spill] sm:$0xff] %v3563_v50  ;;  %6745 = vst [vmem:[#allocation36_spill] sm:$0xff] %v3583_v14 }
  0x77   : > { %3058 = vset.pattern.permute.xlu1 %v6461_v3 }
  0x78   : > { %233 = vperm.xlu1 %3058, %v3353_v24   ;;  %223 = vperm.xlu0 %3084, %v3359_v25  }
  0x7c   : > { %238 = vperm.xlu1 %3058, %v3315_v10   ;;  %318 = vperm.xlu0 %3084, %v3473_v56  }
  0x80   : > { %3059 = vset.pattern.permute.xlu1 %v6465_v13  ;;  %293 = vperm.xlu0 %3084, %v195_v57   ;;  %v3571_v57 = vrot.slane %v700_v36, %v3329_v17 }
  0x81   : > { %618 = vperm.xlu1 %3059, %v3315_v10  }
  0x82   : > { %6744 = vst [vmem:[#allocation35_spill] sm:$0xff] %v3571_v57 }
  0x84   : > { %288 = vperm.xlu0 %3084, %v194_v58  }
  0x85   : > { %3060 = vset.pattern.permute.xlu1 %v6463_v2 }
  0x86   : > { %1166 = vperm.xlu1 %3060, %v3353_v24   ;;  %v1248_v24 = vrot.slane %v174_v11, %v3392_v35 }
  0x88   : > { %3088 = vset.pattern.permute.xlu0 %v6463_v2 }
  0x89   : > { %1230 = vperm.xlu0 %3088, %v3490_v59  }
  0x8a   : > { %3062 = vset.pattern.permute.xlu1 %v6467_v21 }
  0x8b   : > { %1726 = vperm.xlu1 %3062, %v3299_v7  }
  0x8d   : > { %1226 = vperm.xlu0 %3088, %v3499_v60  }
  0x8f   : > { %1730 = vperm.xlu1 %3062, %v186_v55   ;;  %v3568_v55 = vrot.slane %v692_v34, %v3329_v17 }
  0x90   : > { %v3505_v62 = vpop.permute.xlu1 %213  ;;  %v1203_v63 = vpop.permute.xlu0 %1202 }
  0x91   : > { %6732 = vst [vmem:[#allocation23_spill] sm:$0xff] %v3505_v62  ;;  %1206 = vperm.xlu0 %3088, %v193_v61   ;;  %6743 = vst [vmem:[#allocation34_spill] sm:$0xff] %v3568_v55  ;;  %v3580_v61 = vmul.f32 %v3543_v37, %v1203_v63  ;;  %v3589_v11 = vmul.f32 %v3554_v12, %v1203_v63  ;;  %v3596_v16 = vmul.f32 %v3548_v42, %v3505_v62 }
  0x92   : > { %v3600_v19 = vmul.f32 %v3551_v44, %v3505_v62  ;;  %v3604_v20 = vmul.f32 %v3560_v48, %v3505_v62  ;;  %v3608_v17 = vmul.f32 %v3563_v50, %v3505_v62  ;;  %v3611_v23 = vmul.f32 %v3399_v40, %v1203_v63 }
  0x93   : > { %3063 = vset.pattern.permute.xlu1 %v6461_v3  ;;  %6747 = vst [vmem:[#allocation38_spill] sm:$0xff] %v3596_v16  ;;  %v3627_v36 = vmul.f32 %v3417_v47, %v1203_v63  ;;  %v3630_v38 = vmul.f32 %v3422_v49, %v1203_v63 }
  0x94   : > { %228 = vperm.xlu1 %3063, %v3432_v51   ;;  %v3509_v0 = vpop.permute.xlu1 %218  ;;  %v3511_v4 = vpop.permute.xlu0 %1194  ;;  %6748 = vst [vmem:[#allocation39_spill] sm:$0xff] %v3600_v19  ;;  %6749 = vst [vmem:[#allocation40_spill] sm:$0xff] %v3604_v20 }
  0x95   : > { %6733 = vst [vmem:[#allocation24_spill] sm:$0xff] %v3509_v0  ;;  %3090 = vset.pattern.permute.xlu0 %v6467_v21  ;;  %6750 = vst [vmem:[#allocation41_spill] sm:$0xff] %v3608_v17  ;;  %v3620_v28 = vmul.f32 %v3540_v9, %v3511_v4  ;;  %v3624_v34 = vmul.f32 %v3543_v37, %v3511_v4  ;;  %v3635_v39 = vmul.f32 %v3554_v12, %v3511_v4 }
  0x96   : > { %1774 = vperm.xlu0 %3090, %v3441_v52   ;;  %v3658_v17 = vmul.f32 %v3563_v50, %v3509_v0  ;;  %v3662_v20 = vmul.f32 %v3399_v40, %v3511_v4  ;;  %v3666_v19 = vmul.f32 %v3414_v46, %v3511_v4  ;;  %v3674_v60 = vmul.f32 %v3417_v47, %v3511_v4 }
  0x97   : > { %6752 = vst [vmem:[#allocation43_spill] sm:$0xff] %v3620_v28  ;;  %6753 = vst [vmem:[#allocation44_spill] sm:$0xff] %v3624_v34  ;;  %v3678_v52 = vmul.f32 %v3422_v49, %v3511_v4 }
  0x98   : > { %3064 = vset.pattern.permute.xlu1 %v6465_v13  ;;  %v3516_v5 = vpop.permute.xlu1 %278  ;;  %v3518_v7 = vpop.permute.xlu0 %1174  ;;  %6754 = vst [vmem:[#allocation45_spill] sm:$0xff] %v3635_v39  ;;  %v3647_v13 = vmul.f32 %v3551_v44, %v3509_v0  ;;  %6759 = vst [vmem:[#allocation50_spill] sm:$0xff] %v3658_v17 }
  0x99   : > { %6734 = vst [vmem:[#allocation25_spill] sm:$0xff] %v3518_v7  ;;  %606 = vperm.xlu1 %3064, %v3359_v25   ;;  %6760 = vst [vmem:[#allocation51_spill] sm:$0xff] %v3662_v20  ;;  %v520_v17 = vmul.f32 %v3551_v44, %v3516_v5  ;;  %v524_v34 = vmul.f32 %v3370_v30, %v3516_v5  ;;  %v521_v28 = vmul.f32 %v3373_v31, %v3516_v5 }
  0x9a   : > { %1770 = vperm.xlu0 %3090, %v196_v53   ;;  %6757 = vst [vmem:[#allocation48_spill] sm:$0xff] %v3647_v13  ;;  %6761 = vst [vmem:[#allocation52_spill] sm:$0xff] %v3666_v19 }
  0x9b   : > { %6762 = vst [vmem:[#allocation53_spill] sm:$0xff] %v3674_v60  ;;  %6763 = vst [vmem:[#allocation54_spill] sm:$0xff] %v3678_v52  ;;  %v3705_v52 = vmul.f32 %v3543_v37, %v3518_v7  ;;  %v3709_v60 = vmul.f32 %v3554_v12, %v3518_v7 }
  0x9c   : > { %v3529_v26 = vpop.permute.xlu0 %1170 }
  0x9d   : > { %6735 = vst [vmem:[#allocation26_spill] sm:$0xff] %v3529_v26  ;;  %3065 = vset.pattern.permute.xlu1 %v6463_v2  ;;  %v3534_v29 = vpop.permute.xlu1 %650  ;;  %v3643_v2 = vmul.f32 %v3548_v42, %v3509_v0  ;;  %6767 = vst [vmem:[#allocation57_spill] sm:$0xff] %v3705_v52 }
  0x9e   : > { %1158 = vperm.xlu1 %3065, %v3359_v25   ;;  %v3557_v25 = vrot.slane %v1248_v24, %v3392_v35  ;;  %v3577_v35 = vmul.f32 %v3540_v9, %v1203_v63  ;;  %v3614_v24 = vmul.f32 %v3414_v46, %v1203_v63  ;;  %v880_v16 = vmul.f32 %v3571_v57, %v3534_v29 }
  0x9f   : > { %6756 = vst [vmem:[#allocation47_spill] sm:$0xff] %v3643_v2  ;;  %v879_v13 = vmul.f32 %v3586_v8, %v3534_v29  ;;  %v517_v2 = vmul.f32 %v3560_v48, %v3516_v5  ;;  %v882_v59 = vmul.f32 %v3342_v22, %v3534_v29  ;;  %6768 = vst [vmem:[#allocation58_spill] sm:$0xff] %v3709_v60 }
  0xa0   : > { %6739 = vst [vmem:[#allocation30_spill] sm:$0xff] %v3557_v25  ;;  %v3592_v15 = vmul.f32 %v3557_v25, %v1203_v63  ;;  %v3639_v3 = vmul.f32 %v3557_v25, %v3511_v4  ;;  %v519_v4 = vmul.f32 %v3563_v50, %v3516_v5  ;;  %v884_v19 = vmul.f32 %v3402_v41, %v3534_v29 }
  0xa1   : > { %v3565_v53 = vpop.permute.xlu0 %1742  ;;  %v1072_v54 = vadd.f32 %v880_v16, %v520_v17  ;;  %v883_v52 = vmul.f32 %v3411_v45, %v3534_v29  ;;  %v3732_v16 = vmul.f32 %v3540_v9, %v3529_v26 }
  0xa2   : > { %6742 = vst [vmem:[#allocation33_spill] sm:$0xff] %v3565_v53  ;;  %1162 = vperm.xlu1 %3065, %v3432_v51   ;;  %v3574_v58 = vpop.permute.xlu1 %1198  ;;  %6755 = vst [vmem:[#allocation46_spill] sm:$0xff] %v3639_v3  ;;  %v6766_v53 = vmov 1   ;;  %v1071_v60 = vadd.f32 %v879_v13, %v519_v4  ;;  %v3742_v13 = vmul.f32 %v3554_v12, %v3529_v26  ;;  %v6774_v4 = vmov 2  }
  0xa3   : > { %6771 = vst [vmem:[#allocation61_spill] sm:$0xff] %v3732_v16 }
  0xa4   : > { %6773 = vst [vmem:[#allocation63_spill] sm:$0xff] %v3742_v13 }
  0xa5   : > { %v3616_v27 = vpop.permute.xlu0 %1738 }
  0xa6   : > { %6751 = vst [vmem:[#allocation42_spill] sm:$0xff] %v3616_v27  ;;  %3066 = vset.pattern.permute.xlu1 %v6467_v21  ;;  %v3654_v21 = vmul.f32 %v3560_v48, %v3509_v0  ;;  %v518_v27 = vmul.f32 %v3548_v42, %v3516_v5 }
  0xa7   : > { %1722 = vperm.xlu1 %3066, %v3315_v10   ;;  %v3650_v63 = vpop.permute.xlu1 %263  ;;  %v878_v10 = vmul.f32 %v3568_v55, %v3534_v29 }
  0xa8   : > { %6758 = vst [vmem:[#allocation49_spill] sm:$0xff] %v3654_v21  ;;  %v877_v21 = vmul.f32 %v3583_v14, %v3534_v29 }
  0xa9   : > { %v3680_v56 = vpop.permute.xlu0 %1718  ;;  %v1070_v20 = vadd.f32 %v878_v10, %v518_v27  ;;  %v3728_v27 = vmul.f32 %v3557_v25, %v3518_v7 }
  0xaa   : > { %6764 = vst [vmem:[#allocation55_spill] sm:$0xff] %v3680_v56  ;;  %v3696_v56 = vmul.f32 %v3540_v9, %v3518_v7  ;;  %v1069_v39 = vadd.f32 %v877_v21, %v517_v2  ;;  %v3738_v2 = vmul.f32 %v3543_v37, %v3529_v26  ;;  %v1076_v21 = vadd.f32 %v884_v19, %v524_v34 }
  0xab   : > { %3067 = vset.pattern.permute.xlu1 %v6766_v53  ;;  %v3701_v33 = vpop.permute.xlu1 %268  ;;  %v522_v53 = vmul.f32 %v3332_v18, %v3516_v5  ;;  %6770 = vst [vmem:[#allocation60_spill] sm:$0xff] %v3728_v27  ;;  %v3782_v19 = vmul.f32 %v3399_v40, %v3574_v58  ;;  %v3803_v34 = vmul.f32 %v3422_v49, %v3574_v58 }
  0xac   : > { %6765 = vst [vmem:[#allocation56_spill] sm:$0xff] %v3696_v56  ;;  %v881_v56 = vmul.f32 %v3406_v43, %v3534_v29  ;;  %598 = vperm.xlu1 %3067, %v3279_v1   ;;  %v523_v29 = vmul.f32 %v3376_v32, %v3516_v5  ;;  %6772 = vst [vmem:[#allocation62_spill] sm:$0xff] %v3738_v2  ;;  %v3753_v5 = vmul.f32 %v3557_v25, %v3529_v26 }
  0xad   : > { %v3720_v3 = vpop.permute.xlu0 %1710  ;;  %v1074_v17 = vadd.f32 %v882_v59, %v522_v53  ;;  %v3749_v59 = vadd.f32 %v3580_v61, %v1072_v54  ;;  %v3767_v54 = vadd.f32 %v3589_v11, %v1069_v39  ;;  %v3770_v61 = vadd.f32 %v3592_v15, %v1071_v60  ;;  %6781 = vst [vmem:[#allocation70_spill] sm:$0xff] %v3782_v19 }
  0xae   : > { %6769 = vst [vmem:[#allocation59_spill] sm:$0xff] %v3720_v3  ;;  %v1073_v10 = vadd.f32 %v881_v56, %v521_v28  ;;  %v3746_v3 = vadd.f32 %v3577_v35, %v1070_v20  ;;  %6775 = vst [vmem:[#allocation64_spill] sm:$0xff] %v3753_v5  ;;  %v1075_v53 = vadd.f32 %v883_v52, %v523_v29  ;;  %v6788_v19 = vmov 3  }
  0xaf   : > { %v3760_v56 = vmul.f32 %v3540_v9, %v3574_v58  ;;  %v3764_v35 = vmul.f32 %v3543_v37, %v3574_v58  ;;  %v3774_v52 = vmul.f32 %v3554_v12, %v3574_v58  ;;  %v3785_v20 = vadd.f32 %v3611_v23, %v1074_v17  ;;  %6784 = vst [vmem:[#allocation73_spill] sm:$0xff] %v3803_v34 }
  0xb0   : > { %3068 = vset.pattern.permute.xlu1 %v6774_v4  ;;  %v643_v7 = vpop.permute.xlu1 %642  ;;  %v3789_v11 = vmul.f32 %v3414_v46, %v3574_v58  ;;  %v3792_v60 = vadd.f32 %v3614_v24, %v1076_v21  ;;  %v3796_v15 = vmul.f32 %v3417_v47, %v3574_v58  ;;  %v3799_v28 = vadd.f32 %v3627_v36, %v1073_v10 }
  0xb1   : > { %1150 = vperm.xlu1 %3068, %v3279_v1   ;;  %v3756_v2 = vpop.permute.xlu0 %1702  ;;  %6777 = vst [vmem:[#allocation66_spill] sm:$0xff] %v3760_v56  ;;  %6778 = vst [vmem:[#allocation67_spill] sm:$0xff] %v3764_v35  ;;  %v3778_v1 = vmul.f32 %v3557_v25, %v3574_v58  ;;  %v3806_v23 = vadd.f32 %v3630_v38, %v1075_v53  ;;  %v3810_v39 = vmul.f32 %v3332_v18, %v3505_v62 }
  0xb2   : > { %6776 = vst [vmem:[#allocation65_spill] sm:$0xff] %v3756_v2  ;;  %6779 = vst [vmem:[#allocation68_spill] sm:$0xff] %v3774_v52  ;;  %v3814_v24 = vmul.f32 %v3332_v18, %v3509_v0  ;;  %v862_v29 = vmul.f32 %v3568_v55, %v643_v7  ;;  %v864_v58 = vmul.f32 %v3571_v57, %v643_v7 }
  0xb3   : > { %6780 = vst [vmem:[#allocation69_spill] sm:$0xff] %v3778_v1  ;;  %6782 = vst [vmem:[#allocation71_spill] sm:$0xff] %v3789_v11  ;;  %v861_v38 = vmul.f32 %v3583_v14, %v643_v7  ;;  %v863_v21 = vmul.f32 %v3586_v8, %v643_v7  ;;  %v494_v10 = vmul.f32 %v3548_v42, %v3650_v63 }
  0xb4   : > { %6783 = vst [vmem:[#allocation72_spill] sm:$0xff] %v3796_v15  ;;  %6785 = vst [vmem:[#allocation74_spill] sm:$0xff] %v3810_v39  ;;  %v502_v53 = vmul.f32 %v3548_v42, %v3701_v33  ;;  %v496_v0 = vmul.f32 %v3551_v44, %v3650_v63  ;;  %v504_v62 = vmul.f32 %v3551_v44, %v3701_v33 }
  0xb5   : > { %6786 = vst [vmem:[#allocation75_spill] sm:$0xff] %v3814_v24  ;;  %1154 = vperm.xlu1 %3068, %v3294_v6   ;;  %v1191_v17 = vpop.permute.xlu1 %1190  ;;  %v3817_v36 = vpop.permute.xlu0 %1698  ;;  %v501_v24 = vmul.f32 %v3560_v48, %v3701_v33  ;;  %v503_v39 = vmul.f32 %v3563_v50, %v3701_v33  ;;  %v866_v26 = vmul.f32 %v3342_v22, %v643_v7 }
  0xb6   : > { %6787 = vst [vmem:[#allocation76_spill] sm:$0xff] %v3817_v36  ;;  %v868_v36 = vmul.f32 %v3402_v41, %v643_v7  ;;  %v506_v2 = vmul.f32 %v3332_v18, %v3701_v33  ;;  %v508_v34 = vmul.f32 %v3370_v30, %v3701_v33  ;;  %v865_v15 = vmul.f32 %v3406_v43, %v643_v7 }
  0xb7   : > { %v867_v11 = vmul.f32 %v3411_v45, %v643_v7  ;;  %v1054_v5 = vadd.f32 %v862_v29, %v502_v53  ;;  %v1056_v13 = vadd.f32 %v864_v58, %v504_v62  ;;  %v1053_v16 = vadd.f32 %v861_v38, %v501_v24  ;;  %v6794_v53 = vld [vmem:[#allocation43_spill] sm:$0xff] }
  0xb8   : > { %v1055_v1 = vadd.f32 %v863_v21, %v503_v39  ;;  %v493_v56 = vmul.f32 %v3560_v48, %v3650_v63  ;;  %v495_v27 = vmul.f32 %v3563_v50, %v3650_v63  ;;  %v505_v7 = vmul.f32 %v3373_v31, %v3701_v33 }
  0xb9   : > { %3069 = vset.pattern.permute.xlu1 %v6788_v19  ;;  %v507_v62 = vmul.f32 %v3376_v32, %v3701_v33  ;;  %v3859_v39 = vmul.f32 %v3332_v18, %v3650_v63  ;;  %v3863_v24 = vmul.f32 %v3370_v30, %v3650_v63  ;;  %v1060_v29 = vadd.f32 %v868_v36, %v508_v34  ;;  %v6795_v18 = vld [vmem:[#allocation44_spill] sm:$0xff]  ;;  %v6797_v34 = vld [vmem:[#allocation46_spill] sm:$0xff] }
  0xba   : > { %1714 = vperm.xlu1 %3069, %v3432_v51   ;;  %v3845_v52 = vpop.permute.xlu1 %1750  ;;  %v3847_v35 = vpop.permute.xlu0 %646  ;;  %v1058_v51 = vadd.f32 %v866_v26, %v506_v2  ;;  %v3867_v58 = vmul.f32 %v3373_v31, %v3650_v63  ;;  %v1057_v38 = vadd.f32 %v865_v15, %v505_v7  ;;  %v3871_v21 = vmul.f32 %v3376_v32, %v3650_v63  ;;  %v6796_v2 = vld [vmem:[#allocation45_spill] sm:$0xff] }
  0xbb   : > { %6789 = vst [vmem:[#allocation77_spill] sm:$0xff] %v3845_v52  ;;  %6790 = vst [vmem:[#allocation78_spill] sm:$0xff] %v3859_v39  ;;  %v1059_v33 = vadd.f32 %v867_v11, %v507_v62  ;;  %v3874_v52 = vadd.f32 %v6794_v53, %v1054_v5  ;;  %v3877_v26 = vadd.f32 %v6795_v18, %v1056_v13  ;;  %v6799_v31 = vmov 1   ;;  %v6800_v13 = vld [vmem:[#allocation19_spill] sm:$0xff] }
  0xbc   : > { %6791 = vst [vmem:[#allocation79_spill] sm:$0xff] %v3863_v24  ;;  %6792 = vst [vmem:[#allocation80_spill] sm:$0xff] %v3867_v58  ;;  %v3880_v30 = vadd.f32 %v6796_v2, %v1053_v16  ;;  %v3883_v36 = vadd.f32 %v6797_v34, %v1055_v1  ;;  %v1406_v63 = vmul.f32 %v3540_v9, %v1191_v17  ;;  %v6802_v1 = vld [vmem:[#allocation51_spill] sm:$0xff]  ;;  %v6805_v2 = vld [vmem:[#allocation52_spill] sm:$0xff] }
  0xbd   : > { %6793 = vst [vmem:[#allocation81_spill] sm:$0xff] %v3871_v21  ;;  %v1408_v5 = vmul.f32 %v3543_v37, %v1191_v17  ;;  %v1405_v11 = vmul.f32 %v3554_v12, %v1191_v17  ;;  %v1407_v18 = vmul.f32 %v3557_v25, %v1191_v17  ;;  %v3896_v16 = vmul.f32 %v3399_v40, %v1191_v17 }
  0xbe   : > { %6798 = vst [vmem:[#allocation43_spill] sm:$0xff] %v3883_v36  ;;  %3070 = vset.pattern.permute.xlu1 %v6799_v31  ;;  %v3886_v15 = vpop.permute.xlu1 %1754  ;;  %v3888_v7 = vpop.permute.xlu0 %638  ;;  %v3899_v62 = vadd.f32 %v6802_v1, %v1058_v51  ;;  %v3902_v53 = vmul.f32 %v3414_v46, %v1191_v17  ;;  %v3905_v34 = vadd.f32 %v6805_v2, %v1060_v29  ;;  %v6807_v1 = vld [vmem:[#allocation53_spill] sm:$0xff]  ;;  %v6809_v2 = vld [vmem:[#allocation54_spill] sm:$0xff] }
  0xbf   : > { %590 = vperm.xlu1 %3070, %v6800_v13   ;;  %6801 = vst [vmem:[#allocation44_spill] sm:$0xff] %v3896_v16  ;;  %v854_v32 = vmul.f32 %v3568_v55, %v3888_v7  ;;  %v856_v21 = vmul.f32 %v3571_v57, %v3888_v7  ;;  %v853_v58 = vmul.f32 %v3583_v14, %v3888_v7 }
  0xc0   : > { %6803 = vst [vmem:[#allocation45_spill] sm:$0xff] %v3899_v62  ;;  %6804 = vst [vmem:[#allocation46_spill] sm:$0xff] %v3902_v53  ;;  %v855_v40 = vmul.f32 %v3586_v8, %v3888_v7  ;;  %v3916_v51 = vmul.f32 %v3417_v47, %v1191_v17  ;;  %v3919_v46 = vadd.f32 %v6807_v1, %v1057_v38 }
  0xc1   : > { %6806 = vst [vmem:[#allocation19_spill] sm:$0xff] %v3905_v34  ;;  %v3922_v29 = vmul.f32 %v3422_v49, %v1191_v17  ;;  %v3925_v34 = vadd.f32 %v6809_v2, %v1059_v33  ;;  %v1046_v53 = vadd.f32 %v854_v32, %v494_v10  ;;  %v1048_v16 = vadd.f32 %v856_v21, %v496_v0 }
  0xc2   : > { %v3927_v62 = vpop.permute.xlu0 %634  ;;  %v1045_v24 = vadd.f32 %v853_v58, %v493_v56  ;;  %v1047_v39 = vadd.f32 %v855_v40, %v495_v27  ;;  %v3934_v38 = vmul.f32 %v3568_v55, %v3847_v35  ;;  %v3938_v17 = vmul.f32 %v3571_v57, %v3847_v35 }
  0xc3   : > { %6808 = vst [vmem:[#allocation51_spill] sm:$0xff] %v3922_v29  ;;  %6810 = vst [vmem:[#allocation52_spill] sm:$0xff] %v3925_v34  ;;  %v3929_v36 = vpop.permute.xlu1 %258  ;;  %3071 = vset.pattern.permute.xlu1 %v6774_v4  ;;  %v3942_v33 = vmul.f32 %v3583_v14, %v3847_v35  ;;  %v3946_v32 = vmul.f32 %v3586_v8, %v3847_v35  ;;  %v1598_v40 = vadd.f32 %v1406_v63, %v1046_v53  ;;  %v6823_v53 = vld [vmem:[#allocation33_spill] sm:$0xff] }
  0xc4   : > { %6811 = vst [vmem:[#allocation53_spill] sm:$0xff] %v3927_v62  ;;  %6812 = vst [vmem:[#allocation54_spill] sm:$0xff] %v3929_v36  ;;  %1142 = vperm.xlu1 %3071, %v6800_v13   ;;  %v1600_v0 = vadd.f32 %v1408_v5, %v1048_v16  ;;  %v1597_v27 = vadd.f32 %v1405_v11, %v1045_v24  ;;  %v1599_v56 = vadd.f32 %v1407_v18, %v1047_v39  ;;  %v6822_v16 = vld [vmem:[#allocation10_spill] sm:$0xff] }
  0xc5   : > { %6813 = vst [vmem:[#allocation82_spill] sm:$0xff] %v3938_v17  ;;  %6814 = vst [vmem:[#allocation83_spill] sm:$0xff] %v3942_v33  ;;  %v3951_v10 = vadd.f32 %v3886_v15, %v3746_v3  ;;  %v3955_v58 = vadd.f32 %v3886_v15, %v3749_v59  ;;  %v3959_v21 = vadd.f32 %v3886_v15, %v3767_v54 }
  0xc6   : > { %6815 = vst [vmem:[#allocation84_spill] sm:$0xff] %v3946_v32  ;;  %v3963_v1 = vadd.f32 %v3886_v15, %v3770_v61  ;;  %v3965_v63 = vpop.permute.xlu0 %614  ;;  %v846_v39 = vmul.f32 %v3568_v55, %v3927_v62  ;;  %v848_v3 = vmul.f32 %v3571_v57, %v3927_v62  ;;  %v845_v59 = vmul.f32 %v3583_v14, %v3927_v62 }
  0xc7   : > { %6816 = vst [vmem:[#allocation85_spill] sm:$0xff] %v3951_v10  ;;  %6817 = vst [vmem:[#allocation86_spill] sm:$0xff] %v3955_v58  ;;  %v847_v24 = vmul.f32 %v3586_v8, %v3927_v62  ;;  %v486_v54 = vmul.f32 %v3548_v42, %v3929_v36  ;;  %v488_v61 = vmul.f32 %v3551_v44, %v3929_v36 }
  0xc8   : > { %6818 = vst [vmem:[#allocation87_spill] sm:$0xff] %v3959_v21  ;;  %6819 = vst [vmem:[#allocation88_spill] sm:$0xff] %v3963_v1  ;;  %v485_v5 = vmul.f32 %v3560_v48, %v3929_v36  ;;  %v487_v11 = vmul.f32 %v3563_v50, %v3929_v36  ;;  %v3983_v18 = vpop.permute.xlu1 %630  ;;  %1146 = vperm.xlu1 %3071, %v6822_v16   ;;  %v3987_v2 = vadd.f32 %v6823_v53, %v1598_v40 }
  0xc9   : > { %6820 = vst [vmem:[#allocation89_spill] sm:$0xff] %v3965_v63  ;;  %6821 = vst [vmem:[#allocation90_spill] sm:$0xff] %v3983_v18  ;;  %v3990_v49 = vadd.f32 %v6823_v53, %v1600_v0  ;;  %v3993_v47 = vadd.f32 %v6823_v53, %v1597_v27  ;;  %v3996_v62 = vadd.f32 %v6823_v53, %v1599_v56 }
  0xca   : > { %v4000_v34 = vmul.f32 %v3342_v22, %v3847_v35  ;;  %v4004_v36 = vmul.f32 %v3402_v41, %v3847_v35  ;;  %v4008_v40 = vmul.f32 %v3406_v43, %v3847_v35  ;;  %v4012_v0 = vmul.f32 %v3411_v45, %v3847_v35  ;;  %v4014_v27 = vpop.permute.xlu0 %610 }
  0xcb   : > { %6828 = vst [vmem:[#allocation94_spill] sm:$0xff] %v4014_v27  ;;  %v1038_v32 = vadd.f32 %v846_v39, %v486_v54  ;;  %v1037_v33 = vadd.f32 %v845_v59, %v485_v5  ;;  %v1039_v17 = vadd.f32 %v847_v24, %v487_v11  ;;  %v4030_v39 = vmul.f32 %v3568_v55, %v3983_v18 }
  0xcc   : > { %6824 = vst [vmem:[#allocation10_spill] sm:$0xff] %v4000_v34  ;;  %6825 = vst [vmem:[#allocation91_spill] sm:$0xff] %v4004_v36  ;;  %v1040_v36 = vadd.f32 %v848_v3, %v488_v61  ;;  %3072 = vset.pattern.permute.xlu1 %v6788_v19  ;;  %v4034_v3 = vmul.f32 %v3571_v57, %v3983_v18  ;;  %v4038_v59 = vmul.f32 %v3583_v14, %v3983_v18 }
  0xcd   : > { %6826 = vst [vmem:[#allocation92_spill] sm:$0xff] %v4008_v40  ;;  %6827 = vst [vmem:[#allocation93_spill] sm:$0xff] %v4012_v0  ;;  %v4025_v10 = vpop.permute.xlu1 %1182  ;;  %1706 = vperm.xlu1 %3072, %v3294_v6   ;;  %v4042_v24 = vmul.f32 %v3586_v8, %v3983_v18  ;;  %v4048_v6 = vmul.f32 %v3568_v55, %v3965_v63  ;;  %v4052_v61 = vmul.f32 %v3571_v57, %v3965_v63 }
  0xce   : > { %6829 = vst [vmem:[#allocation95_spill] sm:$0xff] %v4025_v10  ;;  %v4044_v54 = vpop.permute.xlu0 %602  ;;  %v4056_v5 = vmul.f32 %v3583_v14, %v3965_v63  ;;  %v4060_v11 = vmul.f32 %v3586_v8, %v3965_v63  ;;  %v4064_v34 = vmul.f32 %v3568_v55, %v4014_v27  ;;  %v4068_v29 = vmul.f32 %v3571_v57, %v4014_v27 }
  0xcf   : > { %6830 = vst [vmem:[#allocation96_spill] sm:$0xff] %v4044_v54  ;;  %6831 = vst [vmem:[#allocation97_spill] sm:$0xff] %v4048_v6  ;;  %v4072_v16 = vmul.f32 %v3583_v14, %v4014_v27  ;;  %v4076_v56 = vmul.f32 %v3586_v8, %v4014_v27  ;;  %v4080_v0 = vadd.f32 %v3886_v15, %v3785_v20  ;;  %v6844_v27 = vmov 0  }
  0xd0   : > { %6832 = vst [vmem:[#allocation98_spill] sm:$0xff] %v4052_v61  ;;  %6833 = vst [vmem:[#allocation99_spill] sm:$0xff] %v4056_v5  ;;  %v4084_v35 = vadd.f32 %v3886_v15, %v3792_v60  ;;  %v4088_v40 = vadd.f32 %v3886_v15, %v3799_v28  ;;  %v4092_v63 = vadd.f32 %v3886_v15, %v3806_v23 }
  0xd1   : > { %6834 = vst [vmem:[#allocation100_spill] sm:$0xff] %v4060_v11  ;;  %6835 = vst [vmem:[#allocation101_spill] sm:$0xff] %v4064_v34  ;;  %v4094_v18 = vpop.permute.xlu1 %1186  ;;  %3073 = vset.pattern.permute.xlu1 %v6844_v27  ;;  %v858_v20 = vmul.f32 %v3342_v22, %v3888_v7  ;;  %v857_v60 = vmul.f32 %v3406_v43, %v3888_v7  ;;  %v859_v28 = vmul.f32 %v3411_v45, %v3888_v7 }
  0xd2   : > { %6836 = vst [vmem:[#allocation102_spill] sm:$0xff] %v4068_v29  ;;  %6837 = vst [vmem:[#allocation103_spill] sm:$0xff] %v4072_v16  ;;  %v6845_v16 = vld [vmem:[#allocation21_spill] sm:$0xff]  ;;  %v4106_v23 = vpop.permute.xlu0 %594  ;;  %v1398_v15 = vmul.f32 %v3540_v9, %v4094_v18  ;;  %v1400_v29 = vmul.f32 %v3543_v37, %v4094_v18  ;;  %v1397_v22 = vmul.f32 %v3554_v12, %v4094_v18 }
  0xd3   : > { %6838 = vst [vmem:[#allocation104_spill] sm:$0xff] %v4076_v56  ;;  %6839 = vst [vmem:[#allocation105_spill] sm:$0xff] %v4080_v0  ;;  %v860_v56 = vmul.f32 %v3402_v41, %v3888_v7  ;;  %313 = vperm.xlu1 %3073, %v6845_v16   ;;  %v1399_v41 = vmul.f32 %v3557_v25, %v4094_v18  ;;  %v4118_v43 = vmul.f32 %v3540_v9, %v4025_v10  ;;  %v6870_v0 = vld [vmem:[#allocation45_spill] sm:$0xff] }
  0xd4   : > { %6840 = vst [vmem:[#allocation106_spill] sm:$0xff] %v4084_v35  ;;  %6841 = vst [vmem:[#allocation107_spill] sm:$0xff] %v4088_v40  ;;  %v4122_v7 = vmul.f32 %v3543_v37, %v4025_v10  ;;  %v4126_v45 = vmul.f32 %v3554_v12, %v4025_v10  ;;  %v4130_v34 = vmul.f32 %v3557_v25, %v4025_v10  ;;  %v6857_v12 = vld [vmem:[#allocation50_spill] sm:$0xff]  ;;  %v6861_v40 = vld [vmem:[#allocation79_spill] sm:$0xff]  ;;  %v6876_v35 = vmax.f32 %v3996_v62, 0.0 }
  0xd5   : > { %6842 = vst [vmem:[#allocation108_spill] sm:$0xff] %v4092_v63  ;;  %6843 = vst [vmem:[#allocation109_spill] sm:$0xff] %v4094_v18  ;;  %v782_v11 = vmul.f32 %v3568_v55, %v4044_v54  ;;  %v784_v18 = vmul.f32 %v3571_v57, %v4044_v54  ;;  %v781_v5 = vmul.f32 %v3583_v14, %v4044_v54  ;;  %v6860_v63 = vld [vmem:[#allocation78_spill] sm:$0xff] }
  0xd6   : > { %6846 = vst [vmem:[#allocation110_spill] sm:$0xff] %v4106_v23  ;;  %6847 = vst [vmem:[#allocation111_spill] sm:$0xff] %v4130_v34  ;;  %v783_v61 = vmul.f32 %v3586_v8, %v4044_v54  ;;  %v1590_v6 = vadd.f32 %v1398_v15, %v1038_v32  ;;  %v1592_v37 = vadd.f32 %v1400_v29, %v1040_v36  ;;  %v4142_v10 = vpop.permute.xlu1 %1746  ;;  %v4145_v25 = vpop.permute.xlu0 %670  ;;  %v6850_v15 = vld [vmem:[#allocation43_spill] sm:$0xff]  ;;  %v6855_v34 = vld [vmem:[#allocation49_spill] sm:$0xff] }
  0xd7   : > { %6848 = vst [vmem:[#allocation112_spill] sm:$0xff] %v4142_v10  ;;  %3074 = vset.pattern.permute.xlu1 %v6799_v31  ;;  %6849 = vst [vmem:[#allocation113_spill] sm:$0xff] %v4145_v25  ;;  %v1589_v1 = vadd.f32 %v1397_v22, %v1037_v33  ;;  %v1591_v21 = vadd.f32 %v1399_v41, %v1039_v17  ;;  %v1894_v36 = vadd.f32 %v4142_v10, %v3874_v52  ;;  %v6851_v22 = vld [vmem:[#allocation47_spill] sm:$0xff]  ;;  %v6853_v17 = vld [vmem:[#allocation48_spill] sm:$0xff] }
  0xd8   : > { %678 = vperm.xlu1 %3074, %v6845_v16   ;;  %v1896_v29 = vadd.f32 %v4142_v10, %v3877_v26  ;;  %v1893_v32 = vadd.f32 %v4142_v10, %v3880_v30  ;;  %v1895_v9 = vadd.f32 %v4142_v10, %v6850_v15  ;;  %v4159_v41 = vadd.f32 %v782_v11, %v6851_v22  ;;  %v6859_v54 = vld [vmem:[#allocation42_spill] sm:$0xff] }
  0xd9   : > { %v4162_v33 = vadd.f32 %v784_v18, %v6853_v17  ;;  %v4165_v58 = vadd.f32 %v781_v5, %v6855_v34  ;;  %v4168_v52 = vadd.f32 %v783_v61, %v6857_v12  ;;  %v4171_v26 = vadd.f32 %v6859_v54, %v1590_v6 }
  0xda   : > { %6852 = vst [vmem:[#allocation43_spill] sm:$0xff] %v4159_v41  ;;  %v4174_v30 = vadd.f32 %v6859_v54, %v1592_v37  ;;  %v1050_v15 = vadd.f32 %v858_v20, %v6860_v63  ;;  %v1052_v11 = vadd.f32 %v860_v56, %v6861_v40  ;;  %v4178_v22 = vpop.permute.xlu0 %666  ;;  %v4181_v18 = vadd.f32 %v6859_v54, %v1589_v1  ;;  %v6864_v63 = vld [vmem:[#allocation20_spill] sm:$0xff] }
  0xdb   : > { %6854 = vst [vmem:[#allocation47_spill] sm:$0xff] %v4162_v33  ;;  %6856 = vst [vmem:[#allocation48_spill] sm:$0xff] %v4165_v58  ;;  %v4184_v34 = vadd.f32 %v6859_v54, %v1591_v21  ;;  %v4188_v12 = vmul.f32 %v3568_v55, %v4106_v23  ;;  %v4192_v37 = vmul.f32 %v3571_v57, %v4106_v23  ;;  %v4194_v6 = vpop.permute.xlu1 %243  ;;  %v2086_v40 = vmax.f32 %v1894_v36, 0.0  ;;  %v6865_v20 = vld [vmem:[#allocation80_spill] sm:$0xff] }
  0xdc   : > { %6858 = vst [vmem:[#allocation49_spill] sm:$0xff] %v4168_v52  ;;  %6862 = vst [vmem:[#allocation50_spill] sm:$0xff] %v4178_v22  ;;  %682 = vperm.xlu1 %3074, %v6864_v63   ;;  %v2088_v56 = vmax.f32 %v1896_v29, 0.0  ;;  %v2085_v61 = vmax.f32 %v1893_v32, 0.0  ;;  %v2087_v1 = vmax.f32 %v1895_v9, 0.0  ;;  %v4199_v21 = vmul.f32 %v3583_v14, %v4106_v23  ;;  %v6866_v52 = vld [vmem:[#allocation81_spill] sm:$0xff] }
  0xdd   : > { %6863 = vst [vmem:[#allocation78_spill] sm:$0xff] %v4194_v6  ;;  %v4203_v5 = vmul.f32 %v3586_v8, %v4106_v23  ;;  %v1049_v17 = vadd.f32 %v857_v60, %v6865_v20  ;;  %v4207_v58 = vadd.f32 %v859_v28, %v6866_v52  ;;  %v6868_v29 = vld [vmem:[#allocation44_spill] sm:$0xff]  ;;  %v6869_v9 = vld [vmem:[#allocation46_spill] sm:$0xff]  ;;  %v4217_v23 = vadd.f32 %v4142_v10, %v6870_v0  ;;  %v6871_v60 = vld [vmem:[#allocation19_spill] sm:$0xff] }
  0xde   : > { %v1602_v32 = vadd.f32 %v6868_v29, %v1050_v15  ;;  %v1604_v41 = vadd.f32 %v6869_v9, %v1052_v11  ;;  %v4221_v28 = vadd.f32 %v4142_v10, %v6871_v60  ;;  %v6873_v15 = vmax.f32 %v3987_v2, 0.0 }
  0xdf   : > { %6867 = vst [vmem:[#allocation79_spill] sm:$0xff] %v4207_v58  ;;  %v4223_v52 = vpop.permute.xlu0 %203  ;;  %v6874_v11 = vmax.f32 %v3990_v49, 0.0  ;;  %v6875_v9 = vmax.f32 %v3993_v47, 0.0  ;;  %v4240_v60 = vpack.c.bf16 %v2087_v1, %v6876_v35  ;;  %v462_v2 = vmul.f32 %v3548_v42, %v4194_v6  ;;  %v6900_v58 = vld [vmem:[#allocation82_spill] sm:$0xff] }
  0xe0   : > { %6872 = vst [vmem:[#allocation20_spill] sm:$0xff] %v4223_v52  ;;  %3075 = vset.pattern.permute.xlu1 %v6774_v4  ;;  %v4228_v20 = vpack.c.bf16 %v2086_v40, %v6873_v15  ;;  %v4242_v54 = vpop.permute.xlu1 %622  ;;  %v464_v49 = vmul.f32 %v3551_v44, %v4194_v6  ;;  %v461_v40 = vmul.f32 %v3560_v48, %v4194_v6 }
  0xe1   : > { %v4232_v29 = vpack.c.bf16 %v2088_v56, %v6874_v11  ;;  %v4236_v0 = vpack.c.bf16 %v2085_v61, %v6875_v9  ;;  %6877 = vst [vmem:[#allocation80_spill] sm:$0xff] %v4242_v54  ;;  %1234 = vperm.xlu1 %3075, %v6864_v63   ;;  %v463_v47 = vmul.f32 %v3563_v50, %v4194_v6 }
  0xe2   : > { %v822_v62 = vmul.f32 %v3568_v55, %v4242_v54  ;;  %v824_v35 = vmul.f32 %v3571_v57, %v4242_v54  ;;  %v4258_v63 = vadd.f32 %v6823_v53, %v1602_v32  ;;  %v4261_v56 = vadd.f32 %v6823_v53, %v1604_v41 }
  0xe3   : > { %v821_v61 = vmul.f32 %v3583_v14, %v4242_v54  ;;  %v823_v1 = vmul.f32 %v3586_v8, %v4242_v54  ;;  %v4269_v15 = vmul.f32 %v3568_v55, %v4145_v25  ;;  %v4273_v11 = vmul.f32 %v3571_v57, %v4145_v25  ;;  %v4275_v9 = vpop.permute.xlu0 %208 }
  0xe4   : > { %6880 = vst [vmem:[#allocation46_spill] sm:$0xff] %v4275_v9  ;;  %v4279_v41 = vmul.f32 %v3583_v14, %v4145_v25  ;;  %v4283_v32 = vmul.f32 %v3586_v8, %v4145_v25  ;;  %v4287_v36 = vmul.f32 %v3568_v55, %v4178_v22  ;;  %v4291_v33 = vmul.f32 %v3571_v57, %v4178_v22 }
  0xe5   : > { %6878 = vst [vmem:[#allocation81_spill] sm:$0xff] %v4269_v15  ;;  %6879 = vst [vmem:[#allocation44_spill] sm:$0xff] %v4273_v11  ;;  %v4293_v15 = vpop.permute.xlu1 %626  ;;  %3076 = vset.pattern.permute.xlu1 %v6788_v19  ;;  %v4298_v11 = vmul.f32 %v3548_v42, %v4223_v52  ;;  %v4302_v25 = vmul.f32 %v3551_v44, %v4223_v52  ;;  %v4315_v6 = vmul.f32 %v3560_v48, %v4223_v52 }
  0xe6   : > { %6881 = vst [vmem:[#allocation45_spill] sm:$0xff] %v4279_v41  ;;  %6882 = vst [vmem:[#allocation19_spill] sm:$0xff] %v4283_v32  ;;  %v4306_v32 = vmul.f32 %v3583_v14, %v4178_v22  ;;  %1694 = vperm.xlu1 %3076, %v6800_v13   ;;  %v1016_v41 = vadd.f32 %v824_v35, %v464_v49  ;;  %v4319_v54 = vmul.f32 %v3563_v50, %v4223_v52 }
  0xe7   : > { %6883 = vst [vmem:[#allocation114_spill] sm:$0xff] %v4287_v36  ;;  %6884 = vst [vmem:[#allocation115_spill] sm:$0xff] %v4291_v33  ;;  %v4310_v36 = vmul.f32 %v3586_v8, %v4178_v22  ;;  %v1014_v33 = vadd.f32 %v822_v62, %v462_v2  ;;  %v4326_v22 = vadd.f32 %v4142_v10, %v3919_v46  ;;  %v4328_v13 = vpop.permute.xlu0 %273 }
  0xe8   : > { %6885 = vst [vmem:[#allocation116_spill] sm:$0xff] %v4293_v15  ;;  %6886 = vst [vmem:[#allocation117_spill] sm:$0xff] %v4298_v11  ;;  %v1015_v11 = vadd.f32 %v823_v1, %v463_v47  ;;  %v4332_v2 = vmul.f32 %v3548_v42, %v4275_v9  ;;  %v4336_v49 = vmul.f32 %v3551_v44, %v4275_v9  ;;  %v6895_v1 = vld [vmem:[#allocation56_spill] sm:$0xff] }
  0xe9   : > { %6887 = vst [vmem:[#allocation118_spill] sm:$0xff] %v4302_v25  ;;  %6888 = vst [vmem:[#allocation119_spill] sm:$0xff] %v4306_v32  ;;  %v1013_v25 = vadd.f32 %v821_v61, %v461_v40  ;;  %v4322_v32 = vadd.f32 %v3916_v51, %v1049_v17  ;;  %v4340_v40 = vmul.f32 %v3560_v48, %v4275_v9  ;;  %v4354_v35 = vpop.permute.xlu1 %1178 }
  0xea   : > { %6889 = vst [vmem:[#allocation120_spill] sm:$0xff] %v4310_v36  ;;  %6890 = vst [vmem:[#allocation121_spill] sm:$0xff] %v4315_v6  ;;  %v4344_v51 = vmul.f32 %v3563_v50, %v4275_v9  ;;  %v510_v46 = vmul.f32 %v3548_v42, %v4328_v13  ;;  %v512_v17 = vmul.f32 %v3551_v44, %v4328_v13  ;;  %3078 = vset.pattern.permute.xlu1 %v6844_v27  ;;  %v6897_v36 = vld [vmem:[#allocation57_spill] sm:$0xff]  ;;  %v6899_v6 = vld [vmem:[#allocation18_spill] sm:$0xff] }
  0xeb   : > { %6891 = vst [vmem:[#allocation122_spill] sm:$0xff] %v4319_v54  ;;  %6892 = vst [vmem:[#allocation123_spill] sm:$0xff] %v4322_v32  ;;  %v509_v47 = vmul.f32 %v3560_v48, %v4328_v13  ;;  %v511_v62 = vmul.f32 %v3563_v50, %v4328_v13  ;;  %v4359_v61 = vmul.f32 %v3568_v55, %v4293_v15  ;;  %303 = vperm.xlu1 %3078, %v6899_v6   ;;  %v6901_v32 = vld [vmem:[#allocation83_spill] sm:$0xff]  ;;  %v4376_v16 = vpop.permute.xlu0 %253 }
  0xec   : > { %6893 = vst [vmem:[#allocation124_spill] sm:$0xff] %v4326_v22  ;;  %6894 = vst [vmem:[#allocation125_spill] sm:$0xff] %v4354_v35  ;;  %v4362_v9 = vadd.f32 %v6895_v1, %v1014_v33  ;;  %v4366_v52 = vmul.f32 %v3571_v57, %v4293_v15  ;;  %v4369_v54 = vadd.f32 %v6897_v36, %v1016_v41  ;;  %v6902_v22 = vld [vmem:[#allocation84_spill] sm:$0xff]  ;;  %v6904_v1 = vld [vmem:[#allocation58_spill] sm:$0xff] }
  0xed   : > { %v1062_v10 = vadd.f32 %v3934_v38, %v510_v46  ;;  %v1064_v53 = vadd.f32 %v6900_v58, %v512_v17  ;;  %v1061_v27 = vadd.f32 %v6901_v32, %v509_v47  ;;  %v1063_v55 = vadd.f32 %v6902_v22, %v511_v62  ;;  %6903 = vst [vmem:[#allocation18_spill] sm:$0xff] %v4376_v16  ;;  %v6907_v38 = vld [vmem:[#allocation60_spill] sm:$0xff]  ;;  %v6909_v58 = vld [vmem:[#allocation66_spill] sm:$0xff]  ;;  %v6910_v46 = vld [vmem:[#allocation67_spill] sm:$0xff] }
  0xee   : > { %6896 = vst [vmem:[#allocation56_spill] sm:$0xff] %v4362_v9  ;;  %6898 = vst [vmem:[#allocation57_spill] sm:$0xff] %v4369_v54  ;;  %v4380_v33 = vmul.f32 %v3583_v14, %v4293_v15  ;;  %v4383_v9 = vadd.f32 %v6904_v1, %v1013_v25  ;;  %v4387_v36 = vmul.f32 %v3586_v8, %v4293_v15  ;;  %v6911_v17 = vld [vmem:[#allocation68_spill] sm:$0xff]  ;;  %v6912_v62 = vld [vmem:[#allocation69_spill] sm:$0xff] }
  0xef   : > { %v4390_v41 = vadd.f32 %v6907_v38, %v1015_v11  ;;  %v1614_v32 = vadd.f32 %v6909_v58, %v1062_v10  ;;  %v1616_v22 = vadd.f32 %v6910_v46, %v1064_v53  ;;  %v1613_v47 = vadd.f32 %v6911_v17, %v1061_v27  ;;  %v4404_v38 = vpop.permute.xlu1 %1734  ;;  %v6914_v10 = vld [vmem:[#allocation22_spill] sm:$0xff]  ;;  %v6915_v53 = vld [vmem:[#allocation77_spill] sm:$0xff]  ;;  %v4411_v17 = vpop.permute.xlu0 %248 }
  0xf0   : > { %6905 = vst [vmem:[#allocation82_spill] sm:$0xff] %v4383_v9  ;;  %6906 = vst [vmem:[#allocation83_spill] sm:$0xff] %v4387_v36  ;;  %v1615_v54 = vadd.f32 %v6912_v62, %v1063_v55  ;;  %v478_v14 = vmul.f32 %v3548_v42, %v4376_v16  ;;  %v480_v25 = vmul.f32 %v3551_v44, %v4376_v16  ;;  %308 = vperm.xlu1 %3078, %v6914_v10  }
  0xf1   : > { %6908 = vst [vmem:[#allocation84_spill] sm:$0xff] %v4390_v41  ;;  %v477_v1 = vmul.f32 %v3560_v48, %v4376_v16  ;;  %v479_v11 = vmul.f32 %v3563_v50, %v4376_v16  ;;  %6913 = vst [vmem:[#allocation58_spill] sm:$0xff] %v4404_v38  ;;  %v1902_v27 = vadd.f32 %v6915_v53, %v1614_v32 }
  0xf2   : > { %v1904_v55 = vadd.f32 %v6915_v53, %v1616_v22  ;;  %v1901_v58 = vadd.f32 %v6915_v53, %v1613_v47  ;;  %v1903_v46 = vadd.f32 %v6915_v53, %v1615_v54  ;;  %6916 = vst [vmem:[#allocation60_spill] sm:$0xff] %v4411_v17  ;;  %v1030_v62 = vadd.f32 %v4030_v39, %v478_v14  ;;  %v6917_v53 = vld [vmem:[#allocation111_spill] sm:$0xff]  ;;  %v6918_v14 = vld [vmem:[#allocation85_spill] sm:$0xff] }
  0xf3   : > { %v1032_v15 = vadd.f32 %v4034_v3, %v480_v25  ;;  %v1029_v16 = vadd.f32 %v4038_v59, %v477_v1  ;;  %v1031_v41 = vadd.f32 %v4042_v24, %v479_v11  ;;  %v2094_v9 = vmax.f32 %v1902_v27, 0.0  ;;  %v6920_v59 = vld [vmem:[#allocation86_spill] sm:$0xff]  ;;  %v6922_v1 = vld [vmem:[#allocation87_spill] sm:$0xff] }
  0xf4   : > { %v2096_v8 = vmax.f32 %v1904_v55, 0.0  ;;  %v2093_v57 = vmax.f32 %v1901_v58, 0.0  ;;  %v2095_v32 = vmax.f32 %v1903_v46, 0.0  ;;  %v1582_v22 = vadd.f32 %v4118_v43, %v1030_v62  ;;  %3079 = vset.pattern.permute.xlu1 %v6799_v31  ;;  %v6924_v55 = vld [vmem:[#allocation88_spill] sm:$0xff]  ;;  %v4430_v46 = vpop.permute.xlu1 %233 }
  0xf5   : > { %v1584_v47 = vadd.f32 %v4122_v7, %v1032_v15  ;;  %v1581_v54 = vadd.f32 %v4126_v45, %v1029_v16  ;;  %v1583_v36 = vadd.f32 %v6917_v53, %v1031_v41  ;;  %v6919_v39 = vmax.f32 %v6918_v14, 0.0  ;;  %6926 = vst [vmem:[#allocation66_spill] sm:$0xff] %v4430_v46  ;;  %674 = vperm.xlu1 %3079, %v6914_v10  }
  0xf6   : > { %v6921_v25 = vmax.f32 %v6920_v59, 0.0  ;;  %v6923_v11 = vmax.f32 %v6922_v1, 0.0  ;;  %v6925_v58 = vmax.f32 %v6924_v55, 0.0  ;;  %v1870_v45 = vadd.f32 %v4404_v38, %v1582_v22  ;;  %v6939_v1 = vld [vmem:[#allocation27_spill] sm:$0xff] }
  0xf7   : > { %v2242_v3 = vpack.c.bf16 %v6919_v39, %v2094_v9  ;;  %v1872_v16 = vadd.f32 %v4404_v38, %v1584_v47  ;;  %v1869_v7 = vadd.f32 %v4404_v38, %v1581_v54  ;;  %v1871_v15 = vadd.f32 %v4404_v38, %v1583_v36  ;;  %v4437_v9 = vpop.permute.xlu0 %223  ;;  %v6936_v47 = vld [vmem:[#allocation8_spill] sm:$0xff] }
  0xf8   : > { %v2244_v24 = vpack.c.bf16 %v6921_v25, %v2096_v8  ;;  %v2241_v27 = vpack.c.bf16 %v6923_v11, %v2093_v57  ;;  %v2243_v43 = vpack.c.bf16 %v6925_v58, %v2095_v32  ;;  %6927 = vst [vmem:[#allocation67_spill] sm:$0xff] %v4437_v9  ;;  %v470_v57 = vmul.f32 %v3548_v42, %v4411_v17 }
  0xf9   : > { %2402 = vmatprep.subr.bf16.mxu0 %v2242_v3  ;;  %v4443_v8 = vadd.f32 %v4188_v12, %v4332_v2  ;;  %v4447_v41 = vadd.f32 %v4192_v37, %v4336_v49  ;;  %v2062_v36 = vmax.f32 %v1870_v45, 0.0  ;;  %v2064_v53 = vmax.f32 %v1872_v16, 0.0  ;;  %v6932_v2 = vld [vmem:[#allocation5_spill] sm:$0xff]  ;;  %3080 = vset.pattern.permute.xlu1 %v6774_v4 }
  0xfa   : > { %2495 = vmatprep.subr.bf16.mxu1 %v2244_v24  ;;  %2403 = vmatpush1.bf16.msra.mxu0 %v2241_v27  ;;  %v4452_v62 = vadd.f32 %v4199_v21, %v4340_v40  ;;  %v4456_v32 = vadd.f32 %v4203_v5, %v4344_v51  ;;  %v472_v12 = vmul.f32 %v3551_v44, %v4411_v17  ;;  %v4469_v40 = vpop.permute.xlu1 %238  ;;  %v2061_v5 = vmax.f32 %v1869_v7, 0.0 }
  0xfb   : > { %6928 = vst [vmem:[#allocation68_spill] sm:$0xff] %v4443_v8  ;;  %6929 = vst [vmem:[#allocation69_spill] sm:$0xff] %v4447_v41  ;;  %2496 = vmatpush1.bf16.msra.mxu1 %v2243_v43  ;;  %2404 = vmatprep.subr.bf16.mxu0 %v4228_v20  ;;  %v469_v37 = vmul.f32 %v3560_v48, %v4411_v17  ;;  %v4466_v49 = vmul.f32 %v6932_v2, %v4328_v13  ;;  %v2063_v20 = vmax.f32 %v1871_v15, 0.0  ;;  %v4472_v51 = vpop.permute.xlu0 %318  ;;  %v6945_v15 = vld [vmem:[#allocation30_spill] sm:$0xff] }
  0xfc   : > { %6930 = vst [vmem:[#allocation22_spill] sm:$0xff] %v4452_v62  ;;  %6931 = vst [vmem:[#allocation111_spill] sm:$0xff] %v4456_v32  ;;  %2497 = vmatprep.subr.bf16.mxu1 %v4232_v29  ;;  %v6935_v29 = vld [vmem:[#allocation7_spill] sm:$0xff]  ;;  %v4480_v54 = vmul.f32 %v6936_v47, %v4328_v13  ;;  %1222 = vperm.xlu1 %3080, %v6899_v6   ;;  %v6937_v14 = vmax.f32 %v4171_v26, 0.0  ;;  %v6938_v3 = vmax.f32 %v4174_v30, 0.0  ;;  %v6940_v6 = vld [vmem:[#allocation28_spill] sm:$0xff] }
  0xfd   : > { %6933 = vst [vmem:[#allocation85_spill] sm:$0xff] %v4469_v40  ;;  %6934 = vst [vmem:[#allocation86_spill] sm:$0xff] %v4472_v51  ;;  %v4476_v22 = vmul.f32 %v6935_v29, %v4328_v13  ;;  %v1022_v25 = vadd.f32 %v4359_v61, %v470_v57  ;;  %v471_v24 = vmul.f32 %v3563_v50, %v4411_v17  ;;  %v6941_v26 = vld [vmem:[#allocation9_spill] sm:$0xff]  ;;  %v6943_v45 = vmax.f32 %v4181_v18, 0.0 }
  0xfe   : > { %v2226_v39 = vpack.c.bf16 %v6937_v14, %v2062_v36  ;;  %v2228_v59 = vpack.c.bf16 %v6938_v3, %v2064_v53  ;;  %2405 = vmatpush1.bf16.msra.mxu0 %v4236_v0  ;;  %v1382_v11 = vmul.f32 %v6939_v1, %v4354_v35  ;;  %v1384_v27 = vmul.f32 %v6940_v6, %v4354_v35 }
  0xff   : > { %2498 = vmatpush1.bf16.msra.mxu1 %v4240_v60  ;;  %v4498_v55 = vmul.f32 %v6941_v26, %v4328_v13  ;;  %v1024_v61 = vadd.f32 %v4366_v52, %v472_v12  ;;  %v1021_v0 = vadd.f32 %v4380_v33, %v469_v37  ;;  %v6942_v60 = vld [vmem:[#allocation29_spill] sm:$0xff]  ;;  %v2225_v16 = vpack.c.bf16 %v6943_v45, %v2061_v5  ;;  %v4514_v52 = vpop.permute.xlu0 %293  ;;  %v4516_v33 = vpop.permute.xlu1 %618  ;;  %v6948_v12 = vld [vmem:[#allocation83_spill] sm:$0xff] }
 0x100   : > { %2406 = vmatprep.subr.bf16.mxu0 %v2226_v39  ;;  %2499 = vmatprep.subr.bf16.mxu1 %v2228_v59  ;;  %v1381_v58 = vmul.f32 %v6942_v60, %v4354_v35  ;;  %v6944_v7 = vmax.f32 %v4184_v34, 0.0  ;;  %v1383_v57 = vmul.f32 %v6945_v15, %v4354_v35  ;;  %v446_v36 = vmul.f32 %v3548_v42, %v4430_v46  ;;  %v6949_v5 = vld [vmem:[#allocation21_spill] sm:$0xff]  ;;  %v6951_v39 = vld [vmem:[#allocation35_spill] sm:$0xff]  ;;  %v6952_v59 = vld [vmem:[#allocation36_spill] sm:$0xff] }
 0x101   : > { %6946 = vst [vmem:[#allocation87_spill] sm:$0xff] %v4514_v52  ;;  %6947 = vst [vmem:[#allocation88_spill] sm:$0xff] %v4516_v33  ;;  %3081 = vset.pattern.permute.xlu1 %v6788_v19  ;;  %v4519_v53 = vadd.f32 %v1382_v11, %v1022_v25  ;;  %v1023_v18 = vadd.f32 %v6948_v12, %v471_v24  ;;  %v448_v34 = vmul.f32 %v3551_v44, %v4430_v46  ;;  %v6953_v11 = vld [vmem:[#allocation124_spill] sm:$0xff]  ;;  %v6957_v24 = vld [vmem:[#allocation99_spill] sm:$0xff] }
 0x102   : > { %v2227_v13 = vpack.c.bf16 %v6944_v7, %v2063_v20  ;;  %v445_v37 = vmul.f32 %v3560_v48, %v4430_v46  ;;  %1782 = vperm.xlu1 %3081, %v6949_v5   ;;  %2407 = vmatpush1.bf16.msra.mxu0 %v2225_v16  ;;  %v6950_v20 = vld [vmem:[#allocation34_spill] sm:$0xff]  ;;  %v816_v3 = vmul.f32 %v6951_v39, %v4516_v33  ;;  %v6954_v5 = vld [vmem:[#allocation97_spill] sm:$0xff] }
 0x103   : > { %v814_v14 = vmul.f32 %v6950_v20, %v4516_v33  ;;  %v813_v25 = vmul.f32 %v6952_v59, %v4516_v33  ;;  %v4534_v45 = vadd.f32 %v1384_v27, %v1024_v61  ;;  %v4536_v7 = vadd.f32 %v1381_v58, %v1021_v0  ;;  %v6956_v0 = vld [vmem:[#allocation98_spill] sm:$0xff]  ;;  %v4553_v32 = vpop.permute.xlu0 %288 }
 0x104   : > { %2500 = vmatpush1.bf16.msra.mxu1 %v2227_v13  ;;  %v454_v12 = vmul.f32 %v3548_v42, %v4469_v40  ;;  %v456_v16 = vmul.f32 %v3551_v44, %v4469_v40  ;;  %v998_v21 = vadd.f32 %v6954_v5, %v446_v36  ;;  %v453_v43 = vmul.f32 %v3560_v48, %v4469_v40  ;;  %v6955_v13 = vld [vmem:[#allocation37_spill] sm:$0xff]  ;;  %v4555_v36 = vpop.permute.xlu1 %1166  ;;  %v3113_v5 = vld [vmem:[%s6458_s1 + $0xb8] sm:$0xff] }
 0x105   : > { %v447_v10 = vmul.f32 %v3563_v50, %v4430_v46  ;;  %v815_v27 = vmul.f32 %v6955_v13, %v4516_v33  ;;  %v1575_v61 = vadd.f32 %v1383_v57, %v1023_v18  ;;  %v1000_v58 = vadd.f32 %v6956_v0, %v448_v34  ;;  %6958 = vst [vmem:[#allocation27_spill] sm:$0xff] %v4553_v32  ;;  %v6960_v0 = vld [vmem:[#allocation100_spill] sm:$0xff] }
 0x106   : > { %v997_v30 = vadd.f32 %v6957_v24, %v445_v37  ;;  %v455_v35 = vmul.f32 %v3563_v50, %v4469_v40  ;;  %6959 = vst [vmem:[#allocation83_spill] sm:$0xff] %v4555_v36  ;;  %1786 = vperm.xlu1 %3081, %v3113_v5   ;;  %v1006_v46 = vadd.f32 %v814_v14, %v454_v12  ;;  %v6965_v5 = vld [vmem:[#allocation61_spill] sm:$0xff]  ;;  %v6967_v40 = vld [vmem:[#allocation63_spill] sm:$0xff] }
 0x107   : > { %v1008_v62 = vadd.f32 %v816_v3, %v456_v16  ;;  %v1005_v33 = vadd.f32 %v813_v25, %v453_v43  ;;  %v4562_v57 = vmul.f32 %v3548_v42, %v4437_v9  ;;  %v1358_v18 = vmul.f32 %v6939_v1, %v4555_v36  ;;  %v4619_v8 = vpop.permute.xlu0 %1230 }
 0x108   : > { %v1360_v34 = vmul.f32 %v6940_v6, %v4555_v36  ;;  %v1357_v37 = vmul.f32 %v6942_v60, %v4555_v36  ;;  %v1359_v24 = vmul.f32 %v6945_v15, %v4555_v36  ;;  %v999_v14 = vadd.f32 %v6960_v0, %v447_v10  ;;  %v6966_v36 = vld [vmem:[#allocation62_spill] sm:$0xff]  ;;  %6971 = vst [vmem:[#allocation99_spill] sm:$0xff] %v4619_v8 }
 0x109   : > { %v1007_v3 = vadd.f32 %v815_v27, %v455_v35  ;;  %v4575_v43 = vmul.f32 %v3551_v44, %v4437_v9  ;;  %v4579_v25 = vmul.f32 %v3560_v48, %v4437_v9  ;;  %v4583_v12 = vmul.f32 %v3563_v50, %v4437_v9 }
 0x10a   : > { %v4587_v16 = vmul.f32 %v3548_v42, %v4472_v51  ;;  %v4591_v10 = vmul.f32 %v3551_v44, %v4472_v51  ;;  %v4595_v35 = vmul.f32 %v3560_v48, %v4472_v51  ;;  %v6964_v27 = vmov 0  }
 0x10b   : > { %3082 = vset.pattern.permute.xlu1 %v6964_v27  ;;  %v4599_v0 = vadd.f32 %v6965_v5, %v1006_v46  ;;  %v4602_v9 = vadd.f32 %v6966_v36, %v1008_v62  ;;  %v4605_v41 = vadd.f32 %v6967_v40, %v1005_v33  ;;  %v1550_v46 = vadd.f32 %v1358_v18, %v998_v21  ;;  %v6972_v40 = vld [vmem:[#allocation64_spill] sm:$0xff]  ;;  %v4688_v29 = vpop.permute.xlu0 %1226 }
 0x10c   : > { %6961 = vst [vmem:[#allocation21_spill] sm:$0xff] %v4587_v16  ;;  %6962 = vst [vmem:[#allocation34_spill] sm:$0xff] %v4591_v10  ;;  %v4609_v16 = vmul.f32 %v3563_v50, %v4472_v51  ;;  %v4611_v10 = vpop.permute.xlu1 %1726  ;;  %v1552_v5 = vadd.f32 %v1360_v34, %v1000_v58  ;;  %v1549_v62 = vadd.f32 %v1357_v37, %v997_v30  ;;  %v6977_v21 = vld [vmem:[#allocation56_spill] sm:$0xff]  ;;  %v6978_v58 = vld [vmem:[#allocation57_spill] sm:$0xff] }
 0x10d   : > { %6963 = vst [vmem:[#allocation35_spill] sm:$0xff] %v4595_v35  ;;  %6968 = vst [vmem:[#allocation124_spill] sm:$0xff] %v4605_v41  ;;  %v4616_v35 = vld [vmem:[%s6458_s1 + $0x98] sm:$0xff]  ;;  %v1551_v36 = vadd.f32 %v1359_v24, %v999_v14  ;;  %v4622_v33 = vadd.f32 %v6972_v40, %v1007_v3  ;;  %v4626_v51 = vmul.f32 %v3548_v42, %v4514_v52  ;;  %v6979_v34 = vld [vmem:[#allocation82_spill] sm:$0xff] }
 0x10e   : > { %6969 = vst [vmem:[#allocation97_spill] sm:$0xff] %v4609_v16  ;;  %6970 = vst [vmem:[#allocation98_spill] sm:$0xff] %v4611_v10  ;;  %298 = vperm.xlu1 %3082, %v4616_v35   ;;  %v4630_v16 = vmul.f32 %v3551_v44, %v4514_v52  ;;  %v4634_v17 = vmul.f32 %v3560_v48, %v4514_v52  ;;  %v1854_v30 = vadd.f32 %v4611_v10, %v6977_v21  ;;  %v6980_v24 = vld [vmem:[#allocation84_spill] sm:$0xff]  ;;  %v6989_v41 = vld [vmem:[#allocation91_spill] sm:$0xff] }
 0x10f   : > { %6973 = vst [vmem:[#allocation100_spill] sm:$0xff] %v4622_v33  ;;  %6974 = vst [vmem:[#allocation61_spill] sm:$0xff] %v4626_v51  ;;  %v1856_v18 = vadd.f32 %v4611_v10, %v6978_v58  ;;  %v1853_v37 = vadd.f32 %v4611_v10, %v6979_v34  ;;  %v1855_v14 = vadd.f32 %v4611_v10, %v6980_v24  ;;  %v6986_v24 = vld [vmem:[#allocation55_spill] sm:$0xff]  ;;  %v6988_v33 = vld [vmem:[#allocation10_spill] sm:$0xff] }
 0x110   : > { %6975 = vst [vmem:[#allocation62_spill] sm:$0xff] %v4630_v16  ;;  %6976 = vst [vmem:[#allocation63_spill] sm:$0xff] %v4634_v17  ;;  %v4646_v3 = vmul.f32 %v6939_v1, %v4619_v8  ;;  %v4650_v40 = vmul.f32 %v6940_v6, %v4619_v8  ;;  %v4654_v21 = vmul.f32 %v6942_v60, %v4619_v8  ;;  %v4660_v34 = vpop.permute.xlu1 %1730 }
 0x111   : > { %v4658_v58 = vmul.f32 %v6945_v15, %v4619_v8  ;;  %6985 = vst [vmem:[#allocation84_spill] sm:$0xff] %v4660_v34  ;;  %v4664_v17 = vadd.f32 %v6986_v24, %v1550_v46  ;;  %v4667_v16 = vadd.f32 %v6986_v24, %v1552_v5  ;;  %v4670_v51 = vadd.f32 %v6986_v24, %v1549_v62  ;;  %v4678_v8 = vld [vmem:[%s6458_s1 + $0x90] sm:$0xff] }
 0x112   : > { %6981 = vst [vmem:[#allocation64_spill] sm:$0xff] %v4646_v3  ;;  %6982 = vst [vmem:[#allocation56_spill] sm:$0xff] %v4650_v40  ;;  %3083 = vset.pattern.permute.xlu1 %v6799_v31  ;;  %v4673_v40 = vadd.f32 %v6986_v24, %v1551_v36  ;;  %v1862_v46 = vadd.f32 %v4660_v34, %v4519_v53  ;;  %v1864_v5 = vadd.f32 %v4660_v34, %v4534_v45 }
 0x113   : > { %6983 = vst [vmem:[#allocation57_spill] sm:$0xff] %v4654_v21  ;;  %6984 = vst [vmem:[#allocation82_spill] sm:$0xff] %v4658_v58  ;;  %662 = vperm.xlu1 %3083, %v4678_v8   ;;  %v1861_v62 = vadd.f32 %v4660_v34, %v4536_v7  ;;  %v1863_v58 = vadd.f32 %v4660_v34, %v1575_v61  ;;  %v2046_v36 = vmax.f32 %v1854_v30, 0.0  ;;  %v2048_v24 = vmax.f32 %v1856_v18, 0.0  ;;  %v6990_v61 = vld [vmem:[#allocation92_spill] sm:$0xff] }
 0x114   : > { %v2045_v21 = vmax.f32 %v1853_v37, 0.0  ;;  %v2047_v3 = vmax.f32 %v1855_v14, 0.0  ;;  %v2054_v10 = vmax.f32 %v1862_v46, 0.0  ;;  %v2056_v26 = vmax.f32 %v1864_v5, 0.0  ;;  %6987 = vst [vmem:[#allocation126_spill] sm:$0xff] %v4688_v29  ;;  %v4697_v18 = vpop.permute.xlu1 %228 }
 0x115   : > { %v2053_v47 = vmax.f32 %v1861_v62, 0.0  ;;  %v2055_v38 = vmax.f32 %v1863_v58, 0.0  ;;  %v1066_v45 = vadd.f32 %v6988_v33, %v4466_v49  ;;  %v1068_v7 = vadd.f32 %v6989_v41, %v4476_v22  ;;  %6991 = vst [vmem:[#allocation10_spill] sm:$0xff] %v4697_v18  ;;  %v6997_v33 = vld [vmem:[#allocation72_spill] sm:$0xff] }
 0x116   : > { %v1065_v30 = vadd.f32 %v6990_v61, %v4480_v54  ;;  %v2218_v37 = vpack.c.bf16 %v2054_v10, %v2046_v36  ;;  %v2220_v14 = vpack.c.bf16 %v2056_v26, %v2048_v24  ;;  %v4704_v49 = vmul.f32 %v6939_v1, %v4688_v29  ;;  %v6996_v26 = vld [vmem:[#allocation71_spill] sm:$0xff] }
 0x117   : > { %3085 = vset.pattern.permute.xlu1 %v6774_v4  ;;  %v2217_v58 = vpack.c.bf16 %v2053_v47, %v2045_v21  ;;  %v2219_v46 = vpack.c.bf16 %v2055_v38, %v2047_v3  ;;  %v4708_v41 = vmul.f32 %v6940_v6, %v4688_v29  ;;  %v4712_v22 = vmul.f32 %v6942_v60, %v4688_v29  ;;  %v6995_v47 = vld [vmem:[#allocation70_spill] sm:$0xff] }
 0x118   : > { %1214 = vperm.xlu1 %3085, %v4678_v8   ;;  %6992 = vst [vmem:[#allocation91_spill] sm:$0xff] %v4704_v49  ;;  %2408 = vmatprep.subr.bf16.mxu0 %v2218_v37  ;;  %v1618_v54 = vadd.f32 %v6995_v47, %v1066_v45  ;;  %v1620_v10 = vadd.f32 %v6996_v26, %v1068_v7  ;;  %v7001_v7 = vld [vmem:[#allocation77_spill] sm:$0xff]  ;;  %v7004_v26 = vmax.f32 %v4258_v63, 0.0  ;;  %v7010_v63 = vld [vmem:[#allocation123_spill] sm:$0xff] }
 0x119   : > { %6993 = vst [vmem:[#allocation92_spill] sm:$0xff] %v4708_v41  ;;  %6994 = vst [vmem:[#allocation127_spill] sm:$0xff] %v4712_v22  ;;  %2501 = vmatprep.subr.bf16.mxu1 %v2220_v14  ;;  %v1617_v3 = vadd.f32 %v6997_v33, %v1065_v30  ;;  %2409 = vmatpush1.bf16.msra.mxu0 %v2217_v58  ;;  %v4721_v24 = vmul.f32 %v6945_v15, %v4688_v29  ;;  %v4736_v14 = vpop.permute.xlu1 %606  ;;  %v7005_v33 = vmax.f32 %v4217_v23, 0.0  ;;  %v7013_v29 = vld [vmem:[#allocation105_spill] sm:$0xff] }
 0x11a   : > { %2502 = vmatpush1.bf16.msra.mxu1 %v2219_v46  ;;  %v4725_v62 = vmul.f32 %v3563_v50, %v4514_v52  ;;  %v4729_v36 = vmul.f32 %v3548_v42, %v4553_v32  ;;  %v438_v45 = vmul.f32 %v3548_v42, %v4697_v18  ;;  %v1906_v61 = vadd.f32 %v7001_v7, %v1618_v54  ;;  %v7003_v46 = vld [vmem:[#allocation93_spill] sm:$0xff] }
 0x11b   : > { %6998 = vst [vmem:[#allocation70_spill] sm:$0xff] %v4721_v24  ;;  %v1908_v30 = vadd.f32 %v7001_v7, %v1620_v10  ;;  %v1905_v37 = vadd.f32 %v7001_v7, %v1617_v3  ;;  %7002 = vst [vmem:[#allocation77_spill] sm:$0xff] %v4736_v14  ;;  %v440_v58 = vmul.f32 %v3551_v44, %v4697_v18  ;;  %v7007_v54 = vmax.f32 %v4261_v56, 0.0  ;;  %v7012_v56 = vld [vmem:[#allocation73_spill] sm:$0xff] }
 0x11c   : > { %6999 = vst [vmem:[#allocation71_spill] sm:$0xff] %v4725_v62  ;;  %7000 = vst [vmem:[#allocation72_spill] sm:$0xff] %v4729_v36  ;;  %1218 = vperm.xlu1 %3085, %v4616_v35   ;;  %v1067_v47 = vadd.f32 %v7003_v46, %v4498_v55  ;;  %v4747_v21 = vpack.c.bf16 %v7005_v33, %v7004_v26  ;;  %v7008_v10 = vmax.f32 %v4221_v28, 0.0  ;;  %v7011_v46 = vld [vmem:[#allocation33_spill] sm:$0xff]  ;;  %v2098_v26 = vmax.f32 %v1906_v61, 0.0  ;;  %v3116_v36 = vld [vmem:[%s6458_s1 + $0xa8] sm:$0xff] }
 0x11d   : > { %v790_v35 = vmul.f32 %v6950_v20, %v4736_v14  ;;  %v792_v38 = vmul.f32 %v6951_v39, %v4736_v14  ;;  %v789_v55 = vmul.f32 %v6952_v59, %v4736_v14  ;;  %v1889_v23 = vadd.f32 %v7011_v46, %v7010_v63 }
 0x11e   : > { %7006 = vst [vmem:[#allocation93_spill] sm:$0xff] %v4747_v21  ;;  %v4753_v3 = vpack.c.bf16 %v7008_v10, %v7007_v54  ;;  %v2100_v33 = vmax.f32 %v1908_v30, 0.0  ;;  %v2097_v5 = vmax.f32 %v1905_v37, 0.0  ;;  %v1619_v53 = vadd.f32 %v7012_v56, %v1067_v47  ;;  %v7016_v30 = vld [vmem:[#allocation106_spill] sm:$0xff]  ;;  %v4785_v21 = vpop.permute.xlu1 %1158 }
 0x11f   : > { %v982_v28 = vadd.f32 %v790_v35, %v4562_v57  ;;  %v437_v54 = vmul.f32 %v3560_v48, %v4697_v18  ;;  %v439_v10 = vmul.f32 %v3563_v50, %v4697_v18  ;;  %v791_v52 = vmul.f32 %v6955_v13, %v4736_v14  ;;  %v7019_v57 = vld [vmem:[#allocation107_spill] sm:$0xff]  ;;  %7022 = vst [vmem:[#allocation105_spill] sm:$0xff] %v4785_v21 }
 0x120   : > { %7009 = vst [vmem:[#allocation128_spill] sm:$0xff] %v4753_v3  ;;  %3086 = vset.pattern.permute.xlu1 %v6788_v19  ;;  %v7014_v63 = vmax.f32 %v7013_v29, 0.0  ;;  %v7017_v37 = vmax.f32 %v7016_v30, 0.0  ;;  %v7020_v35 = vmax.f32 %v7019_v57, 0.0  ;;  %v1907_v3 = vadd.f32 %v7001_v7, %v1619_v53  ;;  %v7024_v30 = vld [vmem:[#allocation51_spill] sm:$0xff]  ;;  %v7025_v57 = vld [vmem:[#allocation52_spill] sm:$0xff] }
 0x121   : > { %1778 = vperm.xlu1 %3086, %v3116_v36   ;;  %v984_v29 = vadd.f32 %v792_v38, %v4575_v43  ;;  %v1344_v53 = vmul.f32 %v6940_v6, %v4785_v21  ;;  %v1341_v7 = vmul.f32 %v6942_v60, %v4785_v21  ;;  %v1343_v43 = vmul.f32 %v6945_v15, %v4785_v21 }
 0x122   : > { %v4774_v61 = vpack.c.bf16 %v7014_v63, %v2098_v26  ;;  %v4778_v47 = vpack.c.bf16 %v7017_v37, %v2100_v33  ;;  %v4782_v56 = vpack.c.bf16 %v7020_v35, %v2097_v5  ;;  %v981_v26 = vadd.f32 %v789_v55, %v4579_v25  ;;  %v7023_v33 = vld [vmem:[#allocation79_spill] sm:$0xff]  ;;  %v7026_v35 = vld [vmem:[#allocation112_spill] sm:$0xff] }
 0x123   : > { %v2081_v63 = vmax.f32 %v1889_v23, 0.0  ;;  %v1603_v37 = vadd.f32 %v7024_v30, %v7023_v33  ;;  %v1342_v5 = vmul.f32 %v6939_v1, %v4785_v21  ;;  %v1899_v36 = vadd.f32 %v7026_v35, %v7025_v57  ;;  %v4832_v35 = vld [vmem:[%s6458_s1 + $0x80] sm:$0xff]  ;;  %v7050_v21 = vld [vmem:[#allocation124_spill] sm:$0xff] }
 0x124   : > { %7015 = vst [vmem:[#allocation123_spill] sm:$0xff] %v4774_v61  ;;  %7018 = vst [vmem:[#allocation33_spill] sm:$0xff] %v4778_v47  ;;  %v2099_v25 = vmax.f32 %v1907_v3, 0.0  ;;  %v7027_v38 = vmax.f32 %v6953_v11, 0.0  ;;  %v4811_v30 = vmul.f32 %v3551_v44, %v4553_v32  ;;  %v4819_v57 = vmul.f32 %v3563_v50, %v4553_v32  ;;  %v4821_v3 = vpop.permute.xlu1 %1162 }
 0x125   : > { %7021 = vst [vmem:[#allocation73_spill] sm:$0xff] %v4782_v56  ;;  %v1891_v23 = vadd.f32 %v7011_v46, %v1603_v37  ;;  %v1534_v33 = vadd.f32 %v1342_v5, %v982_v28  ;;  %v4815_v56 = vmul.f32 %v3560_v48, %v4553_v32  ;;  %7032 = vst [vmem:[#allocation52_spill] sm:$0xff] %v4821_v3  ;;  %3087 = vset.pattern.permute.xlu1 %v6964_v27  ;;  %v7033_v28 = vld [vmem:[#allocation108_spill] sm:$0xff] }
 0x126   : > { %v4806_v55 = vpack.c.bf16 %v7027_v38, %v2081_v63  ;;  %7029 = vst [vmem:[#allocation107_spill] sm:$0xff] %v4811_v30  ;;  %7031 = vst [vmem:[#allocation51_spill] sm:$0xff] %v4819_v57  ;;  %v1536_v11 = vadd.f32 %v1344_v53, %v984_v29  ;;  %v1533_v63 = vadd.f32 %v1341_v7, %v981_v26  ;;  %v7034_v37 = vmax.f32 %v7033_v28, 0.0  ;;  %v7036_v38 = vld [vmem:[#allocation101_spill] sm:$0xff]  ;;  %v7038_v29 = vld [vmem:[#allocation18_spill] sm:$0xff] }
 0x127   : > { %7030 = vst [vmem:[#allocation79_spill] sm:$0xff] %v4815_v56  ;;  %v983_v46 = vadd.f32 %v791_v52, %v4583_v12  ;;  %283 = vperm.xlu1 %3087, %v4832_v35   ;;  %v990_v32 = vadd.f32 %v7036_v38, %v438_v45  ;;  %v2091_v27 = vmax.f32 %v1899_v36, 0.0  ;;  %v482_v26 = vmul.f32 %v6932_v2, %v7038_v29  ;;  %v7039_v52 = vld [vmem:[#allocation103_spill] sm:$0xff]  ;;  %v7040_v53 = vld [vmem:[#allocation104_spill] sm:$0xff]  ;;  %v7042_v57 = vld [vmem:[#allocation54_spill] sm:$0xff] }
 0x128   : > { %7028 = vst [vmem:[#allocation106_spill] sm:$0xff] %v4806_v55  ;;  %v4827_v5 = vpack.c.bf16 %v7034_v37, %v2099_v25  ;;  %v7037_v55 = vld [vmem:[#allocation102_spill] sm:$0xff]  ;;  %v989_v12 = vadd.f32 %v7039_v52, %v437_v54  ;;  %v991_v7 = vadd.f32 %v7040_v53, %v439_v10  ;;  %v2083_v28 = vmax.f32 %v1891_v23, 0.0  ;;  %v4860_v23 = vpop.permute.xlu1 %1722  ;;  %v7048_v56 = vld [vmem:[#allocation95_spill] sm:$0xff] }
 0x129   : > { %v992_v47 = vadd.f32 %v7037_v55, %v440_v58  ;;  %v1535_v25 = vadd.f32 %v1343_v43, %v983_v46  ;;  %v1350_v37 = vmul.f32 %v6939_v1, %v4821_v3  ;;  %v490_v45 = vmul.f32 %v6932_v2, %v7042_v57  ;;  %v7043_v58 = vld [vmem:[#allocation90_spill] sm:$0xff]  ;;  %7045 = vst [vmem:[#allocation108_spill] sm:$0xff] %v4860_v23  ;;  %v7047_v46 = vld [vmem:[#allocation53_spill] sm:$0xff]  ;;  %v7049_v30 = vld [vmem:[#allocation11_spill] sm:$0xff] }
 0x12a   : > { %7035 = vst [vmem:[#allocation112_spill] sm:$0xff] %v4827_v5  ;;  %v7041_v5 = vld [vmem:[#allocation59_spill] sm:$0xff]  ;;  %v7044_v36 = vld [vmem:[#allocation6_spill] sm:$0xff]  ;;  %v1352_v38 = vmul.f32 %v6940_v6, %v4821_v3  ;;  %v1349_v10 = vmul.f32 %v6942_v60, %v4821_v3  ;;  %v1846_v62 = vadd.f32 %v4860_v23, %v4599_v0 }
 0x12b   : > { %v4844_v61 = vadd.f32 %v7041_v5, %v1534_v33  ;;  %v842_v55 = vmul.f32 %v7044_v36, %v7043_v58  ;;  %v4853_v54 = vadd.f32 %v7041_v5, %v1536_v11  ;;  %v4858_v43 = vadd.f32 %v7041_v5, %v1533_v63  ;;  %3089 = vset.pattern.permute.xlu1 %v6799_v31 }
 0x12c   : > { %v4863_v33 = vpack.c.bf16 %v2091_v27, %v2083_v28  ;;  %v850_v52 = vmul.f32 %v7044_v36, %v7047_v46  ;;  %v1394_v11 = vmul.f32 %v7049_v30, %v7048_v56  ;;  %654 = vperm.xlu1 %3089, %v4832_v35   ;;  %v1848_v63 = vadd.f32 %v4860_v23, %v4602_v9  ;;  %v7051_v27 = vld [vmem:[#allocation100_spill] sm:$0xff] }
 0x12d   : > { %v1034_v53 = vadd.f32 %v842_v55, %v482_v26  ;;  %v1845_v31 = vadd.f32 %v4860_v23, %v7050_v21  ;;  %v1847_v28 = vadd.f32 %v4860_v23, %v7051_v27  ;;  %v1351_v26 = vmul.f32 %v6945_v15, %v4821_v3  ;;  %v4890_v23 = vpop.permute.xlu1 %598 }
 0x12e   : > { %7046 = vst [vmem:[#allocation101_spill] sm:$0xff] %v4863_v33  ;;  %v4881_v55 = vadd.f32 %v7041_v5, %v1535_v25  ;;  %v7052_v33 = vld [vmem:[#allocation109_spill] sm:$0xff]  ;;  %v2038_v0 = vmax.f32 %v1846_v62, 0.0  ;;  %v2040_v24 = vmax.f32 %v1848_v63, 0.0  ;;  %v4885_v41 = vadd.f32 %v1350_v37, %v990_v32  ;;  %7053 = vst [vmem:[#allocation102_spill] sm:$0xff] %v4890_v23  ;;  %v4895_v25 = vld [vmem:[%s6458_s1 + $0x88] sm:$0xff] }
 0x12f   : > { %v1402_v14 = vmul.f32 %v7049_v30, %v7052_v33  ;;  %v1586_v18 = vadd.f32 %v1394_v11, %v1034_v53  ;;  %v2037_v22 = vmax.f32 %v1845_v31, 0.0  ;;  %v2039_v9 = vmax.f32 %v1847_v28, 0.0  ;;  %v7058_v28 = vld [vmem:[#allocation7_spill] sm:$0xff]  ;;  %v7069_v5 = vld [vmem:[#allocation41_spill] sm:$0xff] }
 0x130   : > { %v4888_v49 = vadd.f32 %v1352_v38, %v992_v47  ;;  %v1042_v27 = vadd.f32 %v850_v52, %v490_v45  ;;  %658 = vperm.xlu1 %3089, %v4895_v25   ;;  %v7054_v62 = vmax.f32 %v4664_v17, 0.0  ;;  %v7055_v32 = vmax.f32 %v4667_v16, 0.0  ;;  %v7068_v52 = vld [vmem:[#allocation40_spill] sm:$0xff] }
 0x131   : > { %v7056_v11 = vmax.f32 %v4670_v51, 0.0  ;;  %v7057_v45 = vmax.f32 %v4673_v40, 0.0  ;;  %v774_v63 = vmul.f32 %v6950_v20, %v4890_v23  ;;  %v484_v21 = vmul.f32 %v7058_v28, %v7038_v29 }
 0x132   : > { %v2210_v53 = vpack.c.bf16 %v2038_v0, %v7054_v62  ;;  %v2212_v37 = vpack.c.bf16 %v2040_v24, %v7055_v32  ;;  %v1594_v31 = vadd.f32 %v1402_v14, %v1042_v27  ;;  %v4911_v17 = vadd.f32 %v1349_v10, %v989_v12  ;;  %v7061_v12 = vld [vmem:[#allocation12_spill] sm:$0xff]  ;;  %v7065_v32 = vld [vmem:[#allocation42_spill] sm:$0xff] }
 0x133   : > { %v2209_v47 = vpack.c.bf16 %v2037_v22, %v7056_v11  ;;  %v2211_v38 = vpack.c.bf16 %v2039_v9, %v7057_v45  ;;  %v4914_v51 = vadd.f32 %v1351_v26, %v991_v7  ;;  %v7059_v22 = vld [vmem:[#allocation58_spill] sm:$0xff]  ;;  %v776_v14 = vmul.f32 %v6951_v39, %v4890_v23  ;;  %v4922_v9 = vpop.permute.xlu0 %1206 }
 0x134   : > { %2410 = vmatprep.subr.bf16.mxu0 %v2210_v53  ;;  %2503 = vmatprep.subr.bf16.mxu1 %v2212_v37  ;;  %v1874_v40 = vadd.f32 %v7059_v22, %v1586_v18  ;;  %v773_v0 = vmul.f32 %v6952_v59, %v4890_v23  ;;  %7060 = vst [vmem:[#allocation18_spill] sm:$0xff] %v4922_v9  ;;  %v7062_v7 = vld [vmem:[#allocation38_spill] sm:$0xff]  ;;  %v4936_v53 = vpop.permute.xlu1 %1150 }
 0x135   : > { %2411 = vmatpush1.bf16.msra.mxu0 %v2209_v47  ;;  %2504 = vmatpush1.bf16.msra.mxu1 %v2211_v38  ;;  %v844_v10 = vmul.f32 %v7061_v12, %v7043_v58  ;;  %v966_v26 = vadd.f32 %v774_v63, %v7062_v7  ;;  %v775_v18 = vmul.f32 %v6955_v13, %v4890_v23  ;;  %v7066_v47 = vld [vmem:[#allocation15_spill] sm:$0xff] }
 0x136   : > { %3091 = vset.pattern.permute.xlu1 %v6774_v4  ;;  %v4932_v27 = vmul.f32 %v6939_v1, %v4922_v9  ;;  %v492_v62 = vmul.f32 %v7058_v28, %v7042_v57  ;;  %7064 = vst [vmem:[#allocation104_spill] sm:$0xff] %v4936_v53  ;;  %v1882_v37 = vadd.f32 %v7065_v32, %v1594_v31  ;;  %v7067_v31 = vld [vmem:[#allocation39_spill] sm:$0xff] }
 0x137   : > { %1210 = vperm.xlu1 %3091, %v4895_v25   ;;  %v852_v4 = vmul.f32 %v7061_v12, %v7047_v46  ;;  %v1036_v11 = vadd.f32 %v844_v10, %v484_v21  ;;  %v1396_v45 = vmul.f32 %v7066_v47, %v7048_v56  ;;  %v1326_v38 = vmul.f32 %v6939_v1, %v4936_v53 }
 0x138   : > { %7063 = vst [vmem:[#allocation103_spill] sm:$0xff] %v4932_v27  ;;  %v1328_v63 = vmul.f32 %v6940_v6, %v4936_v53  ;;  %v1325_v7 = vmul.f32 %v6942_v60, %v4936_v53  ;;  %v1327_v24 = vmul.f32 %v6945_v15, %v4936_v53  ;;  %v968_v16 = vadd.f32 %v776_v14, %v7067_v31  ;;  %v4961_v48 = vpop.permute.xlu1 %1154 }
 0x139   : > { %v965_v27 = vadd.f32 %v773_v0, %v7068_v52  ;;  %v2066_v21 = vmax.f32 %v1874_v40, 0.0  ;;  %v1404_v10 = vmul.f32 %v7066_v47, %v7052_v33  ;;  %v1518_v23 = vadd.f32 %v1326_v38, %v966_v26  ;;  %7071 = vst [vmem:[#allocation90_spill] sm:$0xff] %v4961_v48  ;;  %v7073_v26 = vld [vmem:[#allocation8_spill] sm:$0xff] }
 0x13a   : > { %v967_v3 = vadd.f32 %v775_v18, %v7069_v5  ;;  %v4959_v50 = vmul.f32 %v6940_v6, %v4922_v9  ;;  %v1588_v34 = vadd.f32 %v1396_v45, %v1036_v11  ;;  %v1520_v53 = vadd.f32 %v1328_v63, %v968_v16 }
 0x13b   : > { %3092 = vset.pattern.permute.xlu1 %v6788_v19  ;;  %v1517_v14 = vadd.f32 %v1325_v7, %v965_v27  ;;  %v2074_v31 = vmax.f32 %v1882_v37, 0.0  ;;  %v1044_v52 = vadd.f32 %v852_v4, %v492_v62  ;;  %v1334_v40 = vmul.f32 %v6939_v1, %v4961_v48  ;;  %v7076_v62 = vld [vmem:[#allocation65_spill] sm:$0xff] }
 0x13c   : > { %7070 = vst [vmem:[#allocation54_spill] sm:$0xff] %v4959_v50  ;;  %1766 = vperm.xlu1 %3092, %v4678_v8   ;;  %v1519_v0 = vadd.f32 %v1327_v24, %v967_v3  ;;  %v4969_v5 = vmul.f32 %v6942_v60, %v4922_v9  ;;  %v481_v18 = vmul.f32 %v7073_v26, %v7038_v29  ;;  %v7077_v4 = vld [vmem:[#allocation13_spill] sm:$0xff]  ;;  %v4999_v7 = vpop.permute.xlu1 %1714 }
 0x13d   : > { %v4975_v19 = vmul.f32 %v6945_v15, %v4922_v9  ;;  %v4977_v16 = vpack.c.bf16 %v2074_v31, %v2066_v21  ;;  %v1596_v27 = vadd.f32 %v1404_v10, %v1044_v52  ;;  %v489_v8 = vmul.f32 %v7073_v26, %v7042_v57  ;;  %7078 = vst [vmem:[#allocation124_spill] sm:$0xff] %v4999_v7 }
 0x13e   : > { %7072 = vst [vmem:[#allocation6_spill] sm:$0xff] %v4969_v5  ;;  %v4982_v37 = vadd.f32 %v7076_v62, %v1518_v23  ;;  %v1336_v3 = vmul.f32 %v6940_v6, %v4961_v48  ;;  %v1876_v24 = vadd.f32 %v7059_v22, %v1588_v34  ;;  %v841_v11 = vmul.f32 %v7077_v4, %v7043_v58  ;;  %v7079_v34 = vld [vmem:[#allocation43_spill] sm:$0xff] }
 0x13f   : > { %7074 = vst [vmem:[#allocation53_spill] sm:$0xff] %v4975_v19  ;;  %7075 = vst [vmem:[#allocation95_spill] sm:$0xff] %v4977_v16  ;;  %v4990_v45 = vadd.f32 %v7076_v62, %v1520_v53  ;;  %v1333_v38 = vmul.f32 %v6942_v60, %v4961_v48  ;;  %v4995_v63 = vadd.f32 %v7076_v62, %v1517_v14 }
 0x140   : > { %v1335_v23 = vmul.f32 %v6945_v15, %v4961_v48  ;;  %1758 = vperm.xlu1 %3092, %v4832_v35   ;;  %v5003_v21 = vadd.f32 %v1334_v40, %v7079_v34  ;;  %v5006_v10 = vadd.f32 %v7076_v62, %v1519_v0  ;;  %v849_v53 = vmul.f32 %v7077_v4, %v7047_v46  ;;  %v7080_v34 = vld [vmem:[#allocation16_spill] sm:$0xff]  ;;  %v5025_v5 = vpop.permute.xlu1 %590 }
 0x141   : > { %v1033_v31 = vadd.f32 %v841_v11, %v481_v18  ;;  %v1830_v14 = vadd.f32 %v4999_v7, %v4885_v41  ;;  %v1832_v52 = vadd.f32 %v4999_v7, %v4888_v49  ;;  %v1829_v9 = vadd.f32 %v4999_v7, %v4911_v17  ;;  %7081 = vst [vmem:[#allocation100_spill] sm:$0xff] %v5025_v5 }
 0x142   : > { %v1831_v35 = vadd.f32 %v4999_v7, %v4914_v51  ;;  %v1884_v40 = vadd.f32 %v7065_v32, %v1596_v27  ;;  %v1041_v0 = vadd.f32 %v849_v53, %v489_v8  ;;  %v1393_v16 = vmul.f32 %v7080_v34, %v7048_v56 }
 0x143   : > { %v1401_v18 = vmul.f32 %v7080_v34, %v7052_v33  ;;  %v2022_v11 = vmax.f32 %v1830_v14, 0.0  ;;  %v2024_v41 = vmax.f32 %v1832_v52, 0.0  ;;  %v2021_v62 = vmax.f32 %v1829_v9, 0.0 }
 0x144   : > { %v2023_v48 = vmax.f32 %v1831_v35, 0.0  ;;  %1762 = vperm.xlu1 %3092, %v4895_v25   ;;  %v2068_v17 = vmax.f32 %v1876_v24, 0.0  ;;  %v1585_v19 = vadd.f32 %v1393_v16, %v1033_v31  ;;  %v7082_v27 = vmax.f32 %v4844_v61, 0.0  ;;  %v7086_v25 = vld [vmem:[#allocation47_spill] sm:$0xff]  ;;  %v7087_v24 = vld [vmem:[#allocation48_spill] sm:$0xff]  ;;  %v7104_v16 = vld [vmem:[#allocation69_spill] sm:$0xff] }
 0x145   : > { %v1593_v51 = vadd.f32 %v1401_v18, %v1041_v0  ;;  %v7083_v53 = vmax.f32 %v4853_v54, 0.0  ;;  %v7084_v14 = vmax.f32 %v4858_v43, 0.0  ;;  %v7085_v9 = vmax.f32 %v4881_v55, 0.0 }
 0x146   : > { %v2202_v8 = vpack.c.bf16 %v2022_v11, %v7082_v27  ;;  %v5036_v7 = vadd.f32 %v1336_v3, %v7086_v25  ;;  %v5040_v31 = vadd.f32 %v1333_v38, %v7087_v24  ;;  %v758_v61 = vmul.f32 %v6950_v20, %v5025_v5  ;;  %v7089_v11 = vld [vmem:[#allocation49_spill] sm:$0xff]  ;;  %v7097_v24 = vld [vmem:[#allocation122_spill] sm:$0xff] }
 0x147   : > { %v2204_v50 = vpack.c.bf16 %v2024_v41, %v7083_v53  ;;  %v2201_v52 = vpack.c.bf16 %v2021_v62, %v7084_v14  ;;  %v2203_v35 = vpack.c.bf16 %v2023_v48, %v7085_v9  ;;  %v760_v54 = vmul.f32 %v6951_v39, %v5025_v5  ;;  %v3095_v62 = vld [vmem:[%s6459_s2 + $0x4] ss:$8 sps:$4 sm:$0xff]  }
 0x148   : > { %2412 = vmatprep.subr.bf16.mxu0 %v2202_v8  ;;  %v757_v43 = vmul.f32 %v6952_v59, %v5025_v5  ;;  %v759_v48 = vmul.f32 %v6955_v13, %v5025_v5  ;;  %v2076_v55 = vmax.f32 %v1884_v40, 0.0  ;;  %v1873_v3 = vadd.f32 %v7059_v22, %v1585_v19  ;;  %v5063_v8 = vpop.permute.xlu1 %1142  ;;  %2965 = vmatprep.mubr.msk.bf16.mxu0 %vm2383_vm0, %v3095_v62  ;;  %v7094_v14 = vld [vmem:[#allocation117_spill] sm:$0xff] }
 0x149   : > { %2505 = vmatprep.subr.bf16.mxu1 %v2204_v50  ;;  %2413 = vmatpush1.bf16.msra.mxu0 %v2201_v52  ;;  %v7088_v50 = vld [vmem:[#allocation9_spill] sm:$0xff]  ;;  %v1527_v41 = vadd.f32 %v1335_v23, %v7089_v11  ;;  %v1881_v27 = vadd.f32 %v7065_v32, %v1593_v51  ;;  %7091 = vst [vmem:[#allocation58_spill] sm:$0xff] %v5063_v8  ;;  %v7095_v51 = vld [vmem:[#allocation118_spill] sm:$0xff] }
 0x14a   : > { %2506 = vmatpush1.bf16.msra.mxu1 %v2203_v35  ;;  %v483_v38 = vmul.f32 %v7088_v50, %v7038_v29  ;;  %v491_v0 = vmul.f32 %v7088_v50, %v7042_v57  ;;  %v5060_v40 = vpack.c.bf16 %v2076_v55, %v2068_v17  ;;  %2971 = vmatprep.mubr.msk.bf16.mxu1 %vm2383_vm0, %v3095_v62  ;;  %v7092_v29 = vld [vmem:[#allocation14_spill] sm:$0xff]  ;;  %v7093_v23 = vld [vmem:[#allocation17_spill] sm:$0xff]  ;;  %v2065_v11 = vmax.f32 %v1873_v3, 0.0  ;;  %v7099_v3 = vld [vmem:[#allocation60_spill] sm:$0xff] }
 0x14b   : > { %v843_v19 = vmul.f32 %v7092_v29, %v7043_v58  ;;  %v851_v57 = vmul.f32 %v7092_v29, %v7047_v46  ;;  %v1403_v17 = vmul.f32 %v7093_v23, %v7052_v33  ;;  %v950_v52 = vadd.f32 %v758_v61, %v7094_v14  ;;  %v7096_v35 = vld [vmem:[#allocation121_spill] sm:$0xff] }
 0x14c   : > { %7090 = vst [vmem:[#allocation109_spill] sm:$0xff] %v5060_v40  ;;  %v952_v9 = vadd.f32 %v760_v54, %v7095_v51  ;;  %v949_v25 = vadd.f32 %v757_v43, %v7096_v35  ;;  %v951_v55 = vadd.f32 %v759_v48, %v7097_v24  ;;  %v1395_v58 = vmul.f32 %v7093_v23, %v7048_v56  ;;  %v5086_v14 = vpop.permute.xlu1 %1146  ;;  %v7102_v24 = vld [vmem:[#allocation78_spill] sm:$0xff]  ;;  %v7106_v23 = vld [vmem:[#allocation116_spill] sm:$0xff] }
 0x14d   : > { %v1035_v53 = vadd.f32 %v843_v19, %v483_v38  ;;  %v1043_v62 = vadd.f32 %v851_v57, %v491_v0  ;;  %v1310_v46 = vmul.f32 %v6939_v1, %v5063_v8  ;;  %v1312_v33 = vmul.f32 %v6940_v6, %v5063_v8  ;;  %7098 = vst [vmem:[#allocation38_spill] sm:$0xff] %v5086_v14  ;;  %v7100_v0 = vld [vmem:[#allocation80_spill] sm:$0xff]  ;;  %v7105_v40 = vld [vmem:[#allocation22_spill] sm:$0xff] }
 0x14e   : > { %v1309_v61 = vmul.f32 %v6942_v60, %v5063_v8  ;;  %v2073_v54 = vmax.f32 %v1881_v27, 0.0  ;;  %v474_v38 = vmul.f32 %v6932_v2, %v7099_v3  ;;  %v826_v56 = vmul.f32 %v7044_v36, %v7100_v0 }
 0x14f   : > { %v1587_v43 = vadd.f32 %v1395_v58, %v1035_v53  ;;  %v1595_v48 = vadd.f32 %v1403_v17, %v1043_v62  ;;  %v1318_v19 = vmul.f32 %v6939_v1, %v5086_v14  ;;  %v1320_v57 = vmul.f32 %v6940_v6, %v5086_v14  ;;  %v7103_v58 = vld [vmem:[#allocation68_spill] sm:$0xff] }
 0x150   : > { %v1317_v51 = vmul.f32 %v6942_v60, %v5086_v14  ;;  %v1319_v27 = vmul.f32 %v6945_v15, %v5086_v14  ;;  %v1311_v53 = vmul.f32 %v6945_v15, %v5063_v8  ;;  %v5102_v17 = vpack.c.bf16 %v2073_v54, %v2065_v11  ;;  %v5119_v54 = vpop.permute.xlu1 %1706 }
 0x151   : > { %v1875_v35 = vadd.f32 %v7059_v22, %v1587_v43  ;;  %v466_v62 = vmul.f32 %v6932_v2, %v7102_v24  ;;  %v1510_v18 = vadd.f32 %v1318_v19, %v7103_v58  ;;  %v1512_v49 = vadd.f32 %v1320_v57, %v7104_v16  ;;  %7107 = vst [vmem:[#allocation39_spill] sm:$0xff] %v5119_v54  ;;  %v7108_v43 = vld [vmem:[#allocation111_spill] sm:$0xff] }
 0x152   : > { %7101 = vst [vmem:[#allocation42_spill] sm:$0xff] %v5102_v17  ;;  %v1509_v5 = vadd.f32 %v1317_v51, %v7105_v40  ;;  %v834_v60 = vmul.f32 %v7044_v36, %v7106_v23  ;;  %v5112_v14 = vadd.f32 %v1310_v46, %v950_v52  ;;  %v5114_v6 = vadd.f32 %v1312_v33, %v952_v9  ;;  %v7109_v46 = vld [vmem:[#allocation76_spill] sm:$0xff] }
 0x153   : > { %v5116_v11 = vadd.f32 %v1309_v61, %v949_v25  ;;  %v1883_v22 = vadd.f32 %v7065_v32, %v1595_v48  ;;  %v1511_v17 = vadd.f32 %v1319_v27, %v7108_v43  ;;  %v2067_v19 = vmax.f32 %v1875_v35, 0.0 }
 0x154   : > { %v1018_v58 = vadd.f32 %v826_v56, %v466_v62  ;;  %v1026_v16 = vadd.f32 %v834_v60, %v474_v38  ;;  %v1814_v40 = vadd.f32 %v5119_v54, %v5003_v21  ;;  %v1816_v52 = vadd.f32 %v5119_v54, %v5036_v7  ;;  %v7110_v60 = vld [vmem:[#allocation25_spill] sm:$0xff]  ;;  %v5147_v51 = vpop.permute.xlu1 %313 }
 0x155   : > { %v1813_v9 = vadd.f32 %v5119_v54, %v5040_v31  ;;  %v1815_v25 = vadd.f32 %v5119_v54, %v1527_v41  ;;  %v5130_v32 = vadd.f32 %v7109_v46, %v1510_v18  ;;  %v5133_v33 = vadd.f32 %v7109_v46, %v1512_v49  ;;  %v7111_v41 = vld [vmem:[#allocation125_spill] sm:$0xff]  ;;  %7112 = vst [vmem:[#allocation40_spill] sm:$0xff] %v5147_v51 }
 0x156   : > { %v5136_v61 = vadd.f32 %v7109_v46, %v1509_v5  ;;  %v1378_v21 = vmul.f32 %v7049_v30, %v7110_v60  ;;  %v2006_v48 = vmax.f32 %v1814_v40, 0.0  ;;  %v2008_v38 = vmax.f32 %v1816_v52, 0.0 }
 0x157   : > { %v2005_v7 = vmax.f32 %v1813_v9, 0.0  ;;  %v2007_v56 = vmax.f32 %v1815_v25, 0.0  ;;  %v5140_v57 = vadd.f32 %v1311_v53, %v951_v55  ;;  %v5143_v31 = vadd.f32 %v7109_v46, %v1511_v17 }
 0x158   : > { %v2075_v18 = vmax.f32 %v1883_v22, 0.0  ;;  %v1386_v49 = vmul.f32 %v7049_v30, %v7111_v41  ;;  %v7113_v5 = vmax.f32 %v4982_v37, 0.0  ;;  %v7114_v35 = vmax.f32 %v4990_v45, 0.0 }
 0x159   : > { %v7115_v43 = vmax.f32 %v4995_v63, 0.0  ;;  %v7116_v55 = vmax.f32 %v5006_v10, 0.0  ;;  %v1570_v9 = vadd.f32 %v1378_v21, %v1018_v58  ;;  %v468_v45 = vmul.f32 %v7058_v28, %v7102_v24  ;;  %v7122_v10 = vld [vmem:[#allocation32_spill] sm:$0xff] }
 0x15a   : > { %v2194_v27 = vpack.c.bf16 %v2006_v48, %v7113_v5  ;;  %v2196_v62 = vpack.c.bf16 %v2008_v38, %v7114_v35  ;;  %v5159_v52 = vpack.c.bf16 %v2075_v18, %v2067_v19  ;;  %v1578_v25 = vadd.f32 %v1386_v49, %v1026_v16  ;;  %v7118_v48 = vld [vmem:[#allocation31_spill] sm:$0xff]  ;;  %v5180_v49 = vpop.permute.xlu1 %678  ;;  %v7121_v5 = vld [vmem:[#allocation98_spill] sm:$0xff] }
 0x15b   : > { %v2193_v40 = vpack.c.bf16 %v2005_v7, %v7115_v43  ;;  %v2195_v53 = vpack.c.bf16 %v2007_v56, %v7116_v55  ;;  %v476_v63 = vmul.f32 %v7058_v28, %v7099_v3  ;;  %v574_v19 = vmul.f32 %v3548_v42, %v5147_v51  ;;  %v7119_v7 = vld [vmem:[#allocation84_spill] sm:$0xff]  ;;  %7120 = vst [vmem:[#allocation43_spill] sm:$0xff] %v5180_v49 }
 0x15c   : > { %7117 = vst [vmem:[#allocation41_spill] sm:$0xff] %v5159_v52  ;;  %2414 = vmatprep.subr.bf16.mxu0 %v2194_v27  ;;  %2507 = vmatprep.subr.bf16.mxu1 %v2196_v62  ;;  %v828_v58 = vmul.f32 %v7061_v12, %v7100_v0  ;;  %v836_v21 = vmul.f32 %v7061_v12, %v7106_v23 }
 0x15d   : > { %2415 = vmatpush1.bf16.msra.mxu0 %v2193_v40  ;;  %2508 = vmatpush1.bf16.msra.mxu1 %v2195_v53  ;;  %v576_v16 = vmul.f32 %v3551_v44, %v5147_v51  ;;  %v573_v38 = vmul.f32 %v7118_v48, %v5147_v51  ;;  %v1866_v56 = vadd.f32 %v7119_v7, %v1578_v25 }
 0x15e   : > { %v1380_v18 = vmul.f32 %v7066_v47, %v7110_v60  ;;  %v1858_v27 = vadd.f32 %v7121_v5, %v1570_v9  ;;  %v1020_v35 = vadd.f32 %v828_v58, %v468_v45  ;;  %v1028_v62 = vadd.f32 %v836_v21, %v476_v63  ;;  %v5197_v52 = vpop.permute.xlu1 %682 }
 0x15f   : > { %v1388_v43 = vmul.f32 %v7066_v47, %v7111_v41  ;;  %v934_v40 = vmul.f32 %v6950_v20, %v5180_v49  ;;  %v936_v55 = vmul.f32 %v6951_v39, %v5180_v49  ;;  %v933_v53 = vmul.f32 %v6952_v59, %v5180_v49  ;;  %7123 = vst [vmem:[#allocation16_spill] sm:$0xff] %v5197_v52 }
 0x160   : > { %v935_v25 = vmul.f32 %v6955_v13, %v5180_v49  ;;  %v575_v9 = vmul.f32 %v7122_v10, %v5147_v51  ;;  %v2058_v45 = vmax.f32 %v1866_v56, 0.0  ;;  %v825_v58 = vmul.f32 %v7077_v4, %v7100_v0 }
 0x161   : > { %v1580_v63 = vadd.f32 %v1388_v43, %v1028_v62  ;;  %v1126_v21 = vadd.f32 %v934_v40, %v574_v19  ;;  %v1128_v37 = vadd.f32 %v936_v55, %v576_v16  ;;  %v1125_v22 = vadd.f32 %v933_v53, %v573_v38  ;;  %v7125_v43 = vld [vmem:[#allocation64_spill] sm:$0xff] }
 0x162   : > { %v1572_v17 = vadd.f32 %v1380_v18, %v1020_v35  ;;  %v1127_v46 = vadd.f32 %v935_v25, %v575_v9  ;;  %v2050_v8 = vmax.f32 %v1858_v27, 0.0  ;;  %v473_v49 = vmul.f32 %v7073_v26, %v7099_v3  ;;  %v7127_v55 = vld [vmem:[#allocation56_spill] sm:$0xff] }
 0x163   : > { %v1868_v54 = vadd.f32 %v7119_v7, %v1580_v63  ;;  %v942_v56 = vmul.f32 %v6950_v20, %v5197_v52  ;;  %v944_v62 = vmul.f32 %v6951_v39, %v5197_v52  ;;  %v465_v16 = vmul.f32 %v7073_v26, %v7102_v24  ;;  %v7129_v63 = vld [vmem:[#allocation82_spill] sm:$0xff] }
 0x164   : > { %v1860_v19 = vadd.f32 %v7121_v5, %v1572_v17  ;;  %v941_v38 = vmul.f32 %v6952_v59, %v5197_v52  ;;  %v943_v18 = vmul.f32 %v6955_v13, %v5197_v52  ;;  %v5213_v27 = vpack.c.bf16 %v2058_v45, %v2050_v8  ;;  %v7128_v17 = vld [vmem:[#allocation57_spill] sm:$0xff]  ;;  %v5231_v45 = vpop.permute.xlu1 %1234 }
 0x165   : > { %v833_v35 = vmul.f32 %v7077_v4, %v7106_v23  ;;  %v5218_v40 = vadd.f32 %v7125_v43, %v1126_v21  ;;  %v5221_v53 = vadd.f32 %v7127_v55, %v1128_v37  ;;  %v5224_v25 = vadd.f32 %v7128_v17, %v1125_v22  ;;  %7130 = vst [vmem:[#allocation9_spill] sm:$0xff] %v5231_v45  ;;  %v7132_v43 = vld [vmem:[#allocation34_spill] sm:$0xff] }
 0x166   : > { %7124 = vst [vmem:[#allocation47_spill] sm:$0xff] %v5213_v27  ;;  %v1017_v9 = vadd.f32 %v825_v58, %v465_v16  ;;  %v5227_v51 = vadd.f32 %v7129_v63, %v1127_v46  ;;  %v2060_v59 = vmax.f32 %v1868_v54, 0.0  ;;  %v1377_v8 = vmul.f32 %v7080_v34, %v7110_v60  ;;  %v7131_v27 = vld [vmem:[#allocation21_spill] sm:$0xff]  ;;  %v7133_v46 = vld [vmem:[#allocation35_spill] sm:$0xff] }
 0x167   : > { %7126 = vst [vmem:[#allocation48_spill] sm:$0xff] %v5218_v40  ;;  %v1025_v52 = vadd.f32 %v833_v35, %v473_v49  ;;  %v1134_v21 = vadd.f32 %v942_v56, %v7131_v27  ;;  %v1136_v40 = vadd.f32 %v944_v62, %v7132_v43  ;;  %v2052_v37 = vmax.f32 %v1860_v19, 0.0  ;;  %v7134_v54 = vld [vmem:[#allocation97_spill] sm:$0xff]  ;;  %v7135_v19 = vld [vmem:[#allocation28_spill] sm:$0xff] }
 0x168   : > { %v475_v22 = vmul.f32 %v7088_v50, %v7099_v3  ;;  %v1494_v58 = vmul.f32 %v6939_v1, %v5231_v45  ;;  %v1133_v16 = vadd.f32 %v941_v38, %v7133_v46  ;;  %v1135_v49 = vadd.f32 %v943_v18, %v7134_v54  ;;  %v7136_v38 = vld [vmem:[#allocation29_spill] sm:$0xff] }
 0x169   : > { %v1385_v35 = vmul.f32 %v7080_v34, %v7111_v41  ;;  %v1569_v55 = vadd.f32 %v1377_v8, %v1017_v9  ;;  %v467_v56 = vmul.f32 %v7088_v50, %v7102_v24  ;;  %v827_v62 = vmul.f32 %v7092_v29, %v7100_v0  ;;  %v5258_v0 = vpop.permute.xlu1 %1694  ;;  %v7139_v54 = vld [vmem:[#allocation17_spill] sm:$0xff] }
 0x16a   : > { %v835_v3 = vmul.f32 %v7092_v29, %v7106_v23  ;;  %v1496_v27 = vmul.f32 %v7135_v19, %v5231_v45  ;;  %v1493_v17 = vmul.f32 %v7136_v38, %v5231_v45  ;;  %v5253_v18 = vpack.c.bf16 %v2060_v59, %v2052_v37  ;;  %7138 = vst [vmem:[#allocation117_spill] sm:$0xff] %v5258_v0 }
 0x16b   : > { %v1577_v63 = vadd.f32 %v1385_v35, %v1025_v52  ;;  %v1495_v9 = vmul.f32 %v6945_v15, %v5231_v45  ;;  %v1857_v24 = vadd.f32 %v7121_v5, %v1569_v55  ;;  %v1019_v8 = vadd.f32 %v827_v62, %v467_v56  ;;  %v7140_v56 = vld [vmem:[#allocation66_spill] sm:$0xff] }
 0x16c   : > { %7137 = vst [vmem:[#allocation49_spill] sm:$0xff] %v5253_v18  ;;  %v1027_v43 = vadd.f32 %v835_v3, %v475_v22  ;;  %v5260_v46 = vadd.f32 %v1494_v58, %v1134_v21  ;;  %v1379_v29 = vmul.f32 %v7139_v54, %v7110_v60  ;;  %v1387_v59 = vmul.f32 %v7139_v54, %v7111_v41  ;;  %v7141_v18 = vld [vmem:[#allocation89_spill] sm:$0xff] }
 0x16d   : > { %v1865_v23 = vadd.f32 %v7119_v7, %v1577_v63  ;;  %v1790_v52 = vadd.f32 %v5258_v0, %v5112_v14  ;;  %v1792_v37 = vadd.f32 %v5258_v0, %v5114_v6  ;;  %v1789_v22 = vadd.f32 %v5258_v0, %v5116_v11  ;;  %v5281_v54 = vpop.permute.xlu1 %303 }
 0x16e   : > { %v1791_v21 = vadd.f32 %v5258_v0, %v5140_v57  ;;  %v2049_v58 = vmax.f32 %v1857_v24, 0.0  ;;  %v1571_v35 = vadd.f32 %v1379_v29, %v1019_v8  ;;  %v1579_v55 = vadd.f32 %v1387_v59, %v1027_v43  ;;  %7142 = vst [vmem:[#allocation118_spill] sm:$0xff] %v5281_v54 }
 0x16f   : > { %v450_v60 = vmul.f32 %v6932_v2, %v7140_v56  ;;  %v1982_v62 = vmax.f32 %v1790_v52, 0.0  ;;  %v1984_v41 = vmax.f32 %v1792_v37, 0.0  ;;  %v1981_v3 = vmax.f32 %v1789_v22, 0.0  ;;  %v7147_v22 = vld [vmem:[#allocation85_spill] sm:$0xff] }
 0x170   : > { %v1983_v63 = vmax.f32 %v1791_v21, 0.0  ;;  %v2057_v14 = vmax.f32 %v1865_v23, 0.0  ;;  %v1859_v45 = vadd.f32 %v7121_v5, %v1571_v35  ;;  %v1867_v6 = vadd.f32 %v7119_v7, %v1579_v55  ;;  %v7148_v21 = vld [vmem:[#allocation88_spill] sm:$0xff] }
 0x171   : > { %v810_v11 = vmul.f32 %v7044_v36, %v7141_v18  ;;  %v7143_v29 = vmax.f32 %v5130_v32, 0.0  ;;  %v7144_v24 = vmax.f32 %v5133_v33, 0.0  ;;  %v7145_v43 = vmax.f32 %v5136_v61, 0.0 }
 0x172   : > { %v7146_v23 = vmax.f32 %v5143_v31, 0.0  ;;  %v558_v7 = vmul.f32 %v3548_v42, %v5281_v54  ;;  %v560_v5 = vmul.f32 %v3551_v44, %v5281_v54  ;;  %v557_v37 = vmul.f32 %v7118_v48, %v5281_v54 }
 0x173   : > { %v2186_v57 = vpack.c.bf16 %v7143_v29, %v1982_v62  ;;  %v2188_v8 = vpack.c.bf16 %v7144_v24, %v1984_v41  ;;  %v2185_v59 = vpack.c.bf16 %v7145_v43, %v1981_v3  ;;  %v559_v32 = vmul.f32 %v7122_v10, %v5281_v54 }
 0x174   : > { %v2187_v52 = vpack.c.bf16 %v7146_v23, %v1983_v63  ;;  %v5299_v33 = vadd.f32 %v1496_v27, %v1136_v40  ;;  %v2059_v61 = vmax.f32 %v1867_v6, 0.0  ;;  %v458_v31 = vmul.f32 %v6932_v2, %v7147_v22  ;;  %v5311_v63 = vpop.permute.xlu1 %308  ;;  %v7151_v40 = vld [vmem:[#allocation81_spill] sm:$0xff] }
 0x175   : > { %2416 = vmatprep.subr.bf16.mxu0 %v2186_v57  ;;  %2509 = vmatprep.subr.bf16.mxu1 %v2188_v8  ;;  %v818_v35 = vmul.f32 %v7044_v36, %v7148_v21  ;;  %v5305_v55 = vadd.f32 %v1493_v17, %v1133_v16  ;;  %v5307_v62 = vadd.f32 %v1495_v9, %v1135_v49  ;;  %v2051_v3 = vmax.f32 %v1859_v45, 0.0  ;;  %v7152_v57 = vld [vmem:[#allocation83_spill] sm:$0xff]  ;;  %v7153_v8 = vld [vmem:[#allocation44_spill] sm:$0xff]  ;;  %v7157_v9 = vld [vmem:[#allocation26_spill] sm:$0xff] }
 0x176   : > { %2417 = vmatpush1.bf16.msra.mxu0 %v2185_v59  ;;  %2510 = vmatpush1.bf16.msra.mxu1 %v2187_v52  ;;  %v5309_v41 = vpack.c.bf16 %v2057_v14, %v2049_v58  ;;  %7150 = vst [vmem:[#allocation122_spill] sm:$0xff] %v5311_v63  ;;  %v1110_v27 = vadd.f32 %v7151_v40, %v558_v7  ;;  %v7154_v59 = vld [vmem:[#allocation45_spill] sm:$0xff]  ;;  %v7155_v16 = vld [vmem:[#allocation19_spill] sm:$0xff] }
 0x177   : > { %v1002_v6 = vadd.f32 %v810_v11, %v450_v60  ;;  %v1010_v29 = vadd.f32 %v818_v35, %v458_v31  ;;  %v1362_v24 = vmul.f32 %v7049_v30, %v7152_v57  ;;  %v1112_v43 = vadd.f32 %v7153_v8, %v560_v5  ;;  %v7158_v31 = vld [vmem:[#allocation55_spill] sm:$0xff] }
 0x178   : > { %7149 = vst [vmem:[#allocation121_spill] sm:$0xff] %v5309_v41  ;;  %v1109_v23 = vadd.f32 %v7154_v59, %v557_v37  ;;  %v1111_v17 = vadd.f32 %v7155_v16, %v559_v32  ;;  %v5319_v49 = vpack.c.bf16 %v2059_v61, %v2051_v3  ;;  %v1370_v45 = vmul.f32 %v7049_v30, %v7157_v9  ;;  %v5340_v3 = vpop.permute.xlu1 %674 }
 0x179   : > { %v1554_v58 = vadd.f32 %v1362_v24, %v1002_v6  ;;  %v452_v14 = vmul.f32 %v7058_v28, %v7140_v56  ;;  %v460_v60 = vmul.f32 %v7058_v28, %v7147_v22  ;;  %v812_v11 = vmul.f32 %v7061_v12, %v7141_v18  ;;  %7159 = vst [vmem:[#allocation80_spill] sm:$0xff] %v5340_v3 }
 0x17a   : > { %7156 = vst [vmem:[#allocation60_spill] sm:$0xff] %v5319_v49  ;;  %v820_v52 = vmul.f32 %v7061_v12, %v7148_v21  ;;  %v1364_v7 = vmul.f32 %v7066_v47, %v7152_v57  ;;  %v1372_v5 = vmul.f32 %v7066_v47, %v7157_v9  ;;  %v566_v37 = vmul.f32 %v3548_v42, %v5311_v63 }
 0x17b   : > { %v568_v32 = vmul.f32 %v3551_v44, %v5311_v63  ;;  %v1562_v61 = vadd.f32 %v1370_v45, %v1010_v29  ;;  %v1842_v35 = vadd.f32 %v7158_v31, %v1554_v58  ;;  %v1004_v40 = vadd.f32 %v812_v11, %v452_v14  ;;  %v7160_v29 = vld [vmem:[#allocation36_spill] sm:$0xff] }
 0x17c   : > { %v1012_v6 = vadd.f32 %v820_v52, %v460_v60  ;;  %v449_v24 = vmul.f32 %v7073_v26, %v7140_v56  ;;  %v809_v8 = vmul.f32 %v7077_v4, %v7141_v18  ;;  %v926_v59 = vmul.f32 %v6950_v20, %v5340_v3  ;;  %v7161_v60 = vld [vmem:[#allocation108_spill] sm:$0xff] }
 0x17d   : > { %v928_v16 = vmul.f32 %v6951_v39, %v5340_v3  ;;  %v925_v45 = vmul.f32 %v7160_v29, %v5340_v3  ;;  %v927_v58 = vmul.f32 %v6955_v13, %v5340_v3  ;;  %v565_v14 = vmul.f32 %v7118_v48, %v5311_v63  ;;  %v5365_v29 = vpop.permute.xlu1 %1222 }
 0x17e   : > { %v1850_v11 = vadd.f32 %v7161_v60, %v1562_v61  ;;  %v1556_v52 = vadd.f32 %v1364_v7, %v1004_v40  ;;  %v1564_v54 = vadd.f32 %v1372_v5, %v1012_v6  ;;  %v1118_v49 = vadd.f32 %v926_v59, %v566_v37  ;;  %7162 = vst [vmem:[#allocation78_spill] sm:$0xff] %v5365_v29  ;;  %v5375_v6 = vpop.permute.xlu0 %1774  ;;  %v7164_v59 = vld [vmem:[#allocation91_spill] sm:$0xff] }
 0x17f   : > { %v1120_v41 = vadd.f32 %v928_v16, %v568_v32  ;;  %v567_v0 = vmul.f32 %v7122_v10, %v5311_v63  ;;  %v457_v47 = vmul.f32 %v7073_v26, %v7147_v22  ;;  %v2034_v12 = vmax.f32 %v1842_v35, 0.0  ;;  %7163 = vst [vmem:[#allocation68_spill] sm:$0xff] %v5375_v6  ;;  %v7166_v63 = vld [vmem:[#allocation127_spill] sm:$0xff]  ;;  %v7167_v26 = vld [vmem:[#allocation70_spill] sm:$0xff] }
 0x180   : > { %v1844_v28 = vadd.f32 %v7158_v31, %v1556_v52  ;;  %v1852_v3 = vadd.f32 %v7161_v60, %v1564_v54  ;;  %v817_v13 = vmul.f32 %v7077_v4, %v7148_v21  ;;  %v1117_v7 = vadd.f32 %v925_v45, %v565_v14 }
 0x181   : > { %v1119_v5 = vadd.f32 %v927_v58, %v567_v0  ;;  %v2042_v37 = vmax.f32 %v1850_v11, 0.0  ;;  %v1001_v32 = vadd.f32 %v809_v8, %v449_v24  ;;  %v1470_v61 = vmul.f32 %v6939_v1, %v5365_v29  ;;  %v7165_v0 = vld [vmem:[#allocation92_spill] sm:$0xff] }
 0x182   : > { %v1472_v40 = vmul.f32 %v7135_v19, %v5365_v29  ;;  %v1469_v35 = vmul.f32 %v7136_v38, %v5365_v29  ;;  %v1471_v54 = vmul.f32 %v6945_v15, %v5365_v29  ;;  %v5378_v16 = vadd.f32 %v7164_v59, %v1118_v49  ;;  %v5391_v49 = vpop.permute.xlu1 %1782 }
 0x183   : > { %v5381_v45 = vadd.f32 %v7165_v0, %v1120_v41  ;;  %v2036_v24 = vmax.f32 %v1844_v28, 0.0  ;;  %v2044_v8 = vmax.f32 %v1852_v3, 0.0  ;;  %v1662_v58 = vadd.f32 %v1470_v61, %v1110_v27  ;;  %7169 = vst [vmem:[#allocation22_spill] sm:$0xff] %v5391_v49 }
 0x184   : > { %v1664_v14 = vadd.f32 %v1472_v40, %v1112_v43  ;;  %v1661_v11 = vadd.f32 %v1469_v35, %v1109_v23  ;;  %v1663_v52 = vadd.f32 %v1471_v54, %v1111_v17  ;;  %v5384_v4 = vadd.f32 %v7166_v63, %v1117_v7  ;;  %v7171_v43 = vld [vmem:[#allocation48_spill] sm:$0xff]  ;;  %v7173_v54 = vld [vmem:[#allocation14_spill] sm:$0xff] }
 0x185   : > { %v5387_v38 = vadd.f32 %v7167_v26, %v1119_v5  ;;  %v5389_v29 = vpack.c.bf16 %v2042_v37, %v2034_v12  ;;  %v1009_v15 = vadd.f32 %v817_v13, %v457_v47  ;;  %v5394_v41 = vadd.f32 %v5375_v6, %v1662_v58 }
 0x186   : > { %v5396_v28 = vpack.c.bf16 %v2044_v8, %v2036_v24  ;;  %v1361_v27 = vmul.f32 %v7080_v34, %v7152_v57  ;;  %v1369_v63 = vmul.f32 %v7080_v34, %v7157_v9  ;;  %v1966_v26 = vadd.f32 %v5391_v49, %v7171_v43  ;;  %v5422_v61 = vpop.permute.xlu1 %1786 }
 0x187   : > { %7168 = vst [vmem:[#allocation69_spill] sm:$0xff] %v5389_v29  ;;  %v1968_v12 = vadd.f32 %v5391_v49, %v5221_v53  ;;  %v1965_v13 = vadd.f32 %v5391_v49, %v5224_v25  ;;  %v1967_v47 = vadd.f32 %v5391_v49, %v5227_v51  ;;  %v5411_v23 = vadd.f32 %v5375_v6, %v1664_v14  ;;  %v7191_v49 = vld [vmem:[#allocation52_spill] sm:$0xff] }
 0x188   : > { %7170 = vst [vmem:[#allocation116_spill] sm:$0xff] %v5396_v28  ;;  %v5414_v17 = vadd.f32 %v5375_v6, %v1661_v11  ;;  %v5417_v3 = vadd.f32 %v5375_v6, %v1663_v52  ;;  %v451_v7 = vmul.f32 %v7088_v50, %v7140_v56  ;;  %v2158_v5 = vmax.f32 %v1966_v26, 0.0  ;;  %7172 = vst [vmem:[#allocation111_spill] sm:$0xff] %v5422_v61 }
 0x189   : > { %v2160_v53 = vmax.f32 %v1968_v12, 0.0  ;;  %v2157_v37 = vmax.f32 %v1965_v13, 0.0  ;;  %v2159_v51 = vmax.f32 %v1967_v47, 0.0  ;;  %v1553_v40 = vadd.f32 %v1361_v27, %v1001_v32 }
 0x18a   : > { %v1561_v35 = vadd.f32 %v1369_v63, %v1009_v15  ;;  %v811_v59 = vmul.f32 %v7173_v54, %v7141_v18  ;;  %v1974_v0 = vadd.f32 %v5422_v61, %v5260_v46  ;;  %v1976_v24 = vadd.f32 %v5422_v61, %v5299_v33  ;;  %v7174_v63 = vld [vmem:[#allocation17_spill] sm:$0xff]  ;;  %v5442_v43 = vpop.permute.xlu1 %298 }
 0x18b   : > { %v1973_v56 = vadd.f32 %v5422_v61, %v5305_v55  ;;  %v1975_v8 = vadd.f32 %v5422_v61, %v5307_v62  ;;  %v1841_v58 = vadd.f32 %v7158_v31, %v1553_v40  ;;  %v459_v15 = vmul.f32 %v7088_v50, %v7147_v22  ;;  %7175 = vst [vmem:[#allocation25_spill] sm:$0xff] %v5442_v43  ;;  %v7190_v22 = vld [vmem:[#allocation62_spill] sm:$0xff] }
 0x18c   : > { %v1849_v32 = vadd.f32 %v7161_v60, %v1561_v35  ;;  %v819_v18 = vmul.f32 %v7173_v54, %v7148_v21  ;;  %v2166_v46 = vmax.f32 %v1974_v0, 0.0  ;;  %v2168_v14 = vmax.f32 %v1976_v24, 0.0 }
 0x18d   : > { %v2165_v11 = vmax.f32 %v1973_v56, 0.0  ;;  %v2167_v33 = vmax.f32 %v1975_v8, 0.0  ;;  %v1003_v27 = vadd.f32 %v811_v59, %v451_v7  ;;  %v1363_v62 = vmul.f32 %v7174_v63, %v7152_v57  ;;  %v7178_v56 = vld [vmem:[#allocation115_spill] sm:$0xff] }
 0x18e   : > { %v2041_v52 = vmax.f32 %v1849_v32, 0.0  ;;  %v1011_v55 = vadd.f32 %v819_v18, %v459_v15  ;;  %v2274_v26 = vpack.c.bf16 %v2166_v46, %v2158_v5  ;;  %v2276_v12 = vpack.c.bf16 %v2168_v14, %v2160_v53  ;;  %v7179_v15 = vld [vmem:[#allocation67_spill] sm:$0xff]  ;;  %v5464_v18 = vpop.permute.xlu1 %662  ;;  %v7181_v46 = vld [vmem:[#allocation10_spill] sm:$0xff] }
 0x18f   : > { %v2273_v13 = vpack.c.bf16 %v2165_v11, %v2157_v37  ;;  %v2275_v47 = vpack.c.bf16 %v2167_v33, %v2159_v51  ;;  %v550_v21 = vmul.f32 %v3548_v42, %v5442_v43  ;;  %v552_v40 = vmul.f32 %v3551_v44, %v5442_v43  ;;  %v7176_v51 = vld [vmem:[#allocation114_spill] sm:$0xff]  ;;  %7180 = vst [vmem:[#allocation31_spill] sm:$0xff] %v5464_v18  ;;  %v7182_v11 = vld [vmem:[#allocation77_spill] sm:$0xff] }
 0x190   : > { %v2033_v35 = vmax.f32 %v1841_v58, 0.0  ;;  %2426 = vmatprep.subr.bf16.mxu0 %v2274_v26  ;;  %2519 = vmatprep.subr.bf16.mxu1 %v2276_v12  ;;  %v549_v57 = vmul.f32 %v7118_v48, %v5442_v43  ;;  %v1371_v5 = vmul.f32 %v7174_v63, %v7157_v9  ;;  %v1555_v53 = vadd.f32 %v1363_v62, %v1003_v27  ;;  %v7183_v27 = vld [vmem:[#allocation94_spill] sm:$0xff]  ;;  %v7184_v62 = vld [vmem:[#allocation105_spill] sm:$0xff]  ;;  %v7185_v12 = vld [vmem:[#allocation36_spill] sm:$0xff] }
 0x191   : > { %2427 = vmatpush2.bf16.msra.mxu0 %v2273_v13  ;;  %2520 = vmatpush2.bf16.msra.mxu1 %v2275_v47  ;;  %v1102_v59 = vadd.f32 %v7176_v51, %v550_v21  ;;  %v551_v0 = vmul.f32 %v7122_v10, %v5442_v43  ;;  %v1104_v8 = vadd.f32 %v7178_v56, %v552_v40  ;;  %v7186_v47 = vld [vmem:[#allocation119_spill] sm:$0xff]  ;;  %v7187_v40 = vld [vmem:[#allocation37_spill] sm:$0xff] }
 0x192   : > { %v5458_v24 = vpack.c.bf16 %v2041_v52, %v2033_v35  ;;  %v1563_v58 = vadd.f32 %v1371_v5, %v1011_v55  ;;  %v1843_v32 = vadd.f32 %v7158_v31, %v1555_v53  ;;  %v434_v9 = vmul.f32 %v6932_v2, %v7179_v15  ;;  %v7188_v5 = vld [vmem:[#allocation120_spill] sm:$0xff]  ;;  %v7189_v37 = vld [vmem:[#allocation61_spill] sm:$0xff] }
 0x193   : > { %v442_v14 = vmul.f32 %v6932_v2, %v7181_v46  ;;  %v794_v33 = vmul.f32 %v7044_v36, %v7182_v11  ;;  %v802_v52 = vmul.f32 %v7044_v36, %v7183_v27  ;;  %v1346_v26 = vmul.f32 %v7049_v30, %v7184_v62 }
 0x194   : > { %7177 = vst [vmem:[#allocation125_spill] sm:$0xff] %v5458_v24  ;;  %v902_v31 = vmul.f32 %v6950_v20, %v5464_v18  ;;  %v904_v55 = vmul.f32 %v6951_v39, %v5464_v18  ;;  %v901_v13 = vmul.f32 %v7185_v12, %v5464_v18  ;;  %v1101_v21 = vadd.f32 %v7186_v47, %v549_v57  ;;  %v7192_v57 = vld [vmem:[#allocation7_spill] sm:$0xff] }
 0x195   : > { %v903_v35 = vmul.f32 %v7187_v40, %v5464_v18  ;;  %v1103_v53 = vadd.f32 %v7188_v5, %v551_v0  ;;  %v1851_v51 = vadd.f32 %v7161_v60, %v1563_v58  ;;  %v986_v56 = vadd.f32 %v794_v33, %v434_v9  ;;  %v5491_v18 = vpop.permute.xlu1 %1214  ;;  %v7194_v0 = vld [vmem:[#allocation63_spill] sm:$0xff] }
 0x196   : > { %v1094_v7 = vadd.f32 %v902_v31, %v7189_v37  ;;  %v1096_v25 = vadd.f32 %v904_v55, %v7190_v22  ;;  %v2035_v43 = vmax.f32 %v1843_v32, 0.0  ;;  %v994_v6 = vadd.f32 %v802_v52, %v442_v14  ;;  %7193 = vst [vmem:[#allocation84_spill] sm:$0xff] %v5491_v18  ;;  %v7195_v37 = vld [vmem:[#allocation12_spill] sm:$0xff]  ;;  %v7196_v14 = vld [vmem:[#allocation29_spill] sm:$0xff]  ;;  %v7197_v52 = vld [vmem:[#allocation71_spill] sm:$0xff] }
 0x197   : > { %v2043_v61 = vmax.f32 %v1851_v51, 0.0  ;;  %v1354_v24 = vmul.f32 %v7049_v30, %v7191_v49  ;;  %v1538_v28 = vadd.f32 %v1346_v26, %v986_v56  ;;  %v436_v47 = vmul.f32 %v7192_v57, %v7179_v15  ;;  %v7198_v31 = vld [vmem:[#allocation30_spill] sm:$0xff]  ;;  %v7199_v51 = vld [vmem:[#allocation59_spill] sm:$0xff] }
 0x198   : > { %v1093_v5 = vadd.f32 %v901_v13, %v7194_v0  ;;  %v444_v60 = vmul.f32 %v7192_v57, %v7181_v46  ;;  %v796_v22 = vmul.f32 %v7195_v37, %v7182_v11  ;;  %v804_v58 = vmul.f32 %v7195_v37, %v7183_v27  ;;  %v7200_v0 = vld [vmem:[#allocation15_spill] sm:$0xff] }
 0x199   : > { %v1454_v32 = vmul.f32 %v6939_v1, %v5491_v18  ;;  %v1456_v9 = vmul.f32 %v7135_v19, %v5491_v18  ;;  %v1453_v33 = vmul.f32 %v7196_v14, %v5491_v18  ;;  %v1095_v26 = vadd.f32 %v903_v35, %v7197_v52  ;;  %v5518_v40 = vpop.permute.xlu1 %1218  ;;  %v7205_v35 = vld [vmem:[#allocation124_spill] sm:$0xff] }
 0x19a   : > { %v1455_v55 = vmul.f32 %v7198_v31, %v5491_v18  ;;  %v1546_v13 = vadd.f32 %v1354_v24, %v994_v6  ;;  %v1826_v56 = vadd.f32 %v7199_v51, %v1538_v28  ;;  %v1348_v29 = vmul.f32 %v7200_v0, %v7184_v62  ;;  %7203 = vst [vmem:[#allocation64_spill] sm:$0xff] %v5518_v40 }
 0x19b   : > { %v5512_v2 = vadd.f32 %v1454_v32, %v1094_v7  ;;  %v5514_v37 = vadd.f32 %v1456_v9, %v1096_v25  ;;  %v5516_v57 = vpack.c.bf16 %v2043_v61, %v2035_v43  ;;  %v988_v30 = vadd.f32 %v796_v22, %v436_v47  ;;  %v5533_v7 = vpop.permute.xlu0 %1770 }
 0x19c   : > { %v5520_v12 = vadd.f32 %v1453_v33, %v1093_v5  ;;  %v1834_v52 = vadd.f32 %v7205_v35, %v1546_v13  ;;  %v996_v18 = vadd.f32 %v804_v58, %v444_v60  ;;  %v1356_v6 = vmul.f32 %v7200_v0, %v7191_v49  ;;  %7206 = vst [vmem:[#allocation57_spill] sm:$0xff] %v5533_v7 }
 0x19d   : > { %7201 = vst [vmem:[#allocation98_spill] sm:$0xff] %v5514_v37  ;;  %7202 = vst [vmem:[#allocation32_spill] sm:$0xff] %v5516_v57  ;;  %v1462_v28 = vmul.f32 %v6939_v1, %v5518_v40  ;;  %v1464_v25 = vmul.f32 %v7135_v19, %v5518_v40  ;;  %v1461_v61 = vmul.f32 %v7196_v14, %v5518_v40  ;;  %v2018_v24 = vmax.f32 %v1826_v56, 0.0 }
 0x19e   : > { %7204 = vst [vmem:[#allocation56_spill] sm:$0xff] %v5520_v12  ;;  %v1463_v43 = vmul.f32 %v7198_v31, %v5518_v40  ;;  %v2026_v47 = vmax.f32 %v1834_v52, 0.0  ;;  %v1540_v5 = vadd.f32 %v1348_v29, %v988_v30  ;;  %v1548_v60 = vadd.f32 %v1356_v6, %v996_v18  ;;  %v7207_v12 = vld [vmem:[#allocation8_spill] sm:$0xff]  ;;  %v5542_v40 = vpop.permute.xlu1 %1778 }
 0x19f   : > { %v1654_v22 = vadd.f32 %v1462_v28, %v1102_v59  ;;  %v1656_v58 = vadd.f32 %v1464_v25, %v1104_v8  ;;  %v1653_v32 = vadd.f32 %v1461_v61, %v1101_v21  ;;  %v5535_v33 = vadd.f32 %v1455_v55, %v1095_v26  ;;  %v7219_v55 = vld [vmem:[#allocation103_spill] sm:$0xff] }
 0x1a0   : > { %v1655_v9 = vadd.f32 %v1463_v43, %v1103_v53  ;;  %v5537_v13 = vpack.c.bf16 %v2026_v47, %v2018_v24  ;;  %v1828_v57 = vadd.f32 %v7199_v51, %v1540_v5  ;;  %v433_v37 = vmul.f32 %v7207_v12, %v7179_v15 }
 0x1a1   : > { %v5545_v56 = vadd.f32 %v5533_v7, %v1654_v22  ;;  %v5548_v30 = vadd.f32 %v5533_v7, %v1656_v58  ;;  %v1836_v29 = vadd.f32 %v7205_v35, %v1548_v60  ;;  %v441_v59 = vmul.f32 %v7207_v12, %v7181_v46 }
 0x1a2   : > { %v1958_v8 = vadd.f32 %v5542_v40, %v5378_v16  ;;  %v1960_v18 = vadd.f32 %v5542_v40, %v5381_v45  ;;  %v1957_v21 = vadd.f32 %v5542_v40, %v5384_v4  ;;  %v1959_v53 = vadd.f32 %v5542_v40, %v5387_v38  ;;  %v7208_v4 = vld [vmem:[#allocation13_spill] sm:$0xff]  ;;  %v5573_v47 = vpop.permute.xlu1 %283 }
 0x1a3   : > { %v5564_v52 = vadd.f32 %v5533_v7, %v1653_v32  ;;  %v5567_v6 = vadd.f32 %v5533_v7, %v1655_v9  ;;  %v2020_v61 = vmax.f32 %v1828_v57, 0.0  ;;  %v2028_v43 = vmax.f32 %v1836_v29, 0.0  ;;  %7209 = vst [vmem:[#allocation82_spill] sm:$0xff] %v5573_v47 }
 0x1a4   : > { %v2150_v16 = vmax.f32 %v1958_v8, 0.0  ;;  %v2152_v28 = vmax.f32 %v1960_v18, 0.0  ;;  %v2149_v25 = vmax.f32 %v1957_v21, 0.0  ;;  %v2151_v45 = vmax.f32 %v1959_v53, 0.0 }
 0x1a5   : > { %v793_v24 = vmul.f32 %v7208_v4, %v7182_v11  ;;  %v801_v38 = vmul.f32 %v7208_v4, %v7183_v27  ;;  %v7210_v5 = vmax.f32 %v5394_v41, 0.0  ;;  %v7211_v22 = vmax.f32 %v5411_v23, 0.0 }
 0x1a6   : > { %v7212_v32 = vmax.f32 %v5414_v17, 0.0  ;;  %v7213_v57 = vmax.f32 %v5417_v3, 0.0  ;;  %v526_v8 = vmul.f32 %v3548_v42, %v5573_v47  ;;  %v528_v18 = vmul.f32 %v3551_v44, %v5573_v47 }
 0x1a7   : > { %v2266_v60 = vpack.c.bf16 %v2150_v16, %v7210_v5  ;;  %v2268_v58 = vpack.c.bf16 %v2152_v28, %v7211_v22  ;;  %v525_v21 = vmul.f32 %v7118_v48, %v5573_v47  ;;  %v527_v41 = vmul.f32 %v7122_v10, %v5573_v47 }
 0x1a8   : > { %v2265_v9 = vpack.c.bf16 %v2149_v25, %v7212_v32  ;;  %v2267_v29 = vpack.c.bf16 %v2151_v45, %v7213_v57  ;;  %v5592_v17 = vpack.c.bf16 %v2028_v43, %v2020_v61  ;;  %v985_v3 = vadd.f32 %v793_v24, %v433_v37  ;;  %v5609_v25 = vpop.permute.xlu1 %654 }
 0x1a9   : > { %2428 = vmatprep.subr.bf16.mxu0 %v2266_v60  ;;  %2521 = vmatprep.subr.bf16.mxu1 %v2268_v58  ;;  %v993_v53 = vadd.f32 %v801_v38, %v441_v59  ;;  %v1345_v44 = vmul.f32 %v7080_v34, %v7184_v62  ;;  %v1353_v48 = vmul.f32 %v7080_v34, %v7191_v49  ;;  %v7242_v7 = vmax.f32 %v5545_v56, 0.0 }
 0x1aa   : > { %2429 = vmatpush2.bf16.msra.mxu0 %v2265_v9  ;;  %2522 = vmatpush2.bf16.msra.mxu1 %v2267_v29  ;;  %v435_v10 = vmul.f32 %v7088_v50, %v7179_v15  ;;  %v443_v16 = vmul.f32 %v7088_v50, %v7181_v46  ;;  %v795_v37 = vmul.f32 %v7173_v54, %v7182_v11  ;;  %v7215_v15 = vld [vmem:[#allocation102_spill] sm:$0xff] }
 0x1ab   : > { %v803_v59 = vmul.f32 %v7173_v54, %v7183_v27  ;;  %v1347_v28 = vmul.f32 %v7174_v63, %v7184_v62  ;;  %7214 = vst [vmem:[#allocation21_spill] sm:$0xff] %v5609_v25  ;;  %v1537_v45 = vadd.f32 %v1345_v44, %v985_v3  ;;  %v1545_v61 = vadd.f32 %v1353_v48, %v993_v53  ;;  %v7216_v27 = vld [vmem:[#allocation36_spill] sm:$0xff]  ;;  %v7217_v62 = vld [vmem:[#allocation37_spill] sm:$0xff] }
 0x1ac   : > { %v1355_v43 = vmul.f32 %v7174_v63, %v7191_v49  ;;  %v778_v24 = vmul.f32 %v7044_v36, %v7215_v15  ;;  %v886_v46 = vmul.f32 %v6950_v20, %v5609_v25  ;;  %v888_v11 = vmul.f32 %v6951_v39, %v5609_v25  ;;  %v5625_v3 = vpop.permute.xlu1 %658 }
 0x1ad   : > { %v885_v38 = vmul.f32 %v7216_v27, %v5609_v25  ;;  %v887_v5 = vmul.f32 %v7217_v62, %v5609_v25  ;;  %v1825_v60 = vadd.f32 %v7199_v51, %v1537_v45  ;;  %v1833_v22 = vadd.f32 %v7205_v35, %v1545_v61  ;;  %7218 = vst [vmem:[#allocation34_spill] sm:$0xff] %v5625_v3 }
 0x1ae   : > { %v987_v49 = vadd.f32 %v795_v37, %v435_v10  ;;  %v995_v58 = vadd.f32 %v803_v59, %v443_v16  ;;  %v1078_v32 = vadd.f32 %v886_v46, %v526_v8  ;;  %v1080_v9 = vadd.f32 %v888_v11, %v528_v18  ;;  %v7220_v10 = vld [vmem:[#allocation54_spill] sm:$0xff]  ;;  %v7222_v37 = vld [vmem:[#allocation53_spill] sm:$0xff]  ;;  %v7225_v46 = vld [vmem:[#allocation79_spill] sm:$0xff] }
 0x1af   : > { %v1077_v57 = vadd.f32 %v885_v38, %v525_v21  ;;  %v1079_v29 = vadd.f32 %v887_v5, %v527_v41  ;;  %v2017_v53 = vmax.f32 %v1825_v60, 0.0  ;;  %v2025_v44 = vmax.f32 %v1833_v22, 0.0  ;;  %v7221_v18 = vld [vmem:[#allocation6_spill] sm:$0xff]  ;;  %v7226_v38 = vld [vmem:[#allocation51_spill] sm:$0xff]  ;;  %v7227_v60 = vld [vmem:[#allocation96_spill] sm:$0xff] }
 0x1b0   : > { %v1539_v48 = vadd.f32 %v1347_v28, %v987_v49  ;;  %v1547_v42 = vadd.f32 %v1355_v43, %v995_v58  ;;  %v894_v23 = vmul.f32 %v6950_v20, %v5625_v3  ;;  %v1630_v26 = vadd.f32 %v7219_v55, %v1078_v32  ;;  %v7223_v28 = vld [vmem:[#allocation72_spill] sm:$0xff]  ;;  %v7224_v20 = vld [vmem:[#allocation107_spill] sm:$0xff]  ;;  %v7229_v58 = vld [vmem:[#allocation74_spill] sm:$0xff] }
 0x1b1   : > { %v896_v45 = vmul.f32 %v6951_v39, %v5625_v3  ;;  %v1632_v16 = vadd.f32 %v7220_v10, %v1080_v9  ;;  %v893_v8 = vmul.f32 %v7216_v27, %v5625_v3  ;;  %v1629_v21 = vadd.f32 %v7221_v18, %v1077_v57  ;;  %v7230_v32 = vld [vmem:[#allocation104_spill] sm:$0xff]  ;;  %v7231_v9 = vld [vmem:[#allocation11_spill] sm:$0xff] }
 0x1b2   : > { %v895_v41 = vmul.f32 %v7217_v62, %v5625_v3  ;;  %v1631_v59 = vadd.f32 %v7222_v37, %v1079_v29  ;;  %v1086_v61 = vadd.f32 %v894_v23, %v7223_v28  ;;  %v5641_v55 = vpack.c.bf16 %v2025_v44, %v2017_v53  ;;  %v5649_v62 = vpop.permute.xlu1 %1210  ;;  %v7232_v29 = vld [vmem:[#allocation90_spill] sm:$0xff]  ;;  %v7235_v18 = vld [vmem:[#allocation7_spill] sm:$0xff] }
 0x1b3   : > { %v1088_v43 = vadd.f32 %v896_v45, %v7224_v20  ;;  %v1827_v39 = vadd.f32 %v7199_v51, %v1539_v48  ;;  %v1085_v11 = vadd.f32 %v893_v8, %v7225_v46  ;;  %v1835_v27 = vadd.f32 %v7205_v35, %v1547_v42  ;;  %7228 = vst [vmem:[#allocation35_spill] sm:$0xff] %v5649_v62  ;;  %v7234_v8 = vld [vmem:[#allocation23_spill] sm:$0xff]  ;;  %v7236_v46 = vld [vmem:[#allocation65_spill] sm:$0xff] }
 0x1b4   : > { %v1087_v5 = vadd.f32 %v895_v41, %v7226_v38  ;;  %v786_v22 = vmul.f32 %v7044_v36, %v7227_v60  ;;  %v970_v23 = vadd.f32 %v778_v24, %v7229_v58  ;;  %v1330_v57 = vmul.f32 %v7231_v9, %v7230_v32  ;;  %v7233_v24 = vld [vmem:[#allocation75_spill] sm:$0xff] }
 0x1b5   : > { %v2019_v49 = vmax.f32 %v1827_v39, 0.0  ;;  %v1338_v51 = vmul.f32 %v7231_v9, %v7232_v29  ;;  %v1446_v53 = vmul.f32 %v6939_v1, %v5649_v62  ;;  %v1448_v35 = vmul.f32 %v7135_v19, %v5649_v62 }
 0x1b6   : > { %v1445_v42 = vmul.f32 %v7196_v14, %v5649_v62  ;;  %v1447_v44 = vmul.f32 %v7198_v31, %v5649_v62  ;;  %v2027_v48 = vmax.f32 %v1835_v27, 0.0  ;;  %v978_v45 = vadd.f32 %v786_v22, %v7233_v24  ;;  %v7237_v14 = vld [vmem:[#allocation24_spill] sm:$0xff] }
 0x1b7   : > { %v1522_v10 = vadd.f32 %v1330_v57, %v970_v23  ;;  %v420_v41 = vmul.f32 %v7235_v18, %v7234_v8  ;;  %v1638_v37 = vadd.f32 %v1446_v53, %v1086_v61  ;;  %v1640_v28 = vadd.f32 %v1448_v35, %v1088_v43  ;;  %v5672_v31 = vpop.permute.xlu1 %1766  ;;  %v7238_v27 = vld [vmem:[#allocation12_spill] sm:$0xff]  ;;  %v7241_v35 = vld [vmem:[#allocation39_spill] sm:$0xff] }
 0x1b8   : > { %v1637_v20 = vadd.f32 %v1445_v42, %v1085_v11  ;;  %v1639_v1 = vadd.f32 %v1447_v44, %v1087_v5  ;;  %v5667_v39 = vpack.c.bf16 %v2027_v48, %v2019_v49  ;;  %v1530_v19 = vadd.f32 %v1338_v51, %v978_v45  ;;  %v7239_v5 = vld [vmem:[#allocation98_spill] sm:$0xff]  ;;  %v7240_v57 = vld [vmem:[#allocation56_spill] sm:$0xff] }
 0x1b9   : > { %v1810_v38 = vadd.f32 %v7236_v46, %v1522_v10  ;;  %v428_v58 = vmul.f32 %v7235_v18, %v7237_v14  ;;  %v780_v22 = vmul.f32 %v7238_v27, %v7215_v15  ;;  %v788_v23 = vmul.f32 %v7238_v27, %v7227_v60 }
 0x1ba   : > { %v1332_v61 = vmul.f32 %v7200_v0, %v7230_v32  ;;  %v1340_v43 = vmul.f32 %v7200_v0, %v7232_v29  ;;  %v1934_v11 = vadd.f32 %v5672_v31, %v5512_v2  ;;  %v1936_v49 = vadd.f32 %v5672_v31, %v7239_v5 }
 0x1bb   : > { %v1933_v51 = vadd.f32 %v5672_v31, %v7240_v57  ;;  %v1935_v53 = vadd.f32 %v5672_v31, %v5535_v33  ;;  %v1818_v42 = vadd.f32 %v7241_v35, %v1530_v19  ;;  %v2002_v44 = vmax.f32 %v1810_v38, 0.0  ;;  %v5691_v25 = vpop.permute.xlu1 %1758 }
 0x1bc   : > { %v972_v48 = vadd.f32 %v780_v22, %v420_v41  ;;  %v980_v24 = vadd.f32 %v788_v23, %v428_v58  ;;  %v2126_v45 = vmax.f32 %v1934_v11, 0.0  ;;  %v2128_v10 = vmax.f32 %v1936_v49, 0.0 }
 0x1bd   : > { %v2125_v62 = vmax.f32 %v1933_v51, 0.0  ;;  %v2127_v3 = vmax.f32 %v1935_v53, 0.0  ;;  %v2010_v2 = vmax.f32 %v1818_v42, 0.0  ;;  %v417_v57 = vmul.f32 %v7207_v12, %v7234_v8 }
 0x1be   : > { %v1524_v47 = vadd.f32 %v1332_v61, %v972_v48  ;;  %v1532_v5 = vadd.f32 %v1340_v43, %v980_v24  ;;  %v2258_v33 = vpack.c.bf16 %v7242_v7, %v2126_v45  ;;  %v7243_v19 = vmax.f32 %v5548_v30, 0.0  ;;  %v3120_v45 = vld [vmem:[%s6458_s1 + $0x8] sm:$0xff] }
 0x1bf   : > { %v7244_v41 = vmax.f32 %v5564_v52, 0.0  ;;  %v7245_v22 = vmax.f32 %v5567_v6, 0.0  ;;  %v1918_v11 = vadd.f32 %v5691_v25, %v1630_v26  ;;  %v1920_v61 = vadd.f32 %v5691_v25, %v1632_v16  ;;  %v5711_v52 = vpop.permute.xlu1 %1762 }
 0x1c0   : > { %v2260_v38 = vpack.c.bf16 %v7243_v19, %v2128_v10  ;;  %v1917_v43 = vadd.f32 %v5691_v25, %v1629_v21  ;;  %v1919_v49 = vadd.f32 %v5691_v25, %v1631_v59  ;;  %2430 = vmatprep.subr.bf16.mxu0 %v2258_v33  ;;  %v5707_v7 = vpack.c.bf16 %v2010_v2, %v2002_v44 }
 0x1c1   : > { %v2257_v58 = vpack.c.bf16 %v7244_v41, %v2125_v62  ;;  %v2259_v23 = vpack.c.bf16 %v7245_v22, %v2127_v3  ;;  %v1812_v56 = vadd.f32 %v7236_v46, %v1524_v47  ;;  %v1820_v30 = vadd.f32 %v7241_v35, %v1532_v5 }
 0x1c2   : > { %2523 = vmatprep.subr.bf16.mxu1 %v2260_v38  ;;  %v2110_v6 = vmax.f32 %v1918_v11, 0.0  ;;  %v2112_v26 = vmax.f32 %v1920_v61, 0.0  ;;  %v2109_v3 = vmax.f32 %v1917_v43, 0.0  ;;  %v2111_v16 = vmax.f32 %v1919_v49, 0.0  ;;  %v3121_v43 = vld [vmem:[%s6458_s1 + $0x18] sm:$0xff] }
 0x1c3   : > { %2431 = vmatpush2.bf16.msra.mxu0 %v2257_v58  ;;  %2524 = vmatpush2.bf16.msra.mxu1 %v2259_v23  ;;  %v1926_v21 = vadd.f32 %v5711_v52, %v1638_v37  ;;  %v1928_v59 = vadd.f32 %v5711_v52, %v1640_v28  ;;  %v1925_v62 = vadd.f32 %v5711_v52, %v1637_v20  ;;  %v3198_v53 = vmov 4   ;;  %v3119_v37 = vld [vmem:[%s6458_s1] sm:$0xff] }
 0x1c4   : > { %v1927_v51 = vadd.f32 %v5711_v52, %v1639_v1  ;;  %3093 = vset.pattern.permute.xlu0 %v3198_v53  ;;  %v2004_v47 = vmax.f32 %v1812_v56, 0.0  ;;  %v2012_v42 = vmax.f32 %v1820_v30, 0.0  ;;  %v425_v44 = vmul.f32 %v7207_v12, %v7237_v14  ;;  %3094 = vset.pattern.permute.xlu1 %v3198_v53 }
 0x1c5   : > { %v777_v48 = vmul.f32 %v7208_v4, %v7215_v15  ;;  %2282 = vperm.xlu0 %3093, %v3119_v37   ;;  %v2118_v28 = vmax.f32 %v1926_v21, 0.0  ;;  %v2120_v20 = vmax.f32 %v1928_v59, 0.0  ;;  %v2117_v24 = vmax.f32 %v1925_v62, 0.0  ;;  %2286 = vperm.xlu1 %3094, %v3120_v45   ;;  %v7248_v62 = vld [vmem:[#allocation20_spill] sm:$0xff] }
 0x1c6   : > { %v2119_v1 = vmax.f32 %v1927_v51, 0.0  ;;  %v5727_v10 = vpack.c.bf16 %v2012_v42, %v2004_v47  ;;  %v785_v2 = vmul.f32 %v7208_v4, %v7227_v60  ;;  %v1329_v33 = vmul.f32 %v7080_v34, %v7230_v32  ;;  %v7249_v51 = vld [vmem:[#allocation5_spill] sm:$0xff]  ;;  %v3122_v42 = vld [vmem:[%s6458_s1 + $0x10] sm:$0xff] }
 0x1c7   : > { %v969_v5 = vadd.f32 %v777_v48, %v417_v57  ;;  %v2250_v19 = vpack.c.bf16 %v2118_v28, %v2110_v6  ;;  %v2252_v38 = vpack.c.bf16 %v2120_v20, %v2112_v26  ;;  %v2249_v41 = vpack.c.bf16 %v2117_v24, %v2109_v3  ;;  %v5743_v57 = vld [vmem:[%s6459_s2] ss:$8 sps:$4 sm:$0xff]   ;;  %v7246_v3 = vld [vmem:[#allocation123_spill] sm:$0xff]  ;;  %v7251_v28 = vld [vmem:[#allocation100_spill] sm:$0xff] }
 0x1c8   : > { %v2251_v58 = vpack.c.bf16 %v2119_v1, %v2111_v16  ;;  %v977_v22 = vadd.f32 %v785_v2, %v425_v44  ;;  %v1337_v23 = vmul.f32 %v7080_v34, %v7232_v29  ;;  %v419_v61 = vmul.f32 %v7088_v50, %v7234_v8  ;;  %v7247_v16 = vld [vmem:[#allocation33_spill] sm:$0xff]  ;;  %v7253_v1 = vld [vmem:[#allocation112_spill] sm:$0xff]  ;;  %v7254_v2 = vld [vmem:[#allocation110_spill] sm:$0xff] }
 0x1c9   : > { %v1521_v11 = vadd.f32 %v1329_v33, %v969_v5  ;;  %2294 = vperm.xlu0 %3093, %v3121_v43   ;;  %2432 = vmatprep.subr.bf16.mxu0 %v2250_v19  ;;  %v427_v49 = vmul.f32 %v7088_v50, %v7237_v14  ;;  %v779_v56 = vmul.f32 %v7173_v54, %v7215_v15  ;;  %v7252_v24 = vld [vmem:[#allocation73_spill] sm:$0xff]  ;;  %v7255_v33 = vld [vmem:[#allocation58_spill] sm:$0xff] }
 0x1ca   : > { %2525 = vmatprep.subr.bf16.mxu1 %v2252_v38  ;;  %v787_v8 = vmul.f32 %v7173_v54, %v7227_v60  ;;  %2433 = vmatpush2.bf16.msra.mxu0 %v2249_v41  ;;  %v1529_v30 = vadd.f32 %v1337_v23, %v977_v22  ;;  %v1331_v26 = vmul.f32 %v7174_v63, %v7230_v32  ;;  %v5761_v60 = vld [vmem:[%s6459_s2 + $0x14] ss:$8 sps:$4 sm:$0xff]   ;;  %v7250_v32 = vld [vmem:[#allocation46_spill] sm:$0xff] }
 0x1cb   : > { %2526 = vmatpush2.bf16.msra.mxu1 %v2251_v58  ;;  %v1809_v6 = vadd.f32 %v7236_v46, %v1521_v11  ;;  %2588 = vmatprep.subr.bf16.mxu0 %v7246_v3  ;;  %v971_v21 = vadd.f32 %v779_v56, %v419_v61  ;;  %v1339_v15 = vmul.f32 %v7174_v63, %v7232_v29  ;;  %v3123_v29 = vld [vmem:[%s6458_s1 + $0x38] sm:$0xff]  ;;  %v7256_v38 = vld [vmem:[#allocation38_spill] sm:$0xff]  ;;  %v7257_v58 = vld [vmem:[#allocation93_spill] sm:$0xff] }
 0x1cc   : > { %2681 = vmatprep.subr.bf16.mxu1 %v7247_v16  ;;  %v979_v14 = vadd.f32 %v787_v8, %v427_v49  ;;  %v1817_v59 = vadd.f32 %v7241_v35, %v1529_v30  ;;  %v402_v53 = vmul.f32 %v7249_v51, %v7248_v62  ;;  %v410_v47 = vmul.f32 %v7249_v51, %v7250_v32  ;;  %v7258_v22 = vld [vmem:[#allocation128_spill] sm:$0xff]  ;;  %v3125_v3 = vld [vmem:[%s6458_s1 + $0x48] sm:$0xff] }
 0x1cd   : > { %2290 = vperm.xlu1 %3094, %v3122_v42   ;;  %2310 = vperm.xlu0 %3093, %v3123_v29   ;;  %v2001_v44 = vmax.f32 %v1809_v6, 0.0  ;;  %v1523_v48 = vadd.f32 %v1331_v26, %v971_v21  ;;  %v762_v20 = vmul.f32 %v7044_v36, %v7251_v28  ;;  %v770_v5 = vmul.f32 %v7044_v36, %v7254_v2  ;;  %v5801_v8 = vld [vmem:[%s6459_s2 + $0x10] ss:$8 sps:$4 sm:$0xff]   ;;  %v7259_v16 = vld [vmem:[#allocation106_spill] sm:$0xff]  ;;  %v7260_v21 = vld [vmem:[#allocation101_spill] sm:$0xff] }
 0x1ce   : > { %2435 = vmatmul.mubr.bf16.vlgmr.msra.gmra.mxu0 %v5743_v57  ;;  %2528 = vmatmul.mubr.bf16.vlgmr.msra.gmra.mxu1 %v5743_v57  ;;  %v1531_v37 = vadd.f32 %v1339_v15, %v979_v14  ;;  %v2009_v45 = vmax.f32 %v1817_v59, 0.0  ;;  %v1314_v19 = vmul.f32 %v7231_v9, %v7255_v33  ;;  %v1322_v41 = vmul.f32 %v7231_v9, %v7256_v38  ;;  %v3124_v26 = vld [vmem:[%s6458_s1 + $0x30] sm:$0xff]  ;;  %v7263_v29 = vld [vmem:[#allocation117_spill] sm:$0xff] }
 0x1cf   : > { %2589 = vmatpush1.bf16.msra.mxu0 %v7252_v24  ;;  %2682 = vmatpush1.bf16.msra.mxu1 %v7253_v1  ;;  %v1811_v23 = vadd.f32 %v7236_v46, %v1523_v48  ;;  %v954_v61 = vadd.f32 %v762_v20, %v402_v53  ;;  %v962_v49 = vadd.f32 %v770_v5, %v410_v47  ;;  %v7261_v53 = vld [vmem:[#allocation95_spill] sm:$0xff]  ;;  %v7262_v47 = vld [vmem:[#allocation109_spill] sm:$0xff]  ;;  %v7264_v20 = vld [vmem:[#allocation76_spill] sm:$0xff] }
 0x1d0   : > { %2590 = vmatprep.subr.bf16.mxu0 %v7257_v58  ;;  %2683 = vmatprep.subr.bf16.mxu1 %v7258_v22  ;;  %v1819_v11 = vadd.f32 %v7241_v35, %v1531_v37  ;;  %v5794_v43 = vpack.c.bf16 %v2009_v45, %v2001_v44  ;;  %v404_v56 = vmul.f32 %v7235_v18, %v7248_v62  ;;  %v5827_v37 = vld [vmem:[%s6459_s2 + $0x24] ss:$8 sps:$4 sm:$0xff]  }
 0x1d1   : > { %2966 = vmatprep.mubr.msk.bf16.mxu0 %vm2383_vm0, %v5761_v60  ;;  %2972 = vmatprep.mubr.msk.bf16.mxu1 %vm2383_vm0, %v5761_v60  ;;  %v2003_v46 = vmax.f32 %v1811_v23, 0.0  ;;  %v1506_v30 = vadd.f32 %v1314_v19, %v954_v61  ;;  %v412_v6 = vmul.f32 %v7235_v18, %v7250_v32  ;;  %v1514_v14 = vadd.f32 %v1322_v41, %v962_v49  ;;  %v7265_v23 = vld [vmem:[#allocation42_spill] sm:$0xff] }
 0x1d2   : > { %v2011_v35 = vmax.f32 %v1819_v11, 0.0  ;;  %2306 = vperm.xlu1 %3094, %v3124_v26   ;;  %2318 = vperm.xlu0 %3093, %v3125_v3   ;;  %v764_v15 = vmul.f32 %v7238_v27, %v7251_v28  ;;  %v772_v59 = vmul.f32 %v7238_v27, %v7254_v2  ;;  %v1316_v48 = vmul.f32 %v7200_v0, %v7255_v33  ;;  %v7266_v11 = vld [vmem:[#allocation41_spill] sm:$0xff] }
 0x1d3   : > { %2591 = vmatpush1.bf16.msra.mxu0 %v7259_v16  ;;  %2684 = vmatpush1.bf16.msra.mxu1 %v7260_v21  ;;  %v1794_v44 = vadd.f32 %v7263_v29, %v1506_v30  ;;  %v1802_v24 = vadd.f32 %v7264_v20, %v1514_v14  ;;  %v1324_v5 = vmul.f32 %v7200_v0, %v7256_v38  ;;  %v7268_v30 = vld [vmem:[#allocation49_spill] sm:$0xff] }
 0x1d4   : > { %2592 = vmatprep.subr.bf16.mxu0 %v7261_v53  ;;  %2685 = vmatprep.subr.bf16.mxu1 %v7262_v47  ;;  %v5819_v42 = vpack.c.bf16 %v2011_v35, %v2003_v46  ;;  %v956_v1 = vadd.f32 %v764_v15, %v404_v56  ;;  %v964_v45 = vadd.f32 %v772_v59, %v412_v6  ;;  %v7267_v35 = vld [vmem:[#allocation47_spill] sm:$0xff]  ;;  %v5861_v15 = vld [vmem:[%s6459_s2 + $0x20] ss:$8 sps:$4 sm:$0xff]  }
 0x1d5   : > { %v1986_v19 = vmax.f32 %v1794_v44, 0.0  ;;  %v401_v41 = vmul.f32 %v7207_v12, %v7248_v62  ;;  %v409_v58 = vmul.f32 %v7207_v12, %v7250_v32  ;;  %v761_v22 = vmul.f32 %v7208_v4, %v7251_v28 }
 0x1d6   : > { %2445 = vmatmul.mubr.bf16.gmra.mxu0 %v5801_v8  ;;  %2538 = vmatmul.mubr.bf16.gmra.mxu1 %v5801_v8  ;;  %v1994_v61 = vmax.f32 %v1802_v24, 0.0  ;;  %v1508_v49 = vadd.f32 %v1316_v48, %v956_v1  ;;  %v1516_v56 = vadd.f32 %v1324_v5, %v964_v45  ;;  %v769_v46 = vmul.f32 %v7208_v4, %v7254_v2  ;;  %v3126_v48 = vld [vmem:[%s6458_s1 + $0x40] sm:$0xff]  ;;  %v7270_v1 = vld [vmem:[#allocation60_spill] sm:$0xff] }
 0x1d7   : > { %2593 = vmatpush1.bf16.msra.mxu0 %v7265_v23  ;;  %2686 = vmatpush1.bf16.msra.mxu1 %v7266_v11  ;;  %v953_v6 = vadd.f32 %v761_v22, %v401_v41  ;;  %v1313_v26 = vmul.f32 %v7080_v34, %v7255_v33  ;;  %v1321_v3 = vmul.f32 %v7080_v34, %v7256_v38  ;;  %v7269_v24 = vld [vmem:[#allocation121_spill] sm:$0xff]  ;;  %v5884_v11 = vld [vmem:[%s6459_s2 + $0x34] ss:$8 sps:$4 sm:$0xff]  }
 0x1d8   : > { %2594 = vmatprep.subr.bf16.mxu0 %v7267_v35  ;;  %2687 = vmatprep.subr.bf16.mxu1 %v7268_v30  ;;  %v5854_v16 = vpack.c.bf16 %v1994_v61, %v1986_v19  ;;  %v1796_v21 = vadd.f32 %v7263_v29, %v1508_v49  ;;  %v1804_v14 = vadd.f32 %v7264_v20, %v1516_v56  ;;  %v7271_v41 = vld [vmem:[#allocation69_spill] sm:$0xff]  ;;  %v3127_v56 = vld [vmem:[%s6458_s1 + $0x28] sm:$0xff]  ;;  %v7273_v35 = vld [vmem:[#allocation40_spill] sm:$0xff] }
 0x1d9   : > { %2967 = vmatprep.mubr.msk.bf16.mxu0 %vm2383_vm0, %v5827_v37  ;;  %2973 = vmatprep.mubr.msk.bf16.mxu1 %vm2383_vm0, %v5827_v37  ;;  %v961_v59 = vadd.f32 %v769_v46, %v409_v58  ;;  %v1505_v53 = vadd.f32 %v1313_v26, %v953_v6  ;;  %v403_v47 = vmul.f32 %v7088_v50, %v7248_v62  ;;  %v7274_v6 = vld [vmem:[#allocation86_spill] sm:$0xff] }
 0x1da   : > { %v411_v44 = vmul.f32 %v7088_v50, %v7250_v32  ;;  %2314 = vperm.xlu1 %3094, %v3126_v48   ;;  %v1988_v45 = vmax.f32 %v1796_v21, 0.0  ;;  %v1996_v5 = vmax.f32 %v1804_v14, 0.0  ;;  %v763_v19 = vmul.f32 %v7173_v54, %v7251_v28  ;;  %v7272_v32 = vld [vmem:[#allocation116_spill] sm:$0xff]  ;;  %2302 = vperm.xlu0 %3093, %v3127_v56  }
 0x1db   : > { %2595 = vmatpush1.bf16.msra.mxu0 %v7269_v24  ;;  %2688 = vmatpush1.bf16.msra.mxu1 %v7270_v1  ;;  %v771_v62 = vmul.f32 %v7173_v54, %v7254_v2  ;;  %v1513_v58 = vadd.f32 %v1321_v3, %v961_v59  ;;  %v1793_v22 = vadd.f32 %v7263_v29, %v1505_v53  ;;  %v7275_v3 = vld [vmem:[#allocation125_spill] sm:$0xff]  ;;  %v7277_v59 = vld [vmem:[#allocation43_spill] sm:$0xff] }
 0x1dc   : > { %2596 = vmatprep.subr.bf16.mxu0 %v7271_v41  ;;  %2689 = vmatprep.subr.bf16.mxu1 %v7272_v32  ;;  %v1315_v23 = vmul.f32 %v7174_v63, %v7255_v33  ;;  %v5886_v61 = vpack.c.bf16 %v1996_v5, %v1988_v45  ;;  %v955_v28 = vadd.f32 %v763_v19, %v403_v47  ;;  %v7279_v24 = vld [vmem:[#allocation99_spill] sm:$0xff]  ;;  %v7280_v45 = vld [vmem:[#allocation9_spill] sm:$0xff] }
 0x1dd   : > { %v963_v49 = vadd.f32 %v771_v62, %v411_v44  ;;  %v1323_v2 = vmul.f32 %v7174_v63, %v7256_v38  ;;  %v1801_v33 = vadd.f32 %v7264_v20, %v1513_v58  ;;  %v1985_v46 = vmax.f32 %v1793_v22, 0.0  ;;  %v7276_v38 = vld [vmem:[#allocation32_spill] sm:$0xff] }
 0x1de   : > { %2455 = vmatmul.mubr.bf16.gmra.mxu0 %v5861_v15  ;;  %2548 = vmatmul.mubr.bf16.gmra.mxu1 %v5861_v15  ;;  %v578_v30 = vmul.f32 %v7249_v51, %v7273_v35  ;;  %v586_v26 = vmul.f32 %v7249_v51, %v7274_v6  ;;  %v1507_v21 = vadd.f32 %v1315_v23, %v955_v28  ;;  %v7278_v44 = vld [vmem:[#allocation16_spill] sm:$0xff] }
 0x1df   : > { %2597 = vmatpush1.bf16.msra.mxu0 %v7275_v3  ;;  %2690 = vmatpush1.bf16.msra.mxu1 %v7276_v38  ;;  %v1515_v14 = vadd.f32 %v1323_v2, %v963_v49  ;;  %v938_v53 = vmul.f32 %v7044_v36, %v7277_v59  ;;  %v1993_v47 = vmax.f32 %v1801_v33, 0.0  ;;  %v946_v48 = vmul.f32 %v7044_v36, %v7278_v44  ;;  %v5921_v62 = vld [vmem:[%s6459_s2 + $0x30] ss:$8 sps:$4 sm:$0xff]  }
 0x1e0   : > { %2598 = vmatprep.subr.bf16.mxu0 %v5537_v13  ;;  %2691 = vmatprep.subr.bf16.mxu1 %v5592_v17  ;;  %v1490_v1 = vmul.f32 %v7231_v9, %v7279_v24  ;;  %v1498_v5 = vmul.f32 %v7231_v9, %v7280_v45  ;;  %v1795_v13 = vadd.f32 %v7263_v29, %v1507_v21  ;;  %v3128_v29 = vld [vmem:[%s6458_s1 + $0x20] sm:$0xff]  ;;  %v7282_v3 = vld [vmem:[#allocation111_spill] sm:$0xff] }
 0x1e1   : > { %2968 = vmatprep.mubr.msk.bf16.mxu0 %vm2383_vm0, %v5884_v11  ;;  %2974 = vmatprep.mubr.msk.bf16.mxu1 %vm2383_vm0, %v5884_v11  ;;  %v1803_v17 = vadd.f32 %v7264_v20, %v1515_v14  ;;  %v1130_v19 = vadd.f32 %v938_v53, %v578_v30  ;;  %v2189_v41 = vpack.c.bf16 %v1993_v47, %v1985_v46  ;;  %v7281_v46 = vld [vmem:[#allocation22_spill] sm:$0xff] }
 0x1e2   : > { %v1138_v32 = vadd.f32 %v946_v48, %v586_v26  ;;  %v580_v58 = vmul.f32 %v7235_v18, %v7273_v35  ;;  %v588_v22 = vmul.f32 %v7235_v18, %v7274_v6  ;;  %2298 = vperm.xlu1 %3094, %v3128_v29   ;;  %v1987_v20 = vmax.f32 %v1795_v13, 0.0 }
 0x1e3   : > { %2599 = vmatpush1.bf16.msra.mxu0 %v5641_v55  ;;  %2692 = vmatpush1.bf16.msra.mxu1 %v5667_v39  ;;  %v1995_v23 = vmax.f32 %v1803_v17, 0.0  ;;  %v1682_v28 = vadd.f32 %v1490_v1, %v1130_v19  ;;  %v940_v49 = vmul.f32 %v7238_v27, %v7277_v59  ;;  %v948_v56 = vmul.f32 %v7238_v27, %v7278_v44 }
 0x1e4   : > { %2600 = vmatprep.subr.bf16.mxu0 %v5707_v7  ;;  %2693 = vmatprep.subr.bf16.mxu1 %v5727_v10  ;;  %v1690_v2 = vadd.f32 %v1498_v5, %v1138_v32  ;;  %v1492_v33 = vmul.f32 %v7200_v0, %v7279_v24  ;;  %v1500_v26 = vmul.f32 %v7200_v0, %v7280_v45  ;;  %v5946_v7 = vld [vmem:[%s6459_s2 + $0x44] ss:$8 sps:$4 sm:$0xff]   ;;  %v3129_v10 = vld [vmem:[%s6458_s1 + $0x58] sm:$0xff] }
 0x1e5   : > { %v2191_v55 = vpack.c.bf16 %v1995_v23, %v1987_v20  ;;  %v1970_v39 = vadd.f32 %v7281_v46, %v1682_v28  ;;  %v1132_v30 = vadd.f32 %v940_v49, %v580_v58  ;;  %2326 = vperm.xlu0 %3093, %v3129_v10   ;;  %v1140_v21 = vadd.f32 %v948_v56, %v588_v22  ;;  %v5979_v58 = vld [vmem:[%s6459_s2 + $0x40] ss:$8 sps:$4 sm:$0xff]   ;;  %v3130_v20 = vld [vmem:[%s6458_s1 + $0x50] sm:$0xff] }
 0x1e6   : > { %2465 = vmatmul.mubr.bf16.gmra.mxu0 %v5921_v62  ;;  %2558 = vmatmul.mubr.bf16.gmra.mxu1 %v5921_v62  ;;  %v1978_v38 = vadd.f32 %v7282_v3, %v1690_v2  ;;  %v577_v14 = vmul.f32 %v7207_v12, %v7273_v35  ;;  %v585_v48 = vmul.f32 %v7207_v12, %v7274_v6  ;;  %v5993_v56 = vld [vmem:[%s6459_s2 + $0x54] ss:$8 sps:$4 sm:$0xff]  }
 0x1e7   : > { %2601 = vmatpush1.bf16.msra.mxu0 %v5794_v43  ;;  %2694 = vmatpush1.bf16.msra.mxu1 %v5819_v42  ;;  %v2162_v53 = vmax.f32 %v1970_v39, 0.0  ;;  %v1684_v47 = vadd.f32 %v1492_v33, %v1132_v30  ;;  %v937_v1 = vmul.f32 %v7208_v4, %v7277_v59  ;;  %v1692_v13 = vadd.f32 %v1500_v26, %v1140_v21  ;;  %v7283_v30 = vld [vmem:[#allocation118_spill] sm:$0xff] }
 0x1e8   : > { %2602 = vmatprep.subr.bf16.mxu0 %v5854_v16  ;;  %2695 = vmatprep.subr.bf16.mxu1 %v5886_v61  ;;  %v2170_v5 = vmax.f32 %v1978_v38, 0.0  ;;  %v945_v17 = vmul.f32 %v7208_v4, %v7278_v44  ;;  %v1489_v43 = vmul.f32 %v7080_v34, %v7279_v24  ;;  %v1497_v16 = vmul.f32 %v7080_v34, %v7280_v45 }
 0x1e9   : > { %v1972_v42 = vadd.f32 %v7281_v46, %v1684_v47  ;;  %2969 = vmatprep.mubr.msk.bf16.mxu0 %vm2383_vm0, %v5946_v7  ;;  %2975 = vmatprep.mubr.msk.bf16.mxu1 %vm2383_vm0, %v5946_v7  ;;  %v1129_v19 = vadd.f32 %v937_v1, %v577_v14  ;;  %v1980_v32 = vadd.f32 %v7282_v3, %v1692_v13  ;;  %v7285_v47 = vld [vmem:[#allocation113_spill] sm:$0xff] }
 0x1ea   : > { %v2278_v61 = vpack.c.bf16 %v2170_v5, %v2162_v53  ;;  %v1137_v22 = vadd.f32 %v945_v17, %v585_v48  ;;  %v579_v29 = vmul.f32 %v7088_v50, %v7273_v35  ;;  %2322 = vperm.xlu1 %3094, %v3130_v20   ;;  %v587_v49 = vmul.f32 %v7088_v50, %v7274_v6  ;;  %v7286_v5 = vld [vmem:[#allocation80_spill] sm:$0xff]  ;;  %v7287_v17 = vld [vmem:[#allocation78_spill] sm:$0xff] }
 0x1eb   : > { %2603 = vmatpush1.bf16.msra.mxu0 %v2189_v41  ;;  %2696 = vmatpush1.bf16.msra.mxu1 %v2191_v55  ;;  %v2164_v23 = vmax.f32 %v1972_v42, 0.0  ;;  %v1681_v28 = vadd.f32 %v1489_v43, %v1129_v19  ;;  %v939_v2 = vmul.f32 %v7173_v54, %v7277_v59  ;;  %v2172_v35 = vmax.f32 %v1980_v32, 0.0 }
 0x1ec   : > { %2612 = vmatprep.subr.bf16.mxu0 %v2278_v61  ;;  %v1689_v33 = vadd.f32 %v1497_v16, %v1137_v22  ;;  %v947_v41 = vmul.f32 %v7173_v54, %v7278_v44  ;;  %v1491_v55 = vmul.f32 %v7174_v63, %v7279_v24  ;;  %v1499_v59 = vmul.f32 %v7174_v63, %v7280_v45  ;;  %v7284_v24 = vld [vmem:[#allocation122_spill] sm:$0xff] }
 0x1ed   : > { %v1969_v39 = vadd.f32 %v7281_v46, %v1681_v28  ;;  %v1131_v6 = vadd.f32 %v939_v2, %v579_v29  ;;  %v562_v26 = vmul.f32 %v7249_v51, %v7283_v30  ;;  %v2280_v10 = vpack.c.bf16 %v2172_v35, %v2164_v23  ;;  %v7288_v16 = vld [vmem:[#allocation126_spill] sm:$0xff]  ;;  %v6030_v28 = vld [vmem:[%s6459_s2 + $0x50] ss:$8 sps:$4 sm:$0xff]  }
 0x1ee   : > { %2475 = vmatmul.mubr.bf16.gmra.mxu0 %v5979_v58  ;;  %2568 = vmatmul.mubr.bf16.gmra.mxu1 %v5979_v58  ;;  %v1977_v38 = vadd.f32 %v7282_v3, %v1689_v33  ;;  %v1139_v44 = vadd.f32 %v947_v41, %v587_v49  ;;  %v570_v53 = vmul.f32 %v7249_v51, %v7284_v24 }
 0x1ef   : > { %v2161_v21 = vmax.f32 %v1969_v39, 0.0  ;;  %v1683_v14 = vadd.f32 %v1491_v55, %v1131_v6  ;;  %v922_v48 = vmul.f32 %v7044_v36, %v7285_v47  ;;  %2970 = vmatprep.mubr.msk.bf16.mxu0 %vm2383_vm0, %v5993_v56  ;;  %2976 = vmatprep.mubr.msk.bf16.mxu1 %vm2383_vm0, %v5993_v56  ;;  %v930_v13 = vmul.f32 %v7044_v36, %v7286_v5  ;;  %v7289_v39 = vld [vmem:[#allocation68_spill] sm:$0xff] }
 0x1f0   : > { %2705 = vmatprep.subr.bf16.mxu1 %v2280_v10  ;;  %v2169_v45 = vmax.f32 %v1977_v38, 0.0  ;;  %v1691_v1 = vadd.f32 %v1499_v59, %v1139_v44  ;;  %v1474_v43 = vmul.f32 %v7231_v9, %v7287_v17  ;;  %v1482_v61 = vmul.f32 %v7231_v9, %v7288_v16 }
 0x1f1   : > { %v1971_v42 = vadd.f32 %v7281_v46, %v1683_v14  ;;  %v1114_v19 = vadd.f32 %v922_v48, %v562_v26  ;;  %v564_v32 = vmul.f32 %v7235_v18, %v7283_v30  ;;  %v1122_v20 = vadd.f32 %v930_v13, %v570_v53  ;;  %v3131_v13 = vld [vmem:[%s6459_s2 + $0x4] ss:$8 sps:$4 sm:$0xff]  }
 0x1f2   : > { %v2277_v22 = vpack.c.bf16 %v2169_v45, %v2161_v21  ;;  %v1979_v29 = vadd.f32 %v7282_v3, %v1691_v1  ;;  %v572_v23 = vmul.f32 %v7235_v18, %v7284_v24  ;;  %v924_v2 = vmul.f32 %v7238_v27, %v7285_v47 }
 0x1f3   : > { %v2163_v46 = vmax.f32 %v1971_v42, 0.0  ;;  %v1666_v49 = vadd.f32 %v1474_v43, %v1114_v19  ;;  %v932_v35 = vmul.f32 %v7238_v27, %v7286_v5  ;;  %v1674_v3 = vadd.f32 %v1482_v61, %v1122_v20 }
 0x1f4   : > { %2613 = vmatpush2.bf16.msra.mxu0 %v2277_v22  ;;  %v2171_v33 = vmax.f32 %v1979_v29, 0.0  ;;  %v1476_v41 = vmul.f32 %v7200_v0, %v7287_v17  ;;  %v1484_v55 = vmul.f32 %v7200_v0, %v7288_v16  ;;  %v1116_v59 = vadd.f32 %v924_v2, %v564_v32 }
 0x1f5   : > { %v1954_v6 = vadd.f32 %v7289_v39, %v1666_v49  ;;  %v1124_v26 = vadd.f32 %v932_v35, %v572_v23  ;;  %v561_v10 = vmul.f32 %v7207_v12, %v7283_v30  ;;  %v1962_v44 = vadd.f32 %v5542_v40, %v1674_v3 }
 0x1f6   : > { %v2279_v38 = vpack.c.bf16 %v2171_v33, %v2163_v46  ;;  %v569_v21 = vmul.f32 %v7207_v12, %v7284_v24  ;;  %v921_v14 = vmul.f32 %v7208_v4, %v7285_v47  ;;  %2485 = vmatmul.mubr.bf16.gmra.mxu0 %v6030_v28  ;;  %v1668_v48 = vadd.f32 %v1476_v41, %v1116_v59 }
 0x1f7   : > { %v2146_v53 = vmax.f32 %v1954_v6, 0.0  ;;  %v1676_v45 = vadd.f32 %v1484_v55, %v1124_v26  ;;  %v929_v1 = vmul.f32 %v7208_v4, %v7286_v5  ;;  %2578 = vmatmul.mubr.bf16.gmra.mxu1 %v6030_v28  ;;  %2977 = vmatprep.mubr.msk.bf16.mxu0 %vm2383_vm0, %v3131_v13  ;;  %v2154_v43 = vmax.f32 %v1962_v44, 0.0 }
 0x1f8   : > { %2706 = vmatpush2.bf16.msra.mxu1 %v2279_v38  ;;  %v1113_v42 = vadd.f32 %v921_v14, %v561_v10  ;;  %v1473_v19 = vmul.f32 %v7080_v34, %v7287_v17  ;;  %v1481_v61 = vmul.f32 %v7080_v34, %v7288_v16  ;;  %2983 = vmatprep.mubr.msk.bf16.mxu1 %vm2383_vm0, %v3131_v13  ;;  %v7290_v10 = vld [vmem:[#allocation87_spill] sm:$0xff]  ;;  %v7294_v13 = vld [vmem:[#allocation84_spill] sm:$0xff] }
 0x1f9   : > { %v1956_v32 = vadd.f32 %v7289_v39, %v1668_v48  ;;  %v1964_v22 = vadd.f32 %v5542_v40, %v1676_v45  ;;  %v1121_v29 = vadd.f32 %v929_v1, %v569_v21  ;;  %v563_v20 = vmul.f32 %v7088_v50, %v7283_v30  ;;  %v7293_v1 = vld [vmem:[#allocation50_spill] sm:$0xff] }
 0x1fa   : > { %v2270_v23 = vpack.c.bf16 %v2154_v43, %v2146_v53  ;;  %v1665_v46 = vadd.f32 %v1473_v19, %v1113_v42  ;;  %v571_v49 = vmul.f32 %v7088_v50, %v7284_v24  ;;  %v923_v2 = vmul.f32 %v7173_v54, %v7285_v47  ;;  %v7292_v53 = vld [vmem:[#allocation31_spill] sm:$0xff] }
 0x1fb   : > { %v2148_v35 = vmax.f32 %v1956_v32, 0.0  ;;  %v2156_v33 = vmax.f32 %v1964_v22, 0.0  ;;  %v1673_v3 = vadd.f32 %v1481_v61, %v1121_v29  ;;  %v931_v41 = vmul.f32 %v7173_v54, %v7286_v5  ;;  %v7291_v5 = vld [vmem:[#allocation25_spill] sm:$0xff]  ;;  %v7295_v61 = vld [vmem:[#allocation64_spill] sm:$0xff] }
 0x1fc   : > { %2614 = vmatprep.subr.bf16.mxu0 %v2270_v23  ;;  %v1953_v55 = vadd.f32 %v7289_v39, %v1665_v46  ;;  %v1115_v6 = vadd.f32 %v923_v2, %v563_v20  ;;  %v1475_v30 = vmul.f32 %v7174_v63, %v7287_v17  ;;  %v1483_v59 = vmul.f32 %v7174_v63, %v7288_v16 }
 0x1fd   : > { %v2272_v24 = vpack.c.bf16 %v2156_v33, %v2148_v35  ;;  %v1961_v26 = vadd.f32 %v5542_v40, %v1673_v3  ;;  %v1123_v47 = vadd.f32 %v931_v41, %v571_v49  ;;  %v546_v38 = vmul.f32 %v7249_v51, %v7290_v10 }
 0x1fe   : > { %v2145_v44 = vmax.f32 %v1953_v55, 0.0  ;;  %v1667_v21 = vadd.f32 %v1475_v30, %v1115_v6  ;;  %v554_v14 = vmul.f32 %v7249_v51, %v7291_v5  ;;  %v906_v48 = vmul.f32 %v7044_v36, %v7292_v53 }
 0x1ff   : > { %2707 = vmatprep.subr.bf16.mxu1 %v2272_v24  ;;  %v2153_v17 = vmax.f32 %v1961_v26, 0.0  ;;  %v1675_v45 = vadd.f32 %v1483_v59, %v1123_v47  ;;  %v914_v16 = vmul.f32 %v7044_v36, %v7293_v1  ;;  %v1458_v43 = vmul.f32 %v7231_v9, %v7294_v13  ;;  %v7296_v26 = vld [vmem:[#allocation57_spill] sm:$0xff] }
 0x200   : > { %v1955_v42 = vadd.f32 %v7289_v39, %v1667_v21  ;;  %v1098_v19 = vadd.f32 %v906_v48, %v546_v38  ;;  %v1466_v32 = vmul.f32 %v7231_v9, %v7295_v61  ;;  %v548_v22 = vmul.f32 %v7235_v18, %v7290_v10 }
 0x201   : > { %v2269_v29 = vpack.c.bf16 %v2153_v17, %v2145_v44  ;;  %v1963_v20 = vadd.f32 %v5542_v40, %v1675_v45  ;;  %v1106_v23 = vadd.f32 %v914_v16, %v554_v14  ;;  %v556_v46 = vmul.f32 %v7235_v18, %v7291_v5 }
 0x202   : > { %v2147_v49 = vmax.f32 %v1955_v42, 0.0  ;;  %v1650_v2 = vadd.f32 %v1458_v43, %v1098_v19  ;;  %v908_v35 = vmul.f32 %v7238_v27, %v7292_v53  ;;  %v916_v39 = vmul.f32 %v7238_v27, %v7293_v1 }
 0x203   : > { %2615 = vmatpush2.bf16.msra.mxu0 %v2269_v29  ;;  %v2155_v33 = vmax.f32 %v1963_v20, 0.0  ;;  %v1658_v3 = vadd.f32 %v1466_v32, %v1106_v23  ;;  %v1460_v41 = vmul.f32 %v7200_v0, %v7294_v13  ;;  %v1468_v40 = vmul.f32 %v7200_v0, %v7295_v61 }
 0x204   : > { %v1938_v55 = vadd.f32 %v5672_v31, %v1650_v2  ;;  %v1100_v6 = vadd.f32 %v908_v35, %v548_v22  ;;  %v1108_v30 = vadd.f32 %v916_v39, %v556_v46  ;;  %v545_v59 = vmul.f32 %v7207_v12, %v7290_v10 }
 0x205   : > { %v2271_v24 = vpack.c.bf16 %v2155_v33, %v2147_v49  ;;  %v1946_v47 = vadd.f32 %v7296_v26, %v1658_v3  ;;  %v553_v38 = vmul.f32 %v7207_v12, %v7291_v5  ;;  %v905_v44 = vmul.f32 %v7208_v4, %v7292_v53 }
 0x206   : > { %v2130_v21 = vmax.f32 %v1938_v55, 0.0  ;;  %v1652_v14 = vadd.f32 %v1460_v41, %v1100_v6  ;;  %v1660_v48 = vadd.f32 %v1468_v40, %v1108_v30  ;;  %v913_v17 = vmul.f32 %v7208_v4, %v7293_v1  ;;  %v7297_v6 = vld [vmem:[#allocation82_spill] sm:$0xff] }
 0x207   : > { %2708 = vmatpush2.bf16.msra.mxu1 %v2271_v24  ;;  %v2138_v45 = vmax.f32 %v1946_v47, 0.0  ;;  %v1097_v16 = vadd.f32 %v905_v44, %v545_v59  ;;  %v1457_v43 = vmul.f32 %v7080_v34, %v7294_v13  ;;  %v1465_v42 = vmul.f32 %v7080_v34, %v7295_v61 }
 0x208   : > { %v1940_v19 = vadd.f32 %v5672_v31, %v1652_v14  ;;  %v1948_v32 = vadd.f32 %v7296_v26, %v1660_v48  ;;  %v1105_v22 = vadd.f32 %v913_v17, %v553_v38  ;;  %v547_v29 = vmul.f32 %v7088_v50, %v7290_v10  ;;  %v7299_v38 = vld [vmem:[#allocation21_spill] sm:$0xff]  ;;  %v7300_v14 = vld [vmem:[#allocation34_spill] sm:$0xff] }
 0x209   : > { %v2262_v20 = vpack.c.bf16 %v2138_v45, %v2130_v21  ;;  %v1649_v23 = vadd.f32 %v1457_v43, %v1097_v16  ;;  %v555_v46 = vmul.f32 %v7088_v50, %v7291_v5  ;;  %v907_v49 = vmul.f32 %v7173_v54, %v7292_v53  ;;  %v7301_v48 = vld [vmem:[#allocation18_spill] sm:$0xff]  ;;  %v7302_v43 = vld [vmem:[#allocation35_spill] sm:$0xff] }
 0x20a   : > { %v2132_v2 = vmax.f32 %v1940_v19, 0.0  ;;  %v2140_v35 = vmax.f32 %v1948_v32, 0.0  ;;  %v1657_v39 = vadd.f32 %v1465_v42, %v1105_v22  ;;  %v915_v33 = vmul.f32 %v7173_v54, %v7293_v1  ;;  %v7298_v1 = vld [vmem:[#allocation27_spill] sm:$0xff] }
 0x20b   : > { %2616 = vmatprep.subr.bf16.mxu0 %v2262_v20  ;;  %v1937_v3 = vadd.f32 %v5672_v31, %v1649_v23  ;;  %v1099_v41 = vadd.f32 %v907_v49, %v547_v29  ;;  %v1459_v10 = vmul.f32 %v7174_v63, %v7294_v13  ;;  %v1467_v40 = vmul.f32 %v7174_v63, %v7295_v61 }
 0x20c   : > { %v2264_v5 = vpack.c.bf16 %v2140_v35, %v2132_v2  ;;  %v1945_v55 = vadd.f32 %v7296_v26, %v1657_v39  ;;  %v1107_v53 = vadd.f32 %v915_v33, %v555_v46  ;;  %v530_v30 = vmul.f32 %v7249_v51, %v7297_v6 }
 0x20d   : > { %v2129_v59 = vmax.f32 %v1937_v3, 0.0  ;;  %v1651_v24 = vadd.f32 %v1459_v10, %v1099_v41  ;;  %v538_v47 = vmul.f32 %v7249_v51, %v7298_v1  ;;  %v890_v44 = vmul.f32 %v7044_v36, %v7299_v38 }
 0x20e   : > { %2709 = vmatprep.subr.bf16.mxu1 %v2264_v5  ;;  %v2137_v13 = vmax.f32 %v1945_v55, 0.0  ;;  %v1659_v21 = vadd.f32 %v1467_v40, %v1107_v53  ;;  %v898_v61 = vmul.f32 %v7044_v36, %v7300_v14  ;;  %v1442_v17 = vmul.f32 %v7231_v9, %v7301_v48 }
 0x20f   : > { %v1939_v45 = vadd.f32 %v5672_v31, %v1651_v24  ;;  %v1082_v16 = vadd.f32 %v890_v44, %v530_v30  ;;  %v1450_v42 = vmul.f32 %v7231_v9, %v7302_v43  ;;  %v532_v51 = vmul.f32 %v7235_v18, %v7297_v6 }
 0x210   : > { %v2261_v19 = vpack.c.bf16 %v2137_v13, %v2129_v59  ;;  %v1947_v32 = vadd.f32 %v7296_v26, %v1659_v21  ;;  %v1090_v22 = vadd.f32 %v898_v61, %v538_v47  ;;  %v540_v29 = vmul.f32 %v7235_v18, %v7298_v1 }
 0x211   : > { %v2131_v36 = vmax.f32 %v1939_v45, 0.0  ;;  %v1634_v20 = vadd.f32 %v1442_v17, %v1082_v16  ;;  %v892_v23 = vmul.f32 %v7238_v27, %v7299_v38  ;;  %v900_v31 = vmul.f32 %v7238_v27, %v7300_v14 }
 0x212   : > { %2617 = vmatpush2.bf16.msra.mxu0 %v2261_v19  ;;  %v2139_v9 = vmax.f32 %v1947_v32, 0.0  ;;  %v1642_v46 = vadd.f32 %v1450_v42, %v1090_v22  ;;  %v1444_v49 = vmul.f32 %v7200_v0, %v7301_v48  ;;  %v1452_v26 = vmul.f32 %v7200_v0, %v7302_v43 }
 0x213   : > { %v1922_v2 = vadd.f32 %v5691_v25, %v1634_v20  ;;  %v1084_v18 = vadd.f32 %v892_v23, %v532_v51  ;;  %v1092_v35 = vadd.f32 %v900_v31, %v540_v29  ;;  %v529_v39 = vmul.f32 %v7207_v12, %v7297_v6 }
 0x214   : > { %v2263_v33 = vpack.c.bf16 %v2139_v9, %v2131_v36  ;;  %v1930_v3 = vadd.f32 %v5711_v52, %v1642_v46  ;;  %v537_v27 = vmul.f32 %v7207_v12, %v7298_v1  ;;  %v889_v41 = vmul.f32 %v7208_v4, %v7299_v38 }
 0x215   : > { %v2114_v10 = vmax.f32 %v1922_v2, 0.0  ;;  %v1636_v40 = vadd.f32 %v1444_v49, %v1084_v18  ;;  %v1644_v5 = vadd.f32 %v1452_v26, %v1092_v35  ;;  %v897_v0 = vmul.f32 %v7208_v4, %v7300_v14 }
 0x216   : > { %2710 = vmatpush2.bf16.msra.mxu1 %v2263_v33  ;;  %v2122_v55 = vmax.f32 %v1930_v3, 0.0  ;;  %v1081_v53 = vadd.f32 %v889_v41, %v529_v39  ;;  %v1441_v30 = vmul.f32 %v7080_v34, %v7301_v48  ;;  %v1449_v59 = vmul.f32 %v7080_v34, %v7302_v43 }
 0x217   : > { %v1924_v12 = vadd.f32 %v5691_v25, %v1636_v40  ;;  %v1932_v24 = vadd.f32 %v5711_v52, %v1644_v5  ;;  %v1089_v47 = vadd.f32 %v897_v0, %v537_v27  ;;  %v531_v44 = vmul.f32 %v7088_v50, %v7297_v6 }
 0x218   : > { %v2254_v13 = vpack.c.bf16 %v2122_v55, %v2114_v10  ;;  %v1633_v21 = vadd.f32 %v1441_v30, %v1081_v53  ;;  %v539_v4 = vmul.f32 %v7088_v50, %v7298_v1  ;;  %v891_v61 = vmul.f32 %v7173_v54, %v7299_v38 }
 0x219   : > { %v2116_v17 = vmax.f32 %v1924_v12, 0.0  ;;  %v2124_v45 = vmax.f32 %v1932_v24, 0.0  ;;  %v1641_v16 = vadd.f32 %v1449_v59, %v1089_v47  ;;  %v899_v34 = vmul.f32 %v7173_v54, %v7300_v14 }
 0x21a   : > { %2618 = vmatprep.subr.bf16.mxu0 %v2254_v13  ;;  %v1921_v42 = vadd.f32 %v5691_v25, %v1633_v21  ;;  %v1083_v51 = vadd.f32 %v891_v61, %v531_v44  ;;  %v1443_v6 = vmul.f32 %v7174_v63, %v7301_v48  ;;  %v1451_v19 = vmul.f32 %v7174_v63, %v7302_v43 }
 0x21b   : > { %v2256_v50 = vpack.c.bf16 %v2124_v45, %v2116_v17  ;;  %v1929_v1 = vadd.f32 %v5711_v52, %v1641_v16  ;;  %v1091_v38 = vadd.f32 %v899_v34, %v539_v4 }
 0x21c   : > { %v1635_v32 = vadd.f32 %v1443_v6, %v1083_v51  ;;  %v2113_v22 = vmax.f32 %v1921_v42, 0.0 }
 0x21d   : > { %2711 = vmatprep.subr.bf16.mxu1 %v2256_v50  ;;  %v2121_v29 = vmax.f32 %v1929_v1, 0.0  ;;  %v1643_v36 = vadd.f32 %v1451_v19, %v1091_v38 }
 0x21e   : > { %v1923_v54 = vadd.f32 %v5691_v25, %v1635_v32 }
 0x21f   : > { %v2253_v14 = vpack.c.bf16 %v2121_v29, %v2113_v22  ;;  %v1931_v20 = vadd.f32 %v5711_v52, %v1643_v36 }
 0x220   : > { %v2115_v23 = vmax.f32 %v1923_v54, 0.0 }
 0x221   : > { %2619 = vmatpush2.bf16.msra.mxu0 %v2253_v14  ;;  %v2123_v48 = vmax.f32 %v1931_v20, 0.0 }
 0x223   : > { %v2255_v31 = vpack.c.bf16 %v2123_v48, %v2115_v23 }
 0x224   : > { %2621 = vmatmul.mubr.bf16.vlgmr.msra.gmra.mxu0 %v5743_v57 }
 0x225   : > { %2712 = vmatpush2.bf16.msra.mxu1 %v2255_v31  ;;  %2978 = vmatprep.mubr.msk.bf16.mxu0 %vm2383_vm0, %v5761_v60 }
 0x228   : > { %2714 = vmatmul.mubr.bf16.vlgmr.msra.gmra.mxu1 %v5743_v57 }
 0x229   : > { %2984 = vmatprep.mubr.msk.bf16.mxu1 %vm2383_vm0, %v5761_v60 }
 0x22c   : > { %2631 = vmatmul.mubr.bf16.gmra.mxu0 %v5801_v8 }
 0x22d   : > { %2979 = vmatprep.mubr.msk.bf16.mxu0 %vm2383_vm0, %v5827_v37 }
 0x230   : > { %2724 = vmatmul.mubr.bf16.gmra.mxu1 %v5801_v8 }
 0x231   : > { %2985 = vmatprep.mubr.msk.bf16.mxu1 %vm2383_vm0, %v5827_v37 }
 0x234   : > { %2641 = vmatmul.mubr.bf16.gmra.mxu0 %v5861_v15 }
 0x235   : > { %2980 = vmatprep.mubr.msk.bf16.mxu0 %vm2383_vm0, %v5884_v11 }
 0x238   : > { %2734 = vmatmul.mubr.bf16.gmra.mxu1 %v5861_v15 }
 0x239   : > { %2986 = vmatprep.mubr.msk.bf16.mxu1 %vm2383_vm0, %v5884_v11 }
 0x23c   : > { %2651 = vmatmul.mubr.bf16.gmra.mxu0 %v5921_v62 }
 0x23d   : > { %2981 = vmatprep.mubr.msk.bf16.mxu0 %vm2383_vm0, %v5946_v7 }
 0x240   : > { %2744 = vmatmul.mubr.bf16.gmra.mxu1 %v5921_v62  ;;  %v6223_v37 = vpop.permute.xlu1 %2286 }
 0x241   : > { %2987 = vmatprep.mubr.msk.bf16.mxu1 %vm2383_vm0, %v5946_v7 }
 0x244   : > { %2661 = vmatmul.mubr.bf16.gmra.mxu0 %v5979_v58 }
 0x245   : > { %2982 = vmatprep.mubr.msk.bf16.mxu0 %vm2383_vm0, %v5993_v56 }
 0x248   : > { %2754 = vmatmul.mubr.bf16.gmra.mxu1 %v5979_v58  ;;  %v6225_v58 = vpop.permute.xlu0 %2282  ;;  %v6227_v9 = vpop.permute.xlu1 %2290 }
 0x249   : > { %2988 = vmatprep.mubr.msk.bf16.mxu1 %vm2383_vm0, %v5993_v56 }
 0x24c   : > { %2671 = vmatmul.mubr.bf16.gmra.mxu0 %v6030_v28  ;;  %v6229_v49 = vpop.permute.xlu0 %2294 }
 0x24d   : > { %v6231_v39 = vpop.permute.xlu1 %2306 }
 0x250   : > { %2764 = vmatmul.mubr.bf16.gmra.mxu1 %v6030_v28  ;;  %v6233_v27 = vpop.permute.xlu0 %2310 }
 0x254   : > { %v6237_v30 = vpop.permute.xlu0 %2318 }
 0x255   : > { %v6235_v0 = vpop.permute.xlu1 %2314 }
 0x258   : > { %v6253_v38 = vpop.permute.xlu0 %2302 }
 0x259   : > { %7303 = vst [vmem:[#allocation97_spill] sm:$0xff] %v6253_v38 }
 0x25d   : > { %v6241_v21 = vpop.permute.xlu1 %2298 }
 0x28e   : > { %v2436_v63 = vpop.f32.mrf.mxu0  ;;  %v2529_v25 = vpop.f32.mrf.mxu1 }
 0x28f   : > { %v2437_v4 = vadd.f32 %v2436_v63, %v6225_v58  ;;  %v2530_v61 = vadd.f32 %v2529_v25, %v6225_v58 }
 0x290   : > { %v2438_v52 = vpop.f32.mrf.mxu0  ;;  %v2531_v57 = vpop.f32.mrf.mxu1 }
 0x291   : > { %v2439_v44 = vadd.f32 %v2438_v52, %v6225_v58  ;;  %v2532_v13 = vadd.f32 %v2531_v57, %v6225_v58 }
 0x292   : > { %v2440_v60 = vpop.f32.mrf.mxu0  ;;  %v2533_v8 = vpop.f32.mrf.mxu1 }
 0x293   : > { %v2441_v17 = vadd.f32 %v2440_v60, %v6223_v37  ;;  %v2534_v45 = vadd.f32 %v2533_v8, %v6223_v37 }
 0x294   : > { %v2442_v15 = vpop.f32.mrf.mxu0  ;;  %v2535_v11 = vpop.f32.mrf.mxu1 }
 0x295   : > { %v2443_v16 = vadd.f32 %v2442_v15, %v6223_v37  ;;  %v2536_v34 = vadd.f32 %v2535_v11, %v6223_v37 }
 0x296   : > { %v2446_v62 = vpop.f32.mrf.mxu0  ;;  %v2539_v7 = vpop.f32.mrf.mxu1 }
 0x297   : > { %v2447_v6 = vadd.f32 %v2446_v62, %v6227_v9  ;;  %v2540_v19 = vadd.f32 %v2539_v7, %v6227_v9 }
 0x298   : > { %v2448_v43 = vpop.f32.mrf.mxu0  ;;  %v2541_v56 = vpop.f32.mrf.mxu1 }
 0x299   : > { %v2449_v50 = vadd.f32 %v2448_v43, %v6227_v9  ;;  %v2542_v1 = vadd.f32 %v2541_v56, %v6227_v9 }
 0x29a   : > { %v2450_v46 = vpop.f32.mrf.mxu0  ;;  %v2543_v28 = vpop.f32.mrf.mxu1 }
 0x29b   : > { %v2451_v32 = vadd.f32 %v2450_v46, %v6229_v49  ;;  %v6257_v22 = vadd.f32 %v2543_v28, %v6229_v49 }
 0x29c   : > { %v2452_v26 = vpop.f32.mrf.mxu0  ;;  %v2545_v2 = vpop.f32.mrf.mxu1 }
 0x29d   : > { %v6260_v29 = vadd.f32 %v2452_v26, %v6229_v49  ;;  %v6263_v36 = vadd.f32 %v2545_v2, %v6229_v49 }
 0x29e   : > { %v2456_v18 = vpop.f32.mrf.mxu0  ;;  %v2549_v35 = vpop.f32.mrf.mxu1 }
 0x29f   : > { %v2457_v48 = vadd.f32 %v2456_v18, %v6241_v21  ;;  %v2550_v31 = vadd.f32 %v2549_v35, %v6241_v21 }
 0x2a0   : > { %v2458_v33 = vpop.f32.mrf.mxu0  ;;  %v2551_v3 = vpop.f32.mrf.mxu1 }
 0x2a1   : > { %v6266_v20 = vadd.f32 %v2458_v33, %v6241_v21  ;;  %v6269_v23 = vadd.f32 %v2551_v3, %v6241_v21 }
 0x2a2   : > { %v2460_v41 = vpop.f32.mrf.mxu0  ;;  %v2553_v10 = vpop.f32.mrf.mxu1 }
 0x2a3   : > { %v6278_v15 = vadd.f32 %v2460_v41, %v6253_v38  ;;  %v6284_v43 = vadd.f32 %v2553_v10, %v6253_v38  ;;  %v6297_v41 = vpop.permute.xlu1 %2322 }
 0x2a4   : > { %v2462_v40 = vpop.f32.mrf.mxu0  ;;  %v2555_v5 = vpop.f32.mrf.mxu1 }
 0x2a5   : > { %v6290_v18 = vadd.f32 %v2462_v40, %v6253_v38  ;;  %v6293_v35 = vadd.f32 %v2555_v5, %v6253_v38 }
 0x2a6   : > { %v2466_v55 = vpop.f32.mrf.mxu0  ;;  %v2559_v53 = vpop.f32.mrf.mxu1 }
 0x2a7   : > { %v2467_v63 = vadd.f32 %v2466_v55, %v6231_v39  ;;  %v2560_v25 = vadd.f32 %v2559_v53, %v6231_v39 }
 0x2a8   : > { %v2468_v59 = vpop.f32.mrf.mxu0  ;;  %v2561_v12 = vpop.f32.mrf.mxu1 }
 0x2a9   : > { %v2469_v11 = vadd.f32 %v2468_v59, %v6231_v39  ;;  %v2562_v62 = vadd.f32 %v2561_v12, %v6231_v39  ;;  %v2774_v10 = vmul.f32 %v2467_v63, %v2437_v4  ;;  %v2776_v55 = vmul.f32 %v2560_v25, %v2530_v61 }
 0x2aa   : > { %v2470_v24 = vpop.f32.mrf.mxu0  ;;  %v2563_v47 = vpop.f32.mrf.mxu1 }
 0x2ab   : > { %v2471_v56 = vadd.f32 %v2470_v24, %v6233_v27  ;;  %v2564_v46 = vadd.f32 %v2563_v47, %v6233_v27  ;;  %v2775_v47 = vmul.f32 %v2469_v11, %v2439_v44  ;;  %v2777_v40 = vmul.f32 %v2562_v62, %v2532_v13 }
 0x2ac   : > { %v2472_v42 = vpop.f32.mrf.mxu0  ;;  %v2565_v51 = vpop.f32.mrf.mxu1 }
 0x2ad   : > { %v2473_v33 = vadd.f32 %v2472_v42, %v6233_v27  ;;  %v2566_v3 = vadd.f32 %v2565_v51, %v6233_v27 }
 0x2ae   : > { %v2476_v54 = vpop.f32.mrf.mxu0  ;;  %v2569_v14 = vpop.f32.mrf.mxu1 }
 0x2af   : > { %v2477_v52 = vadd.f32 %v2476_v54, %v6235_v0  ;;  %v2570_v57 = vadd.f32 %v2569_v14, %v6235_v0  ;;  %v2782_v14 = vmul.f32 %v2471_v56, %v2441_v17  ;;  %v2783_v38 = vmul.f32 %v2473_v33, %v2443_v16 }
 0x2b0   : > { %v2478_v60 = vpop.f32.mrf.mxu0  ;;  %v2571_v8 = vpop.f32.mrf.mxu1  ;;  %v2785_v4 = vmul.f32 %v2566_v3, %v2536_v34 }
 0x2b1   : > { %v2479_v7 = vadd.f32 %v2478_v60, %v6235_v0  ;;  %v2572_v28 = vadd.f32 %v2571_v8, %v6235_v0  ;;  %v2790_v53 = vmul.f32 %v2477_v52, %v2447_v6  ;;  %v2792_v59 = vmul.f32 %v2570_v57, %v2540_v19 }
 0x2b2   : > { %v2480_v26 = vpop.f32.mrf.mxu0  ;;  %v2573_v2 = vpop.f32.mrf.mxu1  ;;  %v2784_v60 = vmul.f32 %v2564_v46, %v2534_v45 }
 0x2b3   : > { %v2791_v54 = vmul.f32 %v2479_v7, %v2449_v50  ;;  %v2481_v5 = vadd.f32 %v2480_v26, %v6237_v30  ;;  %v2793_v42 = vmul.f32 %v2572_v28, %v2542_v1  ;;  %v2574_v51 = vadd.f32 %v2573_v2, %v6237_v30  ;;  %v6308_v1 = vpop.permute.xlu0 %2326 }
 0x2b4   : > { %v2482_v12 = vpop.f32.mrf.mxu0  ;;  %v2575_v24 = vpop.f32.mrf.mxu1  ;;  %v2806_v44 = vadd.f32 %v2790_v53, %v2774_v10  ;;  %v2808_v13 = vadd.f32 %v2792_v59, %v2776_v55 }
 0x2b5   : > { %v2483_v61 = vadd.f32 %v2482_v12, %v6237_v30  ;;  %v2576_v50 = vadd.f32 %v2575_v24, %v6237_v30  ;;  %v2807_v63 = vadd.f32 %v2791_v54, %v2775_v47  ;;  %v2798_v25 = vmul.f32 %v2481_v5, %v2451_v32 }
 0x2b6   : > { %v2486_v8 = vpop.f32.mrf.mxu0  ;;  %v2809_v57 = vadd.f32 %v2793_v42, %v2777_v40  ;;  %v2800_v11 = vmul.f32 %v2574_v51, %v6257_v22 }
 0x2b7   : > { %v2487_v6 = vadd.f32 %v2486_v8, %v6297_v41  ;;  %v2579_v19 = vpop.f32.mrf.mxu1  ;;  %v2799_v46 = vmul.f32 %v2483_v61, %v6260_v29  ;;  %v2801_v32 = vmul.f32 %v2576_v50, %v6263_v36 }
 0x2b8   : > { %v2580_v17 = vadd.f32 %v2579_v19, %v6297_v41  ;;  %v2488_v45 = vpop.f32.mrf.mxu0 }
 0x2b9   : > { %v2822_v16 = vmul.f32 %v2487_v6, %v2457_v48  ;;  %v2489_v34 = vadd.f32 %v2488_v45, %v6297_v41  ;;  %v2581_v52 = vpop.f32.mrf.mxu1  ;;  %v2815_v24 = vadd.f32 %v2799_v46, %v2783_v38 }
 0x2ba   : > { %v2824_v62 = vmul.f32 %v2580_v17, %v2550_v31  ;;  %v2582_v7 = vadd.f32 %v2581_v52, %v6297_v41  ;;  %v2490_v56 = vpop.f32.mrf.mxu0  ;;  %v2814_v31 = vadd.f32 %v2798_v25, %v2782_v14 }
 0x2bb   : > { %v2838_v28 = vadd.f32 %v2822_v16, %v2806_v44  ;;  %v2823_v26 = vmul.f32 %v2489_v34, %v6266_v20  ;;  %v2491_v2 = vadd.f32 %v2490_v56, %v6308_v1  ;;  %v2583_v33 = vpop.f32.mrf.mxu1 }
 0x2bc   : > { %v2840_v48 = vadd.f32 %v2824_v62, %v2808_v13  ;;  %v2825_v3 = vmul.f32 %v2582_v7, %v6269_v23  ;;  %v2584_v10 = vadd.f32 %v2583_v33, %v6308_v1  ;;  %v2492_v22 = vpop.f32.mrf.mxu0  ;;  %v2816_v23 = vadd.f32 %v2800_v11, %v2784_v60 }
 0x2bd   : > { %2854 = vst [vmem:[%s6319_s7] sm:$0xff] %v2838_v28  ;;  %v2839_v29 = vadd.f32 %v2823_v26, %v2807_v63  ;;  %v2830_v20 = vmul.f32 %v2491_v2, %v6278_v15  ;;  %v2493_v36 = vadd.f32 %v2492_v22, %v6308_v1  ;;  %v2585_v55 = vpop.f32.mrf.mxu1  ;;  %v2817_v15 = vadd.f32 %v2801_v32, %v2785_v4 }
 0x2be   : > { %2856 = vst [vmem:[%s6319_s7 + $0x10] sm:$0xff] %v2840_v48  ;;  %v2841_v53 = vadd.f32 %v2825_v3, %v2809_v57  ;;  %v2832_v59 = vmul.f32 %v2584_v10, %v6284_v43  ;;  %v2586_v12 = vadd.f32 %v2585_v55, %v6308_v1 }
 0x2bf   : > { %2855 = vst [vmem:[%s6319_s7 + $0x8] sm:$0xff] %v2839_v29  ;;  %v2846_v47 = vadd.f32 %v2830_v20, %v2814_v31  ;;  %v2831_v40 = vmul.f32 %v2493_v36, %v6290_v18 }
 0x2c0   : > { %2857 = vst [vmem:[%s6319_s7 + $0x18] sm:$0xff] %v2841_v53  ;;  %v2848_v54 = vadd.f32 %v2832_v59, %v2816_v23  ;;  %v2833_v5 = vmul.f32 %v2586_v12, %v6293_v35 }
 0x2c1   : > { %2862 = vst [vmem:[%s6319_s7 + $0x40] sm:$0xff] %v2846_v47  ;;  %v2847_v14 = vadd.f32 %v2831_v40, %v2815_v24 }
 0x2c2   : > { %2864 = vst [vmem:[%s6319_s7 + $0x50] sm:$0xff] %v2848_v54  ;;  %v2849_v60 = vadd.f32 %v2833_v5, %v2817_v15 }
 0x2c3   : > { %2863 = vst [vmem:[%s6319_s7 + $0x48] sm:$0xff] %v2847_v14 }
 0x2c4   : > { %2865 = vst [vmem:[%s6319_s7 + $0x58] sm:$0xff] %v2849_v60 }
 0x2e4   : > { %v2622_v42 = vpop.f32.mrf.mxu0 }
 0x2e5   : > { %v2623_v33 = vadd.f32 %v2622_v42, %v6225_v58 }
 0x2e6   : > { %v2624_v43 = vpop.f32.mrf.mxu0 }
 0x2e7   : > { %v2625_v48 = vadd.f32 %v2624_v43, %v6225_v58 }
 0x2e8   : > { %v2715_v51 = vpop.f32.mrf.mxu1  ;;  %v2626_v8 = vpop.f32.mrf.mxu0 }
 0x2e9   : > { %v2716_v32 = vadd.f32 %v2715_v51, %v6225_v58  ;;  %v2627_v10 = vadd.f32 %v2626_v8, %v6223_v37 }
 0x2ea   : > { %v2717_v38 = vpop.f32.mrf.mxu1  ;;  %v2628_v61 = vpop.f32.mrf.mxu0 }
 0x2eb   : > { %v2718_v3 = vadd.f32 %v2717_v38, %v6225_v58  ;;  %v2629_v31 = vadd.f32 %v2628_v61, %v6223_v37 }
 0x2ec   : > { %v2719_v6 = vpop.f32.mrf.mxu1  ;;  %v2632_v19 = vpop.f32.mrf.mxu0 }
 0x2ed   : > { %v2720_v22 = vadd.f32 %v2719_v6, %v6223_v37  ;;  %v2633_v55 = vadd.f32 %v2632_v19, %v6227_v9  ;;  %v7304_v19 = vld [vmem:[#allocation97_spill] sm:$0xff] }
 0x2ee   : > { %v2721_v18 = vpop.f32.mrf.mxu1  ;;  %v2634_v4 = vpop.f32.mrf.mxu0 }
 0x2ef   : > { %v6345_v36 = vadd.f32 %v2721_v18, %v6223_v37  ;;  %v2635_v53 = vadd.f32 %v2634_v4, %v6227_v9 }
 0x2f0   : > { %v2725_v44 = vpop.f32.mrf.mxu1  ;;  %v2636_v13 = vpop.f32.mrf.mxu0 }
 0x2f1   : > { %v2726_v23 = vadd.f32 %v2725_v44, %v6227_v9  ;;  %v2637_v58 = vadd.f32 %v2636_v13, %v6229_v49 }
 0x2f2   : > { %v2727_v50 = vpop.f32.mrf.mxu1  ;;  %v2638_v35 = vpop.f32.mrf.mxu0 }
 0x2f3   : > { %v2728_v59 = vadd.f32 %v2727_v50, %v6227_v9  ;;  %v2639_v24 = vadd.f32 %v2638_v35, %v6229_v49 }
 0x2f4   : > { %v2729_v17 = vpop.f32.mrf.mxu1  ;;  %v2642_v45 = vpop.f32.mrf.mxu0 }
 0x2f5   : > { %v6353_v12 = vadd.f32 %v2729_v17, %v6229_v49  ;;  %v2643_v15 = vadd.f32 %v2642_v45, %v6241_v21 }
 0x2f6   : > { %v2731_v63 = vpop.f32.mrf.mxu1  ;;  %v2644_v25 = vpop.f32.mrf.mxu0 }
 0x2f7   : > { %v6357_v37 = vadd.f32 %v2731_v63, %v6229_v49  ;;  %v2645_v54 = vadd.f32 %v2644_v25, %v6241_v21 }
 0x2f8   : > { %v2735_v16 = vpop.f32.mrf.mxu1  ;;  %v2646_v34 = vpop.f32.mrf.mxu0 }
 0x2f9   : > { %v2736_v9 = vadd.f32 %v2735_v16, %v6241_v21  ;;  %v2647_v18 = vadd.f32 %v2646_v34, %v7304_v19 }
 0x2fa   : > { %v2737_v52 = vpop.f32.mrf.mxu1  ;;  %v2648_v57 = vpop.f32.mrf.mxu0 }
 0x2fb   : > { %v2738_v6 = vadd.f32 %v2737_v52, %v6241_v21 }
 0x2fc   : > { %v2739_v11 = vpop.f32.mrf.mxu1  ;;  %v2652_v62 = vpop.f32.mrf.mxu0 }
 0x2fd   : > { %v2653_v14 = vadd.f32 %v2652_v62, %v6231_v39  ;;  %v6375_v35 = vadd.f32 %v2739_v11, %v7304_v19 }
 0x2fe   : > { %v6335_v7 = vpop.f32.mrf.mxu1  ;;  %v2654_v56 = vpop.f32.mrf.mxu0 }
 0x2ff   : > { %v2655_v42 = vadd.f32 %v2654_v56, %v6231_v39  ;;  %v2778_v63 = vmul.f32 %v2653_v14, %v2623_v33 }
 0x300   : > { %v2745_v46 = vpop.f32.mrf.mxu1  ;;  %v2656_v28 = vpop.f32.mrf.mxu0 }
 0x301   : > { %v2746_v60 = vadd.f32 %v2745_v46, %v6231_v39  ;;  %v2657_v49 = vadd.f32 %v2656_v28, %v6233_v27  ;;  %v2779_v16 = vmul.f32 %v2655_v42, %v2625_v48 }
 0x302   : > { %v2747_v26 = vpop.f32.mrf.mxu1  ;;  %v2658_v2 = vpop.f32.mrf.mxu0 }
 0x303   : > { %v2748_v8 = vadd.f32 %v2747_v26, %v6231_v39  ;;  %v2659_v4 = vadd.f32 %v2658_v2, %v6233_v27  ;;  %v2649_v39 = vadd.f32 %v2648_v57, %v7304_v19  ;;  %v2780_v25 = vmul.f32 %v2746_v60, %v2716_v32 }
 0x304   : > { %v2749_v29 = vpop.f32.mrf.mxu1  ;;  %v2662_v20 = vpop.f32.mrf.mxu0  ;;  %v2786_v56 = vmul.f32 %v2657_v49, %v2627_v10 }
 0x305   : > { %v2663_v5 = vadd.f32 %v2662_v20, %v6235_v0  ;;  %v2750_v17 = vadd.f32 %v2749_v29, %v6233_v27  ;;  %v2781_v62 = vmul.f32 %v2748_v8, %v2718_v3  ;;  %v2787_v26 = vmul.f32 %v2659_v4, %v2629_v31 }
 0x306   : > { %v2751_v47 = vpop.f32.mrf.mxu1  ;;  %v2664_v40 = vpop.f32.mrf.mxu0 }
 0x307   : > { %v2665_v61 = vadd.f32 %v2664_v40, %v6235_v0  ;;  %v2794_v45 = vmul.f32 %v2663_v5, %v2633_v55  ;;  %v2788_v55 = vmul.f32 %v2750_v17, %v2720_v22  ;;  %v2752_v33 = vadd.f32 %v2751_v47, %v6233_v27 }
 0x308   : > { %v2755_v43 = vpop.f32.mrf.mxu1  ;;  %v2666_v51 = vpop.f32.mrf.mxu0 }
 0x309   : > { %v2756_v38 = vadd.f32 %v2755_v43, %v6235_v0  ;;  %v2667_v13 = vadd.f32 %v2666_v51, %v6237_v30  ;;  %v2795_v28 = vmul.f32 %v2665_v61, %v2635_v53  ;;  %v2810_v32 = vadd.f32 %v2794_v45, %v2778_v63 }
 0x30a   : > { %v2757_v44 = vpop.f32.mrf.mxu1  ;;  %v2668_v50 = vpop.f32.mrf.mxu0 }
 0x30b   : > { %v2758_v21 = vadd.f32 %v2757_v44, %v6235_v0  ;;  %v2796_v46 = vmul.f32 %v2756_v38, %v2726_v23  ;;  %v2802_v2 = vmul.f32 %v2667_v13, %v2637_v58  ;;  %v2669_v11 = vadd.f32 %v2668_v50, %v6237_v30 }
 0x30c   : > { %v2759_v34 = vpop.f32.mrf.mxu1  ;;  %v2672_v52 = vpop.f32.mrf.mxu0  ;;  %v2811_v40 = vadd.f32 %v2795_v28, %v2779_v16 }
 0x30d   : > { %v2673_v57 = vadd.f32 %v2672_v52, %v6297_v41  ;;  %v2760_v0 = vadd.f32 %v2759_v34, %v6237_v30  ;;  %v2797_v48 = vmul.f32 %v2758_v21, %v2728_v59  ;;  %v2812_v58 = vadd.f32 %v2796_v46, %v2780_v25 }
 0x30e   : > { %v2761_v20 = vpop.f32.mrf.mxu1  ;;  %v2674_v29 = vpop.f32.mrf.mxu0  ;;  %v2818_v14 = vadd.f32 %v2802_v2, %v2786_v56  ;;  %v2803_v27 = vmul.f32 %v2669_v11, %v2639_v24 }
 0x30f   : > { %v2762_v3 = vadd.f32 %v2761_v20, %v6237_v30  ;;  %v2826_v10 = vmul.f32 %v2673_v57, %v2643_v15  ;;  %v2675_v31 = vadd.f32 %v2674_v29, %v6297_v41  ;;  %v2804_v30 = vmul.f32 %v2760_v0, %v6353_v12 }
 0x310   : > { %v2765_v23 = vpop.f32.mrf.mxu1  ;;  %v2676_v53 = vpop.f32.mrf.mxu0  ;;  %v2813_v8 = vadd.f32 %v2797_v48, %v2781_v62 }
 0x311   : > { %v2766_v5 = vadd.f32 %v2765_v23, %v6297_v41  ;;  %v2677_v22 = vadd.f32 %v2676_v53, %v6308_v1  ;;  %v2842_v47 = vadd.f32 %v2826_v10, %v2810_v32  ;;  %v2827_v60 = vmul.f32 %v2675_v31, %v2645_v54 }
 0x312   : > { %v2767_v42 = vpop.f32.mrf.mxu1  ;;  %v2678_v59 = vpop.f32.mrf.mxu0  ;;  %v2805_v49 = vmul.f32 %v2762_v3, %v6357_v37  ;;  %v2819_v37 = vadd.f32 %v2803_v27, %v2787_v26  ;;  %v2820_v50 = vadd.f32 %v2804_v30, %v2788_v55 }
 0x313   : > { %v2828_v15 = vmul.f32 %v2766_v5, %v2736_v9  ;;  %v2768_v43 = vadd.f32 %v2767_v42, %v6297_v41  ;;  %v2834_v51 = vmul.f32 %v2677_v22, %v2647_v18  ;;  %2858 = vst [vmem:[%s6319_s7 + $0x20] sm:$0xff] %v2842_v47  ;;  %v2843_v38 = vadd.f32 %v2827_v60, %v2811_v40 }
 0x314   : > { %v2769_v61 = vpop.f32.mrf.mxu1  ;;  %v2679_v24 = vadd.f32 %v2678_v59, %v6308_v1  ;;  %v2742_v41 = vadd.f32 %v6335_v7, %v7304_v19  ;;  %v2789_v18 = vmul.f32 %v2752_v33, %v6345_v36 }
 0x315   : > { %v2844_v54 = vadd.f32 %v2828_v15, %v2812_v58  ;;  %v2829_v4 = vmul.f32 %v2768_v43, %v2738_v6  ;;  %v2850_v12 = vadd.f32 %v2834_v51, %v2818_v14  ;;  %v2770_v9 = vadd.f32 %v2769_v61, %v6308_v1  ;;  %2859 = vst [vmem:[%s6319_s7 + $0x28] sm:$0xff] %v2843_v38 }
 0x316   : > { %v2835_v44 = vmul.f32 %v2679_v24, %v2649_v39  ;;  %v2771_v13 = vpop.f32.mrf.mxu1  ;;  %v2821_v19 = vadd.f32 %v2805_v49, %v2789_v18 }
 0x317   : > { %2860 = vst [vmem:[%s6319_s7 + $0x30] sm:$0xff] %v2844_v54  ;;  %v2845_v6 = vadd.f32 %v2829_v4, %v2813_v8  ;;  %2866 = vst [vmem:[%s6319_s7 + $0x60] sm:$0xff] %v2850_v12  ;;  %v2836_v17 = vmul.f32 %v2770_v9, %v6375_v35  ;;  %v2772_v7 = vadd.f32 %v2771_v13, %v6308_v1 }
 0x318   : > { %v2851_v36 = vadd.f32 %v2835_v44, %v2819_v37 }
 0x319   : > { %2861 = vst [vmem:[%s6319_s7 + $0x38] sm:$0xff] %v2845_v6  ;;  %v2852_v39 = vadd.f32 %v2836_v17, %v2820_v50  ;;  %v2837_v45 = vmul.f32 %v2772_v7, %v2742_v41 }
 0x31a   : > { %2867 = vst [vmem:[%s6319_s7 + $0x68] sm:$0xff] %v2851_v36 }
 0x31b   : > { %2868 = vst [vmem:[%s6319_s7 + $0x70] sm:$0xff] %v2852_v39  ;;  %v2853_v1 = vadd.f32 %v2837_v45, %v2821_v19 }
 0x31d   : > { %2869 = vst [vmem:[%s6319_s7 + $0x78] sm:$0xff] %v2853_v1 }
 0x31e   : > { %3145 = shalt.err (!%p3142_p3)
}
 0x31f   : > { %s3146_s26 = scalar_lea.hbm %s6408_s17, 2048  ;;  %s3150_s29 = scalar_lea.hbm %s6460_s3, 4096 }
 0x320   : > { %p3147_p4 = scmp.ne.s32.totalorder %s6408_s17, %s3146_s26  ;;  %p3151_p9 = scmp.lt.s32.totalorder %s6408_s17, %s6460_s3 }
 0x321   : > { %p3152_p10 = scmp.lt.s32.totalorder %s3150_s29, %s3146_s26 }
 0x322   : > { %p3148_p7 = pnand %p3147_p4, %p3261_p5 }
 0x323   : > { %p3153_p11 = por %p3152_p10, %p3151_p9 }
 0x324   : > { %p3149_p8 = pneg %p3148_p7 }
 0x326   : > { %p3154_p12 = pnand %p3153_p11, %p3149_p8 }
 0x328   : > { %3157 = shalt.err (!%p3154_p12)
}
 0x329   : > { %s3200_s5 = smov 1024   ;;  %s3201_s6 = smov 2048  }
 0x32a   : > { %s3202_s7 = smov 64  }
 0x32b   : > { %2995 = dma.vmem_to_hbm [thread:$0]  (%p3261_p5), %s6411_s9, 2048, %s6408_s17, %s6417_s19, %s3200_s5, %s3201_s6, %s3202_s7  }
 0x32c PF: > { %p3001_p13 = scmp.ge.s32.totalorder %s3192_s15, 2  ;;  %s2899_s8 = sand.u32 1, %s3180_s12  }
 0x32d   : > { %s2900_s10 = scalar_lea.sflag [#allocation3], %s2899_s8 }
 0x32e   : > { %p2998_p0 = pnand %p3001_p13, %p3265_p6 }
 0x330   : > { %p2999_p1 = pneg %p2998_p0 }
 0x332   : > { %3175 = dma.done.wait (%p2999_p1), %s2900_s10, 2048  }
 0x333   : > { %3177 = vsyncadd (%p2999_p1), %s2900_s10, 4294965248  ;;  %p13_p2 = scmp.ge.s32.totalorder %s3248_s18, 4   ;;  %s7305_s12 = smov %s3184_s13 }
 0x334   : > { %s7306_s13 = smov %s3188_s14  ;;  %s7307_s14 = smov %s3259_s21 }
 0x335   : > { %s7308_s15 = smov %s3248_s18  ;;  %15 = sbr.rel (!%p13_p2) target bundleno = 3 (0x3), region = 67 }
 0x33a   :  { %2905 = vsyncpa [#allocation3], 1 }
 0x33b   :  { %2907 = vsyncpa [#allocation3 + $0x1], 1 }

</bundles_post_ra>
